<compile_context>
chip_gen: v5e
topology: v5e:2x2
jax: 0.10.0
libtpu: 0.0.40
codegen_flags: <defaults>
</compile_context>

<pallas_src>
import functools

import jax
import jax.numpy as jnp
from jax.experimental import pallas as pl
from jax.experimental.pallas import tpu as pltpu


def _sft_kernel(x0_ref, x1_ref, w0_ref, b0_ref, w1_ref, b1_ref, out_ref,
                src_ref, tpad_ref, *, H, W, PAD):
    """One batch element per grid step.

    x0_ref : (1, M, C)        feature to modulate            (M = H*W)
    x1_ref : (1, M, Crep)     condition (unpadded)
    w0_ref : (9*Crep, 2C)     fused conv0 weight (im2col form)
    b0_ref : (1, 2C)
    w1_ref : (9*2C, 2C)       fused block-diagonal conv1 weight
    b1_ref : (1, 2C)
    out_ref: (1, M, C)
    src_ref : VMEM (M + 2*PAD, Crep)  row-halo scratch for the conv0 input
    tpad_ref: VMEM (M + 2*PAD, 2C)    row-halo scratch for the conv1 input
    """
    M = H * W
    C2 = w0_ref.shape[-1]            # 2 * num_feat (scale ++ shift channels)
    C = C2 // 2
    Crep = x1_ref.shape[-1]

    # Column index of every flat output position -> validity masks for the
    # dx = -1 / dx = +1 taps (dy out-of-range taps read the zero halo rows,
    # so they need no mask).
    pos = jax.lax.broadcasted_iota(jnp.int32, (M, 1), 0)
    if W & (W - 1) == 0:             # power-of-two width: avoid vector mod
        col = pos & (W - 1)
    else:
        col = pos % W
    mask_l = (col >= 1).astype(jnp.float32)        # valid where c - 1 >= 0
    mask_r = (col < W - 1).astype(jnp.float32)     # valid where c + 1 <  W

    def im2col(read_window, cin):
        # read_window(s) returns the (M, cin) window shifted by s flat rows.
        ml = jnp.broadcast_to(mask_l, (M, cin))    # hoisted: 2 broadcasts/conv
        mr = jnp.broadcast_to(mask_r, (M, cin))
        cols = []
        for dy in (-1, 0, 1):
            for dx in (-1, 0, 1):
                piece = read_window(dy * W + dx)
                if dx < 0:
                    piece = piece * ml
                elif dx > 0:
                    piece = piece * mr
                cols.append(piece)
        return jnp.concatenate(cols, axis=-1)      # (M, 9 * cin)

    # ---- stage the condition into its flat-row zero-halo scratch ----
    # Only the halo rows are zero-filled; the interior is fully overwritten
    # every step (no program_id gating -> safe under megacore scheduling).
    src_ref[0:PAD, :] = jnp.zeros((PAD, Crep), jnp.float32)
    src_ref[M + PAD:, :] = jnp.zeros((PAD, Crep), jnp.float32)
    src_ref[PAD:M + PAD, :] = x1_ref[0].astype(jnp.float32)

    # ---- fused conv0 (scale & shift share one im2col matmul) + leaky_relu ----
    p0 = im2col(lambda s: src_ref[pl.ds(PAD + s, M), :], Crep)
    t = jnp.dot(p0, w0_ref[...], preferred_element_type=jnp.float32) + b0_ref[...]
    t = jnp.where(t > 0, t, 0.01 * t)

    # ---- fused conv1 (block-diagonal weight) ----
    tpad_ref[0:PAD, :] = jnp.zeros((PAD, C2), jnp.float32)
    tpad_ref[M + PAD:, :] = jnp.zeros((PAD, C2), jnp.float32)
    tpad_ref[PAD:M + PAD, :] = t
    p1 = im2col(lambda s: tpad_ref[pl.ds(PAD + s, M), :], C2)
    y = jnp.dot(p1, w1_ref[...], preferred_element_type=jnp.float32) + b1_ref[...]

    # ---- SFT modulation: out = x0 * scale + shift ----
    scale = y[:, :C]
    shift = y[:, C:]
    out_ref[0] = (x0_ref[0].astype(jnp.float32) * scale + shift
                  ).astype(out_ref.dtype)


def sft_layer_3x3(x0, x1, params):
    """x0: (N, H, W, num_feat) NHWC, x1: (N, H, W, rep_feat) NHWC."""
    N, H, W, C = x0.shape
    Crep = x1.shape[-1]
    ws0, bs0, ws1, bs1, wh0, bh0, wh1, bh1 = params
    C2 = 2 * C
    M = H * W
    PAD = ((W + 1 + 7) // 8) * 8     # sublane-aligned flat-row halo, >= W + 1

    # ---- one-time parameter packing (XLA glue) ----
    # fused conv0: output channels [0:C) = scale branch, [C:2C) = shift branch
    w0 = jnp.concatenate([ws0, wh0], axis=3).reshape(9 * Crep, C2)
    b0 = jnp.concatenate([bs0, bh0]).reshape(1, C2)
    # fused conv1: block-diagonal so each branch only sees its own channels
    z = jnp.zeros((3, 3, C, C), ws1.dtype)
    w1 = jnp.concatenate(
        [jnp.concatenate([ws1, z], axis=3),
         jnp.concatenate([z, wh1], axis=3)], axis=2).reshape(9 * C2, C2)
    b1 = jnp.concatenate([bs1, bh1]).reshape(1, C2)

    # ---- flatten spatial dims (pure reshapes; halo is built in-kernel) ----
    x0f = x0.reshape(N, M, C)
    x1f = x1.reshape(N, M, Crep)

    kernel = functools.partial(_sft_kernel, H=H, W=W, PAD=PAD)

    out = pl.pallas_call(
        kernel,
        out_shape=jax.ShapeDtypeStruct((N, M, C), x0.dtype),
        grid_spec=pltpu.PrefetchScalarGridSpec(
            num_scalar_prefetch=0,
            grid=(N,),
            in_specs=[
                pl.BlockSpec((1, M, C), lambda b: (b, 0, 0)),
                pl.BlockSpec((1, M, Crep), lambda b: (b, 0, 0)),
                pl.BlockSpec((9 * Crep, C2), lambda b: (0, 0)),
                pl.BlockSpec((1, C2), lambda b: (0, 0)),
                pl.BlockSpec((9 * C2, C2), lambda b: (0, 0)),
                pl.BlockSpec((1, C2), lambda b: (0, 0)),
            ],
            out_specs=pl.BlockSpec((1, M, C), lambda b: (b, 0, 0)),
            scratch_shapes=[
                pltpu.VMEM((M + 2 * PAD, Crep), jnp.float32),
                pltpu.VMEM((M + 2 * PAD, C2), jnp.float32),
            ],
        ),
        compiler_params=pltpu.CompilerParams(
            dimension_semantics=("parallel",)),
    )(x0f, x1f, w0, b0, w1, b1)
    return out.reshape(N, H, W, C)


# ------------------------- pure-JAX reference -------------------------
def _conv3x3_ref(x, w, b):
    y = jax.lax.conv_general_dilated(
        x, w, window_strides=(1, 1), padding="SAME",
        dimension_numbers=("NHWC", "HWIO", "NHWC"))
    return y + b


def sft_layer_ref(x0, x1, params):
    ws0, bs0, ws1, bs1, wh0, bh0, wh1, bh1 = params
    lrelu = lambda t: jnp.where(t > 0, t, 0.01 * t)
    scale = _conv3x3_ref(lrelu(_conv3x3_ref(x1, ws0, bs0)), ws1, bs1)
    shift = _conv3x3_ref(lrelu(_conv3x3_ref(x1, wh0, bh0)), wh1, bh1)
    return x0 * scale + shift


if __name__ == "__main__":
    # batch=2, spatial=16x16, rep_feat=num_feat=64 (typical SFT layer widths,
    # which also keep every VMEM tile lane-dense).
    N, H, W = 2, 16, 16
    rep_feat, num_feat = 64, 64

    key = jax.random.PRNGKey(0)
    ks = jax.random.split(key, 10)

    x0 = jax.random.normal(ks[0], (N, H, W, num_feat), jnp.float32)   # feature
    x1 = jax.random.normal(ks[1], (N, H, W, rep_feat), jnp.float32)   # condition

    # deterministic synthetic parameters (HWIO weights, per-output-channel bias)
    params = (
        0.1 * jax.random.normal(ks[2], (3, 3, rep_feat, num_feat), jnp.float32),
        0.1 * jax.random.normal(ks[3], (num_feat,), jnp.float32),
        0.1 * jax.random.normal(ks[4], (3, 3, num_feat, num_feat), jnp.float32),
        0.1 * jax.random.normal(ks[5], (num_feat,), jnp.float32),
        0.1 * jax.random.normal(ks[6], (3, 3, rep_feat, num_feat), jnp.float32),
        0.1 * jax.random.normal(ks[7], (num_feat,), jnp.float32),
        0.1 * jax.random.normal(ks[8], (3, 3, num_feat, num_feat), jnp.float32),
        0.1 * jax.random.normal(ks[9], (num_feat,), jnp.float32),
    )

    out = jax.block_until_ready(sft_layer_3x3(x0, x1, params))
    ref = sft_layer_ref(x0, x1, params)

    assert out.shape == (N, H, W, num_feat)
    assert jnp.allclose(out, ref, atol=1e-3, rtol=1e-3), "mismatch vs reference"

    print("KERNEL_OK")
</pallas_src>

<mosaic_0001>
module attributes {stable_mosaic.version = 11 : i64} {
  func.func @_sft_kernel(%arg0: i32, %arg1: memref<1x256x64xf32, #tpu.memory_space<vmem>>, %arg2: memref<1x256x64xf32, #tpu.memory_space<vmem>>, %arg3: memref<576x128xf32, #tpu.memory_space<vmem>>, %arg4: memref<1x128xf32, #tpu.memory_space<vmem>>, %arg5: memref<1152x128xf32, #tpu.memory_space<vmem>>, %arg6: memref<1x128xf32, #tpu.memory_space<vmem>>, %arg7: memref<1x256x64xf32, #tpu.memory_space<vmem>>, %arg8: memref<304x64xf32, #tpu.memory_space<vmem>>, %arg9: memref<304x128xf32, #tpu.memory_space<vmem>>) attributes {dimension_semantics = [#tpu.dimension_semantics<parallel>], iteration_bounds = array<i64: 2>, scalar_prefetch = 0 : i64, scratch_operands = 2 : i64, tpu.core_type = #tpu.core_type<tc>, window_params = [{transform_indices = @transform_0, window_bounds = array<i64: 1, 256, 64>}, {transform_indices = @transform_1, window_bounds = array<i64: 1, 256, 64>}, {pipeline_mode = #tpu.pipeline_mode<synchronous>, transform_indices = @transform_2, window_bounds = array<i64: 576, 128>}, {pipeline_mode = #tpu.pipeline_mode<synchronous>, transform_indices = @transform_3, window_bounds = array<i64: 1, 128>}, {pipeline_mode = #tpu.pipeline_mode<synchronous>, transform_indices = @transform_4, window_bounds = array<i64: 1152, 128>}, {pipeline_mode = #tpu.pipeline_mode<synchronous>, transform_indices = @transform_5, window_bounds = array<i64: 1, 128>}, {transform_indices = @transform_6, window_bounds = array<i64: 1, 256, 64>}]} {
    %0 = tpu.iota {dimensions = array<i32: 0>} : vector<256x1xi32>
    %c15_i32 = arith.constant 15 : i32
    %1 = vector.broadcast %c15_i32 : i32 to vector<256x1xi32>
    %2 = arith.andi %0, %1 : vector<256x1xi32>
    %c1_i32 = arith.constant 1 : i32
    %3 = vector.broadcast %c1_i32 : i32 to vector<256x1xi32>
    %4 = arith.cmpi sge, %2, %3 : vector<256x1xi32>
    %5 = arith.extui %4 : vector<256x1xi1> to vector<256x1xi32>
    %6 = arith.sitofp %5 : vector<256x1xi32> to vector<256x1xf32>
    %c15_i32_0 = arith.constant 15 : i32
    %7 = vector.broadcast %c15_i32_0 : i32 to vector<256x1xi32>
    %8 = arith.cmpi slt, %2, %7 : vector<256x1xi32>
    %9 = arith.extui %8 : vector<256x1xi1> to vector<256x1xi32>
    %10 = arith.sitofp %9 : vector<256x1xi32> to vector<256x1xf32>
    %cst = arith.constant 0.000000e+00 : f32
    %11 = vector.broadcast %cst : f32 to vector<24x64xf32>
    %c0 = arith.constant 0 : index
    %c0_1 = arith.constant 0 : index
    %12 = vector.load %arg8[%c0, %c0_1] : memref<304x64xf32, #tpu.memory_space<vmem>>, vector<24x64xf32>
    tpu.vector_store %arg8[%c0, %c0_1], %11 {strides = array<i32>} : memref<304x64xf32, #tpu.memory_space<vmem>>, vector<24x64xf32>,
    %cst_2 = arith.constant 0.000000e+00 : f32
    %13 = vector.broadcast %cst_2 : f32 to vector<24x64xf32>
    %c280 = arith.constant 280 : index
    %c0_3 = arith.constant 0 : index
    %14 = vector.load %arg8[%c280, %c0_3] : memref<304x64xf32, #tpu.memory_space<vmem>>, vector<24x64xf32>
    tpu.vector_store %arg8[%c280, %c0_3], %13 {strides = array<i32>} : memref<304x64xf32, #tpu.memory_space<vmem>>, vector<24x64xf32>,
    %c0_4 = arith.constant 0 : index
    %c0_5 = arith.constant 0 : index
    %c0_6 = arith.constant 0 : index
    %15 = vector.load %arg2[%c0_4, %c0_5, %c0_6] : memref<1x256x64xf32, #tpu.memory_space<vmem>>, vector<1x256x64xf32>
    %16 = vector.shape_cast %15 : vector<1x256x64xf32> to vector<256x64xf32>
    %c24 = arith.constant 24 : index
    %c0_7 = arith.constant 0 : index
    %17 = vector.load %arg8[%c24, %c0_7] : memref<304x64xf32, #tpu.memory_space<vmem>>, vector<256x64xf32>
    tpu.vector_store %arg8[%c24, %c0_7], %16 {strides = array<i32>} : memref<304x64xf32, #tpu.memory_space<vmem>>, vector<256x64xf32>,
    %18 = vector.shape_cast %6 : vector<256x1xf32> to vector<256x1xf32>
    %19 = vector.broadcast %18 : vector<256x1xf32> to vector<256x64xf32>
    %20 = vector.shape_cast %10 : vector<256x1xf32> to vector<256x1xf32>
    %21 = vector.broadcast %20 : vector<256x1xf32> to vector<256x64xf32>
    %c7 = arith.constant 7 : index
    %c0_8 = arith.constant 0 : index
    %22 = vector.load %arg8[%c7, %c0_8] : memref<304x64xf32, #tpu.memory_space<vmem>>, vector<256x64xf32>
    %23 = arith.mulf %22, %19 : vector<256x64xf32>
    %c8 = arith.constant 8 : index
    %c0_9 = arith.constant 0 : index
    %24 = vector.load %arg8[%c8, %c0_9] : memref<304x64xf32, #tpu.memory_space<vmem>>, vector<256x64xf32>
    %c9 = arith.constant 9 : index
    %c0_10 = arith.constant 0 : index
    %25 = vector.load %arg8[%c9, %c0_10] : memref<304x64xf32, #tpu.memory_space<vmem>>, vector<256x64xf32>
    %26 = arith.mulf %25, %21 : vector<256x64xf32>
    %c23 = arith.constant 23 : index
    %c0_11 = arith.constant 0 : index
    %27 = vector.load %arg8[%c23, %c0_11] : memref<304x64xf32, #tpu.memory_space<vmem>>, vector<256x64xf32>
    %28 = arith.mulf %27, %19 : vector<256x64xf32>
    %c24_12 = arith.constant 24 : index
    %c0_13 = arith.constant 0 : index
    %29 = vector.load %arg8[%c24_12, %c0_13] : memref<304x64xf32, #tpu.memory_space<vmem>>, vector<256x64xf32>
    %c25 = arith.constant 25 : index
    %c0_14 = arith.constant 0 : index
    %30 = vector.load %arg8[%c25, %c0_14] : memref<304x64xf32, #tpu.memory_space<vmem>>, vector<256x64xf32>
    %31 = arith.mulf %30, %21 : vector<256x64xf32>
    %c39 = arith.constant 39 : index
    %c0_15 = arith.constant 0 : index
    %32 = vector.load %arg8[%c39, %c0_15] : memref<304x64xf32, #tpu.memory_space<vmem>>, vector<256x64xf32>
    %33 = arith.mulf %32, %19 : vector<256x64xf32>
    %c40 = arith.constant 40 : index
    %c0_16 = arith.constant 0 : index
    %34 = vector.load %arg8[%c40, %c0_16] : memref<304x64xf32, #tpu.memory_space<vmem>>, vector<256x64xf32>
    %c41 = arith.constant 41 : index
    %c0_17 = arith.constant 0 : index
    %35 = vector.load %arg8[%c41, %c0_17] : memref<304x64xf32, #tpu.memory_space<vmem>>, vector<256x64xf32>
    %36 = arith.mulf %35, %21 : vector<256x64xf32>
    %37 = tpu.concatenate %23, %24, %26, %28, %29, %31, %33, %34, %36 in 1 : vector<256x64xf32>, vector<256x64xf32>, vector<256x64xf32>, vector<256x64xf32>, vector<256x64xf32>, vector<256x64xf32>, vector<256x64xf32>, vector<256x64xf32>, vector<256x64xf32> -> vector<256x576xf32>
    %c0_18 = arith.constant 0 : index
    %c0_19 = arith.constant 0 : index
    %38 = vector.load %arg3[%c0_18, %c0_19] : memref<576x128xf32, #tpu.memory_space<vmem>>, vector<576x128xf32>
    %cst_20 = arith.constant dense<0.000000e+00> : vector<256x128xf32>
    %39 = tpu.matmul %37, %38, %cst_20 {dimension_numbers = #tpu.dot_dimension_numbers<[1], [0], [0], [1], [0, 0, 1, 1], [], []>} : vector<256x576xf32>, vector<576x128xf32>, vector<256x128xf32> -> vector<256x128xf32>
    %c0_21 = arith.constant 0 : index
    %c0_22 = arith.constant 0 : index
    %40 = vector.load %arg4[%c0_21, %c0_22] : memref<1x128xf32, #tpu.memory_space<vmem>>, vector<1x128xf32>
    %41 = vector.broadcast %40 : vector<1x128xf32> to vector<256x128xf32>
    %42 = arith.addf %39, %41 : vector<256x128xf32>
    %cst_23 = arith.constant 0.000000e+00 : f32
    %43 = vector.broadcast %cst_23 : f32 to vector<256x128xf32>
    %44 = arith.cmpf ogt, %42, %43 : vector<256x128xf32>
    %cst_24 = arith.constant 0.00999999977 : f32
    %45 = vector.broadcast %cst_24 : f32 to vector<256x128xf32>
    %46 = arith.mulf %45, %42 : vector<256x128xf32>
    %47 = arith.select %44, %42, %46 : vector<256x128xi1>, vector<256x128xf32>
    %cst_25 = arith.constant 0.000000e+00 : f32
    %48 = vector.broadcast %cst_25 : f32 to vector<24x128xf32>
    %c0_26 = arith.constant 0 : index
    %c0_27 = arith.constant 0 : index
    %49 = vector.load %arg9[%c0_26, %c0_27] : memref<304x128xf32, #tpu.memory_space<vmem>>, vector<24x128xf32>
    tpu.vector_store %arg9[%c0_26, %c0_27], %48 {strides = array<i32>} : memref<304x128xf32, #tpu.memory_space<vmem>>, vector<24x128xf32>,
    %cst_28 = arith.constant 0.000000e+00 : f32
    %50 = vector.broadcast %cst_28 : f32 to vector<24x128xf32>
    %c280_29 = arith.constant 280 : index
    %c0_30 = arith.constant 0 : index
    %51 = vector.load %arg9[%c280_29, %c0_30] : memref<304x128xf32, #tpu.memory_space<vmem>>, vector<24x128xf32>
    tpu.vector_store %arg9[%c280_29, %c0_30], %50 {strides = array<i32>} : memref<304x128xf32, #tpu.memory_space<vmem>>, vector<24x128xf32>,
    %c24_31 = arith.constant 24 : index
    %c0_32 = arith.constant 0 : index
    %52 = vector.load %arg9[%c24_31, %c0_32] : memref<304x128xf32, #tpu.memory_space<vmem>>, vector<256x128xf32>
    tpu.vector_store %arg9[%c24_31, %c0_32], %47 {strides = array<i32>} : memref<304x128xf32, #tpu.memory_space<vmem>>, vector<256x128xf32>,
    %53 = vector.shape_cast %6 : vector<256x1xf32> to vector<256x1xf32>
    %54 = vector.broadcast %53 : vector<256x1xf32> to vector<256x128xf32>
    %55 = vector.shape_cast %10 : vector<256x1xf32> to vector<256x1xf32>
    %56 = vector.broadcast %55 : vector<256x1xf32> to vector<256x128xf32>
    %c7_33 = arith.constant 7 : index
    %c0_34 = arith.constant 0 : index
    %57 = vector.load %arg9[%c7_33, %c0_34] : memref<304x128xf32, #tpu.memory_space<vmem>>, vector<256x128xf32>
    %58 = arith.mulf %57, %54 : vector<256x128xf32>
    %c8_35 = arith.constant 8 : index
    %c0_36 = arith.constant 0 : index
    %59 = vector.load %arg9[%c8_35, %c0_36] : memref<304x128xf32, #tpu.memory_space<vmem>>, vector<256x128xf32>
    %c9_37 = arith.constant 9 : index
    %c0_38 = arith.constant 0 : index
    %60 = vector.load %arg9[%c9_37, %c0_38] : memref<304x128xf32, #tpu.memory_space<vmem>>, vector<256x128xf32>
    %61 = arith.mulf %60, %56 : vector<256x128xf32>
    %c23_39 = arith.constant 23 : index
    %c0_40 = arith.constant 0 : index
    %62 = vector.load %arg9[%c23_39, %c0_40] : memref<304x128xf32, #tpu.memory_space<vmem>>, vector<256x128xf32>
    %63 = arith.mulf %62, %54 : vector<256x128xf32>
    %c24_41 = arith.constant 24 : index
    %c0_42 = arith.constant 0 : index
    %64 = vector.load %arg9[%c24_41, %c0_42] : memref<304x128xf32, #tpu.memory_space<vmem>>, vector<256x128xf32>
    %c25_43 = arith.constant 25 : index
    %c0_44 = arith.constant 0 : index
    %65 = vector.load %arg9[%c25_43, %c0_44] : memref<304x128xf32, #tpu.memory_space<vmem>>, vector<256x128xf32>
    %66 = arith.mulf %65, %56 : vector<256x128xf32>
    %c39_45 = arith.constant 39 : index
    %c0_46 = arith.constant 0 : index
    %67 = vector.load %arg9[%c39_45, %c0_46] : memref<304x128xf32, #tpu.memory_space<vmem>>, vector<256x128xf32>
    %68 = arith.mulf %67, %54 : vector<256x128xf32>
    %c40_47 = arith.constant 40 : index
    %c0_48 = arith.constant 0 : index
    %69 = vector.load %arg9[%c40_47, %c0_48] : memref<304x128xf32, #tpu.memory_space<vmem>>, vector<256x128xf32>
    %c41_49 = arith.constant 41 : index
    %c0_50 = arith.constant 0 : index
    %70 = vector.load %arg9[%c41_49, %c0_50] : memref<304x128xf32, #tpu.memory_space<vmem>>, vector<256x128xf32>
    %71 = arith.mulf %70, %56 : vector<256x128xf32>
    %72 = tpu.concatenate %58, %59, %61, %63, %64, %66, %68, %69, %71 in 1 : vector<256x128xf32>, vector<256x128xf32>, vector<256x128xf32>, vector<256x128xf32>, vector<256x128xf32>, vector<256x128xf32>, vector<256x128xf32>, vector<256x128xf32>, vector<256x128xf32> -> vector<256x1152xf32>
    %c0_51 = arith.constant 0 : index
    %c0_52 = arith.constant 0 : index
    %73 = vector.load %arg5[%c0_51, %c0_52] : memref<1152x128xf32, #tpu.memory_space<vmem>>, vector<1152x128xf32>
    %cst_53 = arith.constant dense<0.000000e+00> : vector<256x128xf32>
    %74 = tpu.matmul %72, %73, %cst_53 {dimension_numbers = #tpu.dot_dimension_numbers<[1], [0], [0], [1], [0, 0, 1, 1], [], []>} : vector<256x1152xf32>, vector<1152x128xf32>, vector<256x128xf32> -> vector<256x128xf32>
    %c0_54 = arith.constant 0 : index
    %c0_55 = arith.constant 0 : index
    %75 = vector.load %arg6[%c0_54, %c0_55] : memref<1x128xf32, #tpu.memory_space<vmem>>, vector<1x128xf32>
    %76 = vector.broadcast %75 : vector<1x128xf32> to vector<256x128xf32>
    %77 = arith.addf %74, %76 : vector<256x128xf32>
    %78 = vector.extract_strided_slice %77 {offsets = [0, 0], sizes = [256, 64], strides = [1, 1]} : vector<256x128xf32> to vector<256x64xf32>
    %79 = vector.extract_strided_slice %77 {offsets = [0, 64], sizes = [256, 64], strides = [1, 1]} : vector<256x128xf32> to vector<256x64xf32>
    %c0_56 = arith.constant 0 : index
    %c0_57 = arith.constant 0 : index
    %c0_58 = arith.constant 0 : index
    %80 = vector.load %arg1[%c0_56, %c0_57, %c0_58] : memref<1x256x64xf32, #tpu.memory_space<vmem>>, vector<1x256x64xf32>
    %81 = vector.shape_cast %80 : vector<1x256x64xf32> to vector<256x64xf32>
    %82 = arith.mulf %81, %78 : vector<256x64xf32>
    %83 = arith.addf %82, %79 : vector<256x64xf32>
    %c0_59 = arith.constant 0 : index
    %c0_60 = arith.constant 0 : index
    %c0_61 = arith.constant 0 : index
    %84 = vector.load %arg7[%c0_59, %c0_60, %c0_61] : memref<1x256x64xf32, #tpu.memory_space<vmem>>, vector<1x256x64xf32>
    %85 = vector.shape_cast %84 : vector<1x256x64xf32> to vector<256x64xf32>
    %86 = vector.shape_cast %83 : vector<256x64xf32> to vector<1x256x64xf32>
    tpu.vector_store %arg7[%c0_59, %c0_60, %c0_61], %86 {strides = array<i32>} : memref<1x256x64xf32, #tpu.memory_space<vmem>>, vector<1x256x64xf32>,
    return
  }
  func.func @transform_0(%arg0: i32) -> (i32, i32, i32) {
    %c0_i32 = arith.constant 0 : i32
    %c0_i32_0 = arith.constant 0 : i32
    %c0_i32_1 = arith.constant 0 : i32
    return %arg0, %c0_i32, %c0_i32_0 : i32, i32, i32
  }
  func.func @transform_1(%arg0: i32) -> (i32, i32, i32) {
    %c0_i32 = arith.constant 0 : i32
    %c0_i32_0 = arith.constant 0 : i32
    %c0_i32_1 = arith.constant 0 : i32
    return %arg0, %c0_i32, %c0_i32_0 : i32, i32, i32
  }
  func.func @transform_2(%arg0: i32) -> (i32, i32) {
    %c0_i32 = arith.constant 0 : i32
    %c0_i32_0 = arith.constant 0 : i32
    %c0_i32_1 = arith.constant 0 : i32
    return %c0_i32, %c0_i32_0 : i32, i32
  }
  func.func @transform_3(%arg0: i32) -> (i32, i32) {
    %c0_i32 = arith.constant 0 : i32
    %c0_i32_0 = arith.constant 0 : i32
    %c0_i32_1 = arith.constant 0 : i32
    return %c0_i32, %c0_i32_0 : i32, i32
  }
  func.func @transform_4(%arg0: i32) -> (i32, i32) {
    %c0_i32 = arith.constant 0 : i32
    %c0_i32_0 = arith.constant 0 : i32
    %c0_i32_1 = arith.constant 0 : i32
    return %c0_i32, %c0_i32_0 : i32, i32
  }
  func.func @transform_5(%arg0: i32) -> (i32, i32) {
    %c0_i32 = arith.constant 0 : i32
    %c0_i32_0 = arith.constant 0 : i32
    %c0_i32_1 = arith.constant 0 : i32
    return %c0_i32, %c0_i32_0 : i32, i32
  }
  func.func @transform_6(%arg0: i32) -> (i32, i32, i32) {
    %c0_i32 = arith.constant 0 : i32
    %c0_i32_0 = arith.constant 0 : i32
    %c0_i32_1 = arith.constant 0 : i32
    return %arg0, %c0_i32, %c0_i32_0 : i32, i32, i32
  }
}

</mosaic_0001>

<bundles_post_ra>
// kernel: tpu_custom_call.1
= control target key start
LH: loop header
LB: loop body
LE: loop exit
PB: predicated region body
PF: predicated region fallthrough
CT: control target
= control target key end

     0   :  { %11 = vsyncpa [#allocation5], 0  ;;  %s4653_s21 = smov 0   ;;  %s7554_s0 = inlined_call_operand.vmem [shape: f32[2,256,64], index: 0, kind: input, shape index: {}]   ;;  %s7555_s1 = inlined_call_operand.vmem [shape: f32[2,256,64], index: 1, kind: input, shape index: {}]   ;;  %s7556_s2 = inlined_call_operand.hbm [shape: f32[576,128], index: 2, kind: input, shape index: {}]   ;;  %s7557_s3 = inlined_call_operand.vmem [shape: f32[1,128], index: 3, kind: input, shape index: {}]   ;;  %s7558_s4 = inlined_call_operand.vmem [shape: f32[1152,128], index: 4, kind: input, shape index: {}]   ;;  %s7559_s5 = inlined_call_operand.vmem [shape: f32[1,128], index: 5, kind: input, shape index: {}]   ;;  %s7560_s6 = inlined_call_operand.vmem [shape: f32[2,256,64], index: 6, kind: output, shape index: {}]  }
   0x1 LB: > { %s195_s24 = sshll.u32 %s7556_s2, 4  ;;  %s4116_s25 = sadd.s32 4294967295, %s4611_s21   ;;  %s4611_s21 = sphi %s4653_s21, %s17_s21   ;;  %s196_s24 = int_to_ptr.hbm [resolvable:$true] %s195_s24 }
   0x2   : > { %p4118_p0 = scmp.ge.s32.totalorder %s4611_s21, 1  ;;  %p184_p1 = scmp.lt.s32.totalorder %s4611_s21, 3 }
   0x3   : > { %p4238_p2 = scmp.eq.s32.totalorder %s4116_s25, 0  ;;  %s4613_s26 = smov [#allocation4]  }
   0x4   : > { %p185_p3 = pnand %p4118_p0, %p184_p1  ;;  %s197_s27 = sshll.u32 %s4613_s26, 4  ;;  %s198_s27 = int_to_ptr.vmem [resolvable:$true] %s197_s27 }
   0x5   : > { %s4614_s28 = smov 128   ;;  %s4615_s29 = smov 8  }
   0x6   : > { %p4234_p4 = pneg %p185_p3  ;;  %238 = sbr.rel (%p185_p3) target bundleno = 1424 (0x590), region = 44 }
   0x8   : > { %p4235_p5 = pnand %p4238_p2, %p4234_p4 }
   0xa   : > { %4237 = dma.hbm_to_vmem [thread:$0]  (!%p4235_p5), %s196_s24, 9216, %s198_s27, [#allocation5], %s4614_s28, %s4614_s28, %s4615_s29  }
   0xb   : > { %4606 = dma.done.wait (%p4238_p2), [#allocation5], 9216  }
   0xc   : > { %4608 = vsyncadd (%p4238_p2), [#allocation5], 4294958080  ;;  %p274_p6 = scmp.lt.s32.totalorder %s4116_s25, 1  ;;  %vm546_vm0 = vcmask 523264   ;;  %v289_v0 = vlaneseq  ;;  %v7567_v1 = vmov 0.0   ;;  %s4617_s10 = smov 64  }
   0xd   : > { %547 = vst.msk [vmem:[#allocation2] sm:$0xff] %vm546_vm0, %v7567_v1 }
   0xe   : > { %s8026_s25 = smov (!%p274_p6, %s4116_s25), 1  ;;  %v4666_v2 = vshrl.u32 %v289_v0, 7  ;;  %548 = vst.msk [vmem:[#allocation2 + $0x8] sm:$0xff] %vm546_vm0, %v7567_v1 }
   0xf   : > { %549 = vst.msk [vmem:[#allocation2 + $0x10] sm:$0xff] %vm546_vm0, %v7567_v1  ;;  %s4672_s30 = sshll.u32 %s8026_s25, 8 }
  0x10   : > { %550 = vst.msk [vmem:[#allocation2 + $0x118] sm:$0xff] %vm546_vm0, %v7567_v1  ;;  %s4680_s9 = scalar_lea.vmem %s7555_s1, %s4672_s30  ;;  %v306_v3 = vadd.s32 128, %v4666_v2  ;;  %v308_v9 = vadd.s32 144, %v4666_v2  ;;  %v310_v18 = vadd.s32 160, %v4666_v2  ;;  %v312_v38 = vadd.s32 176, %v4666_v2  ;;  %s7287_s15 = scalar_lea.vmem %s7554_s0, %s4672_s30 }
  0x11   : > { %551 = vst.msk [vmem:[#allocation2 + $0x120] sm:$0xff] %vm546_vm0, %v7567_v1  ;;  %v569_v4 = vld [vmem:[%s4680_s9 + $0x80] sm:$0xff]  ;;  %v570_v5 = vld [vmem:[%s4680_s9 + $0x88] sm:$0xff]  ;;  %v567_v6 = vld [vmem:[%s4680_s9 + $0x70] sm:$0xff]  ;;  %v314_v58 = vadd.s32 192, %v4666_v2  ;;  %s7303_s18 = scalar_lea.vmem %s7560_s6, %s4672_s30 }
  0x12   : > { %552 = vst.msk [vmem:[#allocation2 + $0x128] sm:$0xff] %vm546_vm0, %v7567_v1  ;;  %v568_v7 = vld [vmem:[%s4680_s9 + $0x78] sm:$0xff]  ;;  %v338_v8 = vand.u32 15, %v306_v3  ;;  %v571_v10 = vld [vmem:[%s4680_s9 + $0x90] sm:$0xff]  ;;  %v340_v12 = vand.u32 15, %v308_v9  ;;  %v554_v19 = vld [vmem:[%s4680_s9 + $0x8] sm:$0xff] }
  0x13   : > { %2278 = vst [vmem:[#allocation3] sm:$0xff] %v7567_v1  ;;  %v555_v13 = vld [vmem:[%s4680_s9 + $0x10] sm:$0xff]  ;;  %v572_v16 = vld [vmem:[%s4680_s9 + $0x98] sm:$0xff]  ;;  %v573_v22 = vld [vmem:[%s4680_s9 + $0xa0] sm:$0xff]  ;;  %v342_v27 = vand.u32 15, %v310_v18  ;;  %v344_v47 = vand.u32 15, %v312_v38 }
  0x14   : > { %601 = vst.msk [vmem:[#allocation2 + $0x98] sm:$0xff] %vm546_vm0, %v569_v4  ;;  %vm370_vm1 = vcmp.ge.s32.totalorder %v338_v8, 1  ;;  %vm372_vm2 = vcmp.ge.s32.totalorder %v340_v12, 1  ;;  %v557_v24 = vld [vmem:[%s4680_s9 + $0x20] sm:$0xff]  ;;  %v574_v25 = vld [vmem:[%s4680_s9 + $0xa8] sm:$0xff]  ;;  %v556_v28 = vld [vmem:[%s4680_s9 + $0x18] sm:$0xff] }
  0x15   : > { %602 = vst.msk [vmem:[#allocation2 + $0xa0] sm:$0xff] %vm546_vm0, %v570_v5  ;;  %v4706_v15 = vsel %vm370_vm1, 1.0, %v7567_v1  ;;  %v4728_v29 = vsel %vm372_vm2, 1.0, %v7567_v1  ;;  %v575_v30 = vld [vmem:[%s4680_s9 + $0xb0] sm:$0xff]  ;;  %v681_v32 = vld [vmem:[#allocation2 + $0x8] sm:$0xff]  ;;  %v576_v36 = vld [vmem:[%s4680_s9 + $0xb8] sm:$0xff] }
  0x16   : > { %599 = vst.msk [vmem:[#allocation2 + $0x88] sm:$0xff] %vm546_vm0, %v567_v6  ;;  %v682_v31 = vld [vmem:[#allocation2 + $0x10] sm:$0xff]  ;;  %vm374_vm3 = vcmp.ge.s32.totalorder %v342_v27, 1  ;;  %v553_v39 = vld [vmem:[%s4680_s9] sm:$0xff]  ;;  %v558_v40 = vld [vmem:[%s4680_s9 + $0x28] sm:$0xff]  ;;  %vm376_vm4 = vcmp.ge.s32.totalorder %v344_v47, 1 }
  0x17   : > { %600 = vst.msk [vmem:[#allocation2 + $0x90] sm:$0xff] %vm546_vm0, %v568_v7  ;;  %v559_v33 = vld [vmem:[%s4680_s9 + $0x30] sm:$0xff]  ;;  %v577_v43 = vld [vmem:[%s4680_s9 + $0xc0] sm:$0xff]  ;;  %v4749_v44 = vsel %vm374_vm3, 1.0, %v7567_v1  ;;  %v578_v48 = vld [vmem:[%s4680_s9 + $0xc8] sm:$0xff]  ;;  %v4772_v0 = vsel %vm376_vm4, 1.0, %v7567_v1 }
  0x18   : > { %2279 = vst [vmem:[#allocation3 + $0x8] sm:$0xff] %v7567_v1  ;;  %v561_v46 = vld [vmem:[%s4680_s9 + $0x40] sm:$0xff]  ;;  %v560_v51 = vld [vmem:[%s4680_s9 + $0x38] sm:$0xff]  ;;  %v579_v53 = vld [vmem:[%s4680_s9 + $0xd0] sm:$0xff]  ;;  %v346_v6 = vand.u32 15, %v314_v58 }
  0x19   : > { %2280 = vst [vmem:[#allocation3 + $0x10] sm:$0xff] %v7567_v1  ;;  %v563_v55 = vld [vmem:[%s4680_s9 + $0x50] sm:$0xff]  ;;  %v580_v59 = vld [vmem:[%s4680_s9 + $0xd8] sm:$0xff]  ;;  %v562_v60 = vld [vmem:[%s4680_s9 + $0x48] sm:$0xff] }
  0x1a   : > { %2281 = vst [vmem:[#allocation3 + $0x118] sm:$0xff] %v7567_v1  ;;  %v581_v63 = vld [vmem:[%s4680_s9 + $0xe0] sm:$0xff]  ;;  %v582_v7 = vld [vmem:[%s4680_s9 + $0xe8] sm:$0xff]  ;;  %vm378_vm5 = vcmp.ge.s32.totalorder %v346_v6, 1 }
  0x1b   : > { %v699_v11 = vld [vmem:[#allocation2 + $0x98] sm:$0xff]  ;;  %2282 = vst [vmem:[#allocation3 + $0x120] sm:$0xff] %v7567_v1  ;;  %v565_v5 = vld [vmem:[%s4680_s9 + $0x60] sm:$0xff] }
  0x1c   : > { %v4703_v14 = vld [vmem:[#allocation2 + $0x9f] sm:$0xff]  ;;  %7694 = vst [vmem:[#allocation7_spill] sm:$0xff] %v4706_v15 }
  0x1d   : > { %2283 = vst [vmem:[#allocation3 + $0x128] sm:$0xff] %v7567_v1  ;;  %v4263_v17 = vpack.i.bf16 %v699_v11, %v4703_v14  ;;  %v697_v21 = vld [vmem:[#allocation2 + $0x88] sm:$0xff]  ;;  %v700_v57 = vld [vmem:[#allocation2 + $0xa0] sm:$0xff] }
  0x1e   : > { %603 = vst.msk [vmem:[#allocation2 + $0xa8] sm:$0xff] %vm546_vm0, %v571_v10  ;;  %v4714_v20 = vld [vmem:[#allocation2 + $0x97] sm:$0xff] }
  0x1f   : > { %587 = vst.msk [vmem:[#allocation2 + $0x28] sm:$0xff] %vm546_vm0, %v555_v13  ;;  %4264 = vrot.lane.b32.xlu1 %v4263_v17, %s4617_s10  ;;  %v795_v23 = vmul.f32 %v4706_v15, %v4714_v20  ;;  %v698_v35 = vld [vmem:[#allocation2 + $0x90] sm:$0xff]  ;;  %v564_v10 = vld [vmem:[%s4680_s9 + $0x58] sm:$0xff] }
  0x20   : > { %604 = vst.msk [vmem:[#allocation2 + $0xb0] sm:$0xff] %vm546_vm0, %v572_v16  ;;  %v4258_v42 = vpack.i.bf16 %v681_v32, %v698_v35  ;;  %v583_v16 = vld [vmem:[%s4680_s9 + $0xf0] sm:$0xff] }
  0x21   : > { %586 = vst.msk [vmem:[#allocation2 + $0x20] sm:$0xff] %vm546_vm0, %v554_v19  ;;  %v4253_v26 = vpack.i.bf16 %v795_v23, %v697_v21  ;;  %v316_v19 = vadd.s32 208, %v4666_v2  ;;  %v4794_v23 = vsel %vm378_vm5, 1.0, %v7567_v1 }
  0x22   : > { %605 = vst.msk [vmem:[#allocation2 + $0xb8] sm:$0xff] %vm546_vm0, %v573_v22 }
  0x23   : > { %7695 = vst [vmem:[#allocation8_spill] sm:$0xff] %v4728_v29  ;;  %4254 = vrot.lane.b32.xlu0 %v4253_v26, %s4617_s10  ;;  %v566_v26 = vld [vmem:[%s4680_s9 + $0x68] sm:$0xff] }
  0x24   : > { %589 = vst.msk [vmem:[#allocation2 + $0x38] sm:$0xff] %vm546_vm0, %v557_v24 }
  0x25   : > { %606 = vst.msk [vmem:[#allocation2 + $0xc0] sm:$0xff] %vm546_vm0, %v574_v25  ;;  %v4735_v34 = vld [vmem:[#allocation2 + $0xa7] sm:$0xff]  ;;  %v348_v25 = vand.u32 15, %v316_v19  ;;  %v1475_v19 = vld [vmem:[#allocation4 + $0xf0] sm:$0xff] }
  0x26   : > { %588 = vst.msk [vmem:[#allocation2 + $0x30] sm:$0xff] %vm546_vm0, %v556_v28  ;;  %v797_v37 = vmul.f32 %v4728_v29, %v4735_v34  ;;  %v685_v49 = vld [vmem:[#allocation2 + $0x28] sm:$0xff] }
  0x27   : > { %607 = vst.msk [vmem:[#allocation2 + $0xc8] sm:$0xff] %vm546_vm0, %v575_v30  ;;  %v702_v50 = vld [vmem:[#allocation2 + $0xb0] sm:$0xff]  ;;  %v701_v13 = vld [vmem:[#allocation2 + $0xa8] sm:$0xff]  ;;  %vm380_vm6 = vcmp.ge.s32.totalorder %v348_v25, 1 }
  0x28   : > { %591 = vst.msk [vmem:[#allocation2 + $0x48] sm:$0xff] %vm546_vm0, %v559_v33  ;;  %v4268_v41 = vpack.i.bf16 %v797_v37, %v682_v31  ;;  %v684_v54 = vld [vmem:[#allocation2 + $0x20] sm:$0xff]  ;;  %v4288_v56 = vpack.i.bf16 %v685_v49, %v702_v50  ;;  %v4784_v12 = vld [vmem:[#allocation2 + $0xaf] sm:$0xff]  ;;  %v320_v50 = vadd.s32 240, %v4666_v2 }
  0x29   : > { %608 = vst.msk [vmem:[#allocation2 + $0xd0] sm:$0xff] %vm546_vm0, %v576_v36  ;;  %v639_v45 = vld [vmem:[#allocation2 + $0xb7] sm:$0xff]  ;;  %v4278_v21 = vpack.i.bf16 %v701_v13, %v4784_v12  ;;  %v318_v36 = vadd.s32 224, %v4666_v2 }
  0x2a   : > { %7696 = vst [vmem:[#allocation9_spill] sm:$0xff] %v4749_v44  ;;  %4269 = vrot.lane.b32.xlu1 %v4268_v41, %s4617_s10  ;;  %v799_v52 = vmul.f32 %v4749_v44, %v639_v45  ;;  %v703_v32 = vld [vmem:[#allocation2 + $0xb8] sm:$0xff] }
  0x2b   : > { %585 = vst.msk [vmem:[#allocation2 + $0x18] sm:$0xff] %vm546_vm0, %v553_v39  ;;  %4259 = vrot.lane.b32.xlu0 %v4258_v42, %s4617_s10  ;;  %v687_v8 = vld [vmem:[#allocation2 + $0x38] sm:$0xff]  ;;  %v4807_v39 = vsel %vm380_vm6, 1.0, %v7567_v1  ;;  %v350_v41 = vand.u32 15, %v318_v36 }
  0x2c   : > { %590 = vst.msk [vmem:[#allocation2 + $0x40] sm:$0xff] %vm546_vm0, %v558_v40  ;;  %v4283_v61 = vpack.i.bf16 %v799_v52, %v684_v54  ;;  %v704_v9 = vld [vmem:[#allocation2 + $0xc0] sm:$0xff] }
  0x2d   : > { %609 = vst.msk [vmem:[#allocation2 + $0xd8] sm:$0xff] %vm546_vm0, %v577_v43  ;;  %v686_v17 = vld [vmem:[#allocation2 + $0x30] sm:$0xff]  ;;  %v4303_v18 = vpack.i.bf16 %v687_v8, %v704_v9  ;;  %v4802_v31 = vld [vmem:[#allocation2 + $0xbf] sm:$0xff]  ;;  %vm382_vm7 = vcmp.ge.s32.totalorder %v350_v41, 1 }
  0x2e   : > { %593 = vst.msk [vmem:[#allocation2 + $0x58] sm:$0xff] %vm546_vm0, %v561_v46  ;;  %v641_v3 = vld [vmem:[#allocation2 + $0xc7] sm:$0xff]  ;;  %v4293_v37 = vpack.i.bf16 %v703_v32, %v4802_v31  ;;  %v1456_v32 = vld [vmem:[#allocation4 + $0x58] sm:$0xff]  ;;  %v1471_v41 = vld [vmem:[#allocation4 + $0xd0] sm:$0xff] }
  0x2f   : > { %610 = vst.msk [vmem:[#allocation2 + $0xe0] sm:$0xff] %vm546_vm0, %v578_v48  ;;  %v801_v11 = vmul.f32 %v4772_v0, %v641_v3  ;;  %v689_v27 = vld [vmem:[#allocation2 + $0x48] sm:$0xff]  ;;  %v584_v3 = vld [vmem:[%s4680_s9 + $0xf8] sm:$0xff] }
  0x30   : > { %592 = vst.msk [vmem:[#allocation2 + $0x50] sm:$0xff] %vm546_vm0, %v560_v51  ;;  %v706_v28 = vld [vmem:[#allocation2 + $0xd0] sm:$0xff]  ;;  %v705_v47 = vld [vmem:[#allocation2 + $0xc8] sm:$0xff] }
  0x31   : > { %611 = vst.msk [vmem:[#allocation2 + $0xe8] sm:$0xff] %vm546_vm0, %v579_v53  ;;  %v4298_v22 = vpack.i.bf16 %v801_v11, %v686_v17  ;;  %v4318_v35 = vpack.i.bf16 %v689_v27, %v706_v28  ;;  %v642_v46 = vld [vmem:[#allocation2 + $0xcf] sm:$0xff]  ;;  %v4815_v53 = vsel %vm382_vm7, 1.0, %v7567_v1  ;;  %v322_v17 = vand.u32 15, %v4666_v2  ;;  %v1473_v27 = vld [vmem:[#allocation4 + $0xe0] sm:$0xff] }
  0x32   : > { %v683_v62 = vld [vmem:[#allocation2 + $0x18] sm:$0xff]  ;;  %595 = vst.msk [vmem:[#allocation2 + $0x68] sm:$0xff] %vm546_vm0, %v563_v55  ;;  %4289 = vrot.lane.b32.xlu1 %v4288_v56, %s4617_s10  ;;  %v4308_v51 = vpack.i.bf16 %v705_v47, %v642_v46  ;;  %v352_v55 = vand.u32 15, %v320_v50  ;;  %v1470_v46 = vld [vmem:[#allocation4 + $0xc8] sm:$0xff]  ;;  %v1469_v50 = vld [vmem:[#allocation4 + $0xc0] sm:$0xff] }
  0x33   : > { %7697 = vst [vmem:[#allocation10_spill] sm:$0xff] %v4772_v0  ;;  %v4273_v4 = vpack.i.bf16 %v683_v62, %v700_v57  ;;  %4284 = vrot.lane.b32.xlu0 %v4283_v61, %s4617_s10  ;;  %v688_v33 = vld [vmem:[#allocation2 + $0x40] sm:$0xff]  ;;  %v1460_v62 = vld [vmem:[#allocation4 + $0x78] sm:$0xff]  ;;  %vm354_vm9 = vcmp.ge.s32.totalorder %v322_v17, 1 }
  0x34   : > { %612 = vst.msk [vmem:[#allocation2 + $0xf0] sm:$0xff] %vm546_vm0, %v580_v59  ;;  %v643_v24 = vld [vmem:[#allocation2 + $0xd7] sm:$0xff]  ;;  %vm384_vm8 = vcmp.ge.s32.totalorder %v352_v55, 1  ;;  %4198 = vmatpush.msra.mxu2 %v1460_v62  ;;  %1617 = vmatpush.msra.mxu0 %v1460_v62  ;;  %v4864_v17 = vld [vmem:[#allocation2 + $0x21] sm:$0xff] }
  0x35   : > { %594 = vst.msk [vmem:[#allocation2 + $0x60] sm:$0xff] %vm546_vm0, %v562_v60  ;;  %4274 = vrot.lane.b32.xlu2 %v4273_v4, %s4617_s10  ;;  %v803_v30 = vmul.f32 %v4794_v23, %v643_v24  ;;  %v691_v42 = vld [vmem:[#allocation2 + $0x58] sm:$0xff]  ;;  %v1474_v24 = vld [vmem:[#allocation4 + $0xe8] sm:$0xff] }
  0x36   : > { %613 = vst.msk [vmem:[#allocation2 + $0xf8] sm:$0xff] %vm546_vm0, %v581_v63  ;;  %v708_v43 = vld [vmem:[#allocation2 + $0xe0] sm:$0xff]  ;;  %v707_v61 = vld [vmem:[#allocation2 + $0xd8] sm:$0xff] }
  0x37   : > { %597 = vst.msk [vmem:[#allocation2 + $0x78] sm:$0xff] %vm546_vm0, %v565_v5  ;;  %v4313_v38 = vpack.i.bf16 %v803_v30, %v688_v33  ;;  %v690_v48 = vld [vmem:[#allocation2 + $0x50] sm:$0xff]  ;;  %v4333_v49 = vpack.i.bf16 %v691_v42, %v708_v43  ;;  %v644_v60 = vld [vmem:[#allocation2 + $0xdf] sm:$0xff]  ;;  %v1454_v42 = vld [vmem:[#allocation4 + $0x48] sm:$0xff] }
  0x38   : > { %614 = vst.msk [vmem:[#allocation2 + $0x100] sm:$0xff] %vm546_vm0, %v582_v7  ;;  %v645_v40 = vld [vmem:[#allocation2 + $0xe7] sm:$0xff]  ;;  %v1476_v63 = vld [vmem:[#allocation4 + $0xf8] sm:$0xff]  ;;  %v4323_v5 = vpack.i.bf16 %v707_v61, %v644_v60  ;;  %v4824_v7 = vsel %vm384_vm8, 1.0, %v7567_v1 }
  0x39   : > { %596 = vst.msk [vmem:[#allocation2 + $0x70] sm:$0xff] %vm546_vm0, %v564_v10  ;;  %v805_v45 = vmul.f32 %v4807_v39, %v645_v40  ;;  %v693_v56 = vld [vmem:[#allocation2 + $0x68] sm:$0xff]  ;;  %4214 = vmatpush.msra.mxu3 %v1476_v63  ;;  %1730 = vmatpush.msra.mxu1 %v1476_v63  ;;  %v1472_v33 = vld [vmem:[#allocation4 + $0xd8] sm:$0xff]  ;;  %v1455_v40 = vld [vmem:[#allocation4 + $0x50] sm:$0xff] }
  0x3a   : > { %615 = vst.msk [vmem:[#allocation2 + $0x108] sm:$0xff] %vm546_vm0, %v583_v16  ;;  %4304 = vrot.lane.b32.xlu1 %v4303_v18, %s4617_s10  ;;  %v709_v13 = vld [vmem:[#allocation2 + $0xe8] sm:$0xff]  ;;  %v1459_v18 = vld [vmem:[#allocation4 + $0x70] sm:$0xff]  ;;  %v1468_v55 = vld [vmem:[#allocation4 + $0xb8] sm:$0xff] }
  0x3b   : > { %7698 = vst [vmem:[#allocation11_spill] sm:$0xff] %v4794_v23  ;;  %4299 = vrot.lane.b32.xlu0 %v4298_v22, %s4617_s10  ;;  %v4328_v52 = vpack.i.bf16 %v805_v45, %v690_v48  ;;  %v710_v57 = vld [vmem:[#allocation2 + $0xf0] sm:$0xff]  ;;  %4199 = vmatpush.msra.mxu2 %v1459_v18  ;;  %v4839_v45 = vld [vmem:[#allocation2 + $0x19] sm:$0xff]  ;;  %v1466_v61 = vld [vmem:[#allocation4 + $0xa8] sm:$0xff] }
  0x3c   : > { %598 = vst.msk [vmem:[#allocation2 + $0x80] sm:$0xff] %vm546_vm0, %v566_v26  ;;  %v692_v58 = vld [vmem:[#allocation2 + $0x60] sm:$0xff]  ;;  %v4348_v4 = vpack.i.bf16 %v693_v56, %v710_v57  ;;  %v646_v11 = vld [vmem:[#allocation2 + $0xef] sm:$0xff]  ;;  %4215 = vmatpush.msra.mxu3 %v1475_v19  ;;  %1618 = vmatpush.msra.mxu0 %v1459_v18  ;;  %v4835_v36 = vld [vmem:[#allocation2 + $0x17] sm:$0xff]  ;;  %v293_v56 = vadd.s32 24, %v4666_v2 }
  0x3d   : > { %4279 = vrot.lane.b32.xlu2 %v4278_v21, %s4617_s10  ;;  %7699 = vst [vmem:[#allocation12_spill] sm:$0xff] %v4807_v39  ;;  %v647_v54 = vld [vmem:[#allocation2 + $0xf7] sm:$0xff]  ;;  %v1458_v21 = vld [vmem:[#allocation4 + $0x68] sm:$0xff]  ;;  %v1457_v26 = vld [vmem:[#allocation4 + $0x60] sm:$0xff]  ;;  %1731 = vmatpush.msra.mxu1 %v1475_v19  ;;  %v4338_v28 = vpack.i.bf16 %v709_v13, %v646_v11  ;;  %v294_v13 = vadd.s32 32, %v4666_v2 }
  0x3e   : > { %7700 = vst [vmem:[#allocation13_spill] sm:$0xff] %v4815_v53  ;;  %v807_v59 = vmul.f32 %v4815_v53, %v647_v54  ;;  %v695_v9 = vld [vmem:[#allocation2 + $0x78] sm:$0xff]  ;;  %4200 = vmatpush.msra.mxu2 %v1458_v21  ;;  %4216 = vmatpush.msra.mxu3 %v1474_v24  ;;  %v1453_v48 = vld [vmem:[#allocation4 + $0x40] sm:$0xff]  ;;  %v291_v54 = vadd.s32 8, %v4666_v2  ;;  %v1451_v57 = vld [vmem:[#allocation4 + $0x30] sm:$0xff]  ;;  %v325_v62 = vand.u32 15, %v293_v56 }
  0x3f   : > { %616 = vst.msk [vmem:[#allocation2 + $0x110] sm:$0xff] %vm546_vm0, %v584_v3  ;;  %v712_v10 = vld [vmem:[#allocation2 + $0x100] sm:$0xff]  ;;  %1619 = vmatpush.msra.mxu0 %v1458_v21  ;;  %1732 = vmatpush.msra.mxu1 %v1474_v24  ;;  %v4849_v3 = vld [vmem:[#allocation2 + $0x29] sm:$0xff]  ;;  %v1464_v11 = vld [vmem:[#allocation4 + $0x98] sm:$0xff]  ;;  %v326_v24 = vand.u32 15, %v294_v13 }
  0x40   : > { %v4343_v6 = vpack.i.bf16 %v807_v59, %v692_v58  ;;  %7701 = vst [vmem:[#allocation14_spill] sm:$0xff] %v4824_v7  ;;  %v694_v22 = vld [vmem:[#allocation2 + $0x70] sm:$0xff]  ;;  %v4363_v25 = vpack.i.bf16 %v695_v9, %v712_v10  ;;  %4201 = vmatpush.msra.mxu2 %v1457_v26  ;;  %4217 = vmatpush.msra.mxu3 %v1473_v27  ;;  %v1450_v59 = vld [vmem:[#allocation4 + $0x28] sm:$0xff]  ;;  %v323_v60 = vand.u32 15, %v291_v54  ;;  %v1449_v63 = vld [vmem:[#allocation4 + $0x20] sm:$0xff]  ;;  %v292_v10 = vadd.s32 16, %v4666_v2 }
  0x41   : > { %v777_v8 = vld [vmem:[#allocation2 + $0x107] sm:$0xff]  ;;  %1620 = vmatpush.msra.mxu0 %v1457_v26  ;;  %1733 = vmatpush.msra.mxu1 %v1473_v27  ;;  %v1467_v58 = vld [vmem:[#allocation4 + $0xb0] sm:$0xff]  ;;  %v4852_v9 = vld [vmem:[#allocation2 + $0x1f] sm:$0xff]  ;;  %vm453_vm11 = vcmp.lt.s32.totalorder %v325_v62, 15  ;;  %vm358_vm14 = vcmp.ge.s32.totalorder %v326_v24, 1 }
  0x42   : > { %4319 = vrot.lane.b32.xlu1 %v4318_v35, %s4617_s10  ;;  %v809_v16 = vmul.f32 %v4824_v7, %v777_v8  ;;  %v4833_v35 = vsel %vm354_vm9, 1.0, %v7567_v1  ;;  %4202 = vmatpush.msra.mxu2 %v1456_v32  ;;  %v1448_v8 = vld [vmem:[#allocation4 + $0x18] sm:$0xff]  ;;  %vm451_vm10 = vcmp.lt.s32.totalorder %v323_v60, 15  ;;  %v4867_v19 = vsel %vm453_vm11, 1.0, %v7567_v1  ;;  %v4915_v60 = vld [vmem:[#allocation2 + $0x49] sm:$0xff] }
  0x43   : > { %4314 = vrot.lane.b32.xlu0 %v4313_v38, %s4617_s10  ;;  %7702 = vst [vmem:[#allocation15_spill] sm:$0xff] %v4833_v35  ;;  %v711_v38 = vld [vmem:[#allocation2 + $0xf8] sm:$0xff]  ;;  %4218 = vmatpush.msra.mxu3 %v1472_v33  ;;  %v696_v43 = vld [vmem:[#allocation2 + $0x80] sm:$0xff]  ;;  %v779_v47 = vmul.f32 %v4833_v35, %v4835_v36  ;;  %v1507_v62 = vld [vmem:[#allocation4 + $0x1f0] sm:$0xff] }
  0x44   : > { %v4358_v30 = vpack.i.bf16 %v809_v16, %v694_v22  ;;  %4203 = vmatpush.msra.mxu2 %v1455_v40  ;;  %1621 = vmatpush.msra.mxu0 %v1456_v32  ;;  %v4862_v16 = vsel %vm451_vm10, 1.0, %v7567_v1  ;;  %7704 = vst [vmem:[#allocation17_spill] sm:$0xff] %v4867_v19  ;;  %v4869_v21 = vld [vmem:[#allocation2 + $0x31] sm:$0xff]  ;;  %v324_v22 = vand.u32 15, %v292_v10  ;;  %v4884_v32 = vld [vmem:[#allocation2 + $0x41] sm:$0xff]  ;;  %v5050_v7 = vld [vmem:[#allocation2 + $0x99] sm:$0xff] }
  0x45   : > { %4294 = vrot.lane.b32.xlu2 %v4293_v37, %s4617_s10  ;;  %v648_v37 = vld [vmem:[#allocation2 + $0xff] sm:$0xff]  ;;  %4219 = vmatpush.msra.mxu3 %v1471_v41  ;;  %7703 = vst [vmem:[#allocation16_spill] sm:$0xff] %v4862_v16  ;;  %v816_v26 = vmul.f32 %v4862_v16, %v4864_v17  ;;  %v818_v27 = vmul.f32 %v4867_v19, %v4869_v21  ;;  %v4927_v10 = vld [vmem:[#allocation2 + $0x4f] sm:$0xff] }
  0x46   : > { %4204 = vmatpush.msra.mxu2 %v1454_v42  ;;  %1622 = vmatpush.msra.mxu0 %v1455_v40  ;;  %vm356_vm13 = vcmp.ge.s32.totalorder %v324_v22, 1  ;;  %7706 = vst [vmem:[#allocation19_spill] sm:$0xff] %v4884_v32  ;;  %v4890_v40 = vld [vmem:[#allocation2 + $0x27] sm:$0xff]  ;;  %v1492_v54 = vld [vmem:[#allocation4 + $0x178] sm:$0xff]  ;;  %v307_v22 = vadd.s32 136, %v4666_v2 }
  0x47   : > { %4220 = vmatpush.msra.mxu3 %v1470_v46  ;;  %1734 = vmatpush.msra.mxu1 %v1472_v33  ;;  %v1447_v33 = vld [vmem:[#allocation4 + $0x10] sm:$0xff]  ;;  %7710 = vst [vmem:[#allocation23_spill] sm:$0xff] %v4915_v60  ;;  %v1506_v13 = vld [vmem:[#allocation4 + $0x1e8] sm:$0xff] }
  0x48   : > { %4205 = vmatpush.msra.mxu2 %v1453_v48  ;;  %1623 = vmatpush.msra.mxu0 %v1454_v42  ;;  %v4893_v42 = vsel %vm358_vm14, 1.0, %v7567_v1 }
  0x49   : > { %4221 = vmatpush.msra.mxu3 %v1469_v50  ;;  %1735 = vmatpush.msra.mxu1 %v1471_v41  ;;  %7708 = vst [vmem:[#allocation21_spill] sm:$0xff] %v4893_v42 }
  0x4a   : > { %4334 = vrot.lane.b32.xlu1 %v4333_v49, %s4617_s10  ;;  %v4353_v49 = vpack.i.bf16 %v711_v38, %v648_v37  ;;  %1624 = vmatpush.msra.mxu0 %v1453_v48  ;;  %v1463_v37 = vld [vmem:[#allocation4 + $0x90] sm:$0xff]  ;;  %v4888_v38 = vsel %vm356_vm13, 1.0, %v7567_v1  ;;  %v1462_v48 = vld [vmem:[#allocation4 + $0x88] sm:$0xff] }
  0x4b   : > { %4329 = vrot.lane.b32.xlu0 %v4328_v52, %s4617_s10  ;;  %v1452_v52 = vld [vmem:[#allocation4 + $0x38] sm:$0xff]  ;;  %4222 = vmatpush.msra.mxu3 %v1468_v55  ;;  %7707 = vst [vmem:[#allocation20_spill] sm:$0xff] %v4888_v38 }
  0x4c   : > { %4206 = vmatpush.msra.mxu2 %v1452_v52  ;;  %1625 = vmatpush.msra.mxu0 %v1452_v52 }
  0x4d   : > { %4309 = vrot.lane.b32.xlu2 %v4308_v51, %s4617_s10  ;;  %v4368_v51 = vpack.i.bf16 %v696_v43, %v4839_v45  ;;  %4223 = vmatpush.msra.mxu3 %v1467_v58  ;;  %v4895_v43 = vld [vmem:[#allocation2 + $0x37] sm:$0xff] }
  0x4e   : > { %4207 = vmatpush.msra.mxu2 %v1451_v57  ;;  %1736 = vmatpush.msra.mxu1 %v1470_v46  ;;  %v783_v52 = vmul.f32 %v4893_v42, %v4895_v43 }
  0x4f   : > { %4224 = vmatpush.msra.mxu3 %v1466_v61  ;;  %1626 = vmatpush.msra.mxu0 %v1451_v57  ;;  %v4908_v57 = vld [vmem:[#allocation2 + $0x47] sm:$0xff] }
  0x50   : > { %4208 = vmatpush.msra.mxu2 %v1450_v59  ;;  %1737 = vmatpush.msra.mxu1 %v1469_v50  ;;  %v1445_v50 = vld [vmem:[#allocation4] sm:$0xff] }
  0x51   : > { %1627 = vmatpush.msra.mxu0 %v1450_v59  ;;  %v4913_v59 = vld [vmem:[#allocation2 + $0x39] sm:$0xff] }
  0x52   : > { %4349 = vrot.lane.b32.xlu1 %v4348_v4, %s4617_s10  ;;  %v1465_v4 = vld [vmem:[#allocation4 + $0xa0] sm:$0xff]  ;;  %4209 = vmatpush.msra.mxu2 %v1449_v63 }
  0x53   : > { %4344 = vrot.lane.b32.xlu0 %v4343_v6, %s4617_s10  ;;  %v295_v6 = vadd.s32 40, %v4666_v2  ;;  %4225 = vmatpush.msra.mxu3 %v1465_v4 }
  0x54   : > { %4210 = vmatpush.msra.mxu2 %v1448_v8  ;;  %1628 = vmatpush.msra.mxu0 %v1449_v63  ;;  %v1516_v63 = vld [vmem:[#allocation4 + $0x238] sm:$0xff] }
  0x55   : > { %4324 = vrot.lane.b32.xlu2 %v4323_v5, %s4617_s10  ;;  %v778_v5 = vld [vmem:[#allocation2 + $0x10f] sm:$0xff]  ;;  %v327_v18 = vand.u32 15, %v295_v6  ;;  %4226 = vmatpush.msra.mxu3 %v1464_v11 }
  0x56   : > { %1738 = vmatpush.msra.mxu1 %v1468_v55  ;;  %1629 = vmatpush.msra.mxu0 %v1448_v8  ;;  %v1508_v55 = vld [vmem:[#allocation4 + $0x1f8] sm:$0xff] }
  0x57   : > { %vm455_vm12 = vcmp.lt.s32.totalorder %v327_v18, 15  ;;  %4211 = vmatpush.msra.mxu2 %v1447_v33  ;;  %4227 = vmatpush.msra.mxu3 %v1463_v37  ;;  %v4925_v8 = vld [vmem:[#allocation2 + $0x3f] sm:$0xff] }
  0x58   : > { %1739 = vmatpush.msra.mxu1 %v1467_v58  ;;  %1630 = vmatpush.msra.mxu0 %v1447_v33  ;;  %v4945_v33 = vld [vmem:[#allocation2 + $0x5f] sm:$0xff] }
  0x59   : > { %4228 = vmatpush.msra.mxu3 %v1462_v48 }
  0x5a   : > { %4364 = vrot.lane.b32.xlu1 %v4363_v25, %s4617_s10  ;;  %v4871_v25 = vld [vmem:[#allocation2 + $0x2f] sm:$0xff]  ;;  %1740 = vmatpush.msra.mxu1 %v1466_v61 }
  0x5b   : > { %4359 = vrot.lane.b32.xlu0 %v4358_v30, %s4617_s10  ;;  %v4882_v30 = vsel %vm455_vm12, 1.0, %v7567_v1  ;;  %v1491_v61 = vld [vmem:[#allocation4 + $0x170] sm:$0xff] }
  0x5c   : > { %7705 = vst [vmem:[#allocation18_spill] sm:$0xff] %v4882_v30  ;;  %v820_v46 = vmul.f32 %v4882_v30, %v4884_v32  ;;  %1741 = vmatpush.msra.mxu1 %v1465_v4  ;;  %v299_v4 = vadd.s32 72, %v4666_v2  ;;  %v667_v32 = vmul.f32 %v4728_v29, %v4714_v20  ;;  %v5071_v29 = vld [vmem:[#allocation2 + $0xa1] sm:$0xff] }
  0x5d   : > { %4339 = vrot.lane.b32.xlu2 %v4338_v28, %s4617_s10  ;;  %v296_v28 = vadd.s32 48, %v4666_v2  ;;  %7734 = vst [vmem:[#allocation43_spill] sm:$0xff] %v5071_v29 }
  0x5e   : > { %1742 = vmatpush.msra.mxu1 %v1464_v11  ;;  %v331_v6 = vand.u32 15, %v299_v4  ;;  %v1490_v11 = vld [vmem:[#allocation4 + $0x168] sm:$0xff] }
  0x5f   : > { %v328_v41 = vand.u32 15, %v296_v28  ;;  %v300_v28 = vadd.s32 80, %v4666_v2 }
  0x60   : > { %1743 = vmatpush.msra.mxu1 %v1463_v37  ;;  %vm459_vm1 = vcmp.lt.s32.totalorder %v331_v6, 15  ;;  %v4974_v6 = vld [vmem:[#allocation2 + $0x67] sm:$0xff] }
  0x61   : > { %vm360_vm15 = vcmp.ge.s32.totalorder %v328_v41, 1  ;;  %v4939_v24 = vsel %vm459_vm1, 1.0, %v7567_v1  ;;  %v332_v41 = vand.u32 15, %v300_v28  ;;  %v302_v28 = vadd.s32 96, %v4666_v2 }
  0x62   : > { %1077 = vrot.lane.b32.xlu1 %v779_v47, %s4617_s10  ;;  %v1446_v47 = vld [vmem:[#allocation4 + $0x8] sm:$0xff]  ;;  %v4906_v56 = vsel %vm360_vm15, 1.0, %v7567_v1  ;;  %1744 = vmatpush.msra.mxu1 %v1462_v48  ;;  %7712 = vst [vmem:[#allocation25_spill] sm:$0xff] %v4939_v24  ;;  %v339_v48 = vand.u32 15, %v307_v22 }
  0x63   : > { %4369 = vrot.lane.b32.xlu0 %v4368_v51, %s4617_s10  ;;  %4212 = vmatpush.msra.mxu2 %v1446_v47  ;;  %v1461_v51 = vld [vmem:[#allocation4 + $0x80] sm:$0xff]  ;;  %7709 = vst [vmem:[#allocation22_spill] sm:$0xff] %v4906_v56  ;;  %v785_v58 = vmul.f32 %v4906_v56, %v4908_v57  ;;  %vm364_vm3 = vcmp.ge.s32.totalorder %v332_v41, 1 }
  0x64   : > { %1631 = vmatpush.msra.mxu0 %v1446_v47  ;;  %4229 = vmatpush.msra.mxu3 %v1461_v51  ;;  %v4949_v47 = vld [vmem:[#allocation2 + $0x87] sm:$0xff]  ;;  %vm4965_vm4 = vcmp.lt.s32.totalorder %v339_v48, 15  ;;  %v4972_v4 = vsel %vm364_vm3, 1.0, %v7567_v1 }
  0x65   : > { %4354 = vrot.lane.b32.xlu2 %v4353_v49, %s4617_s10  ;;  %v781_v49 = vmul.f32 %v4888_v38, %v4890_v40  ;;  %4213 = vmatpush.msra.mxu2 %v1445_v50  ;;  %7720 = vst [vmem:[#allocation31_spill] sm:$0xff] %v4972_v4 }
  0x66   : > { %1632 = vmatpush.msra.mxu0 %v1445_v50  ;;  %1956 = vmatpush.msrb.mxu3 %v1508_v55  ;;  %v1515_v55 = vld [vmem:[#allocation4 + $0x230] sm:$0xff] }
  0x67   : > { %1843 = vmatpush.msrb.mxu2 %v1492_v54  ;;  %1745 = vmatpush.msra.mxu1 %v1461_v51  ;;  %v4958_v51 = vld [vmem:[#allocation2 + $0x51] sm:$0xff]  ;;  %v1505_v54 = vld [vmem:[#allocation4 + $0x1e0] sm:$0xff] }
  0x68   : > { %1957 = vmatpush.msrb.mxu3 %v1507_v62  ;;  %2077 = vmatpush.msrb.mxu0 %v1516_v63  ;;  %7716 = vst [vmem:[#allocation29_spill] sm:$0xff] %v4958_v51 }
  0x69   : > { %1844 = vmatpush.msrb.mxu2 %v1491_v61  ;;  %v665_v61 = vmul.f32 %v4706_v15, %v4949_v47  ;;  %v4998_v15 = vld [vmem:[#allocation2 + $0x91] sm:$0xff] }
  0x6a   : > { %1209 = vrot.lane.b32.xlu1 %v4849_v3, %s4617_s10  ;;  %1958 = vmatpush.msrb.mxu3 %v1506_v13  ;;  %v301_v13 = vadd.s32 88, %v4666_v2 }
  0x6b   : > { %1079 = vrot.lane.b32.xlu0 %v4852_v9, %s4617_s10  ;;  %1845 = vmatpush.msrb.mxu2 %v1490_v11  ;;  %v298_v11 = vadd.s32 64, %v4666_v2 }
  0x6c   : > { %1959 = vmatpush.msrb.mxu3 %v1505_v54  ;;  %2078 = vmatpush.msrb.mxu0 %v1515_v55  ;;  %v333_v48 = vand.u32 15, %v301_v13  ;;  %v789_v54 = vmul.f32 %v4972_v4, %v4974_v6  ;;  %v5003_v13 = vld [vmem:[#allocation2 + $0x57] sm:$0xff] }
  0x6d   : > { %1139 = vrot.lane.b32.xlu2 %v778_v5, %s4617_s10  ;;  %v4923_v5 = vld [vmem:[#allocation2 + $0x59] sm:$0xff] }
  0x6e   : > { %7711 = vst [vmem:[#allocation24_spill] sm:$0xff] %v4923_v5  ;;  %vm461_vm6 = vcmp.lt.s32.totalorder %v333_v48, 15  ;;  %v334_v48 = vand.u32 15, %v302_v28  ;;  %v309_v28 = vadd.s32 152, %v4666_v2 }
  0x70   : > { %vm366_vm7 = vcmp.ge.s32.totalorder %v334_v48, 1  ;;  %v1503_v48 = vld [vmem:[#allocation4 + $0x1d0] sm:$0xff] }
  0x72   : > { %1083 = vrot.lane.b32.xlu1 %v4871_v25, %s4617_s10 }
  0x73   : > { %1211 = vrot.lane.b32.xlu0 %v818_v27, %s4617_s10  ;;  %v297_v27 = vadd.s32 56, %v4666_v2 }
  0x75   : > { %1207 = vrot.lane.b32.xlu2 %v816_v26, %s4617_s10  ;;  %v4941_v26 = vld [vmem:[#allocation2 + $0x61] sm:$0xff]  ;;  %v329_v37 = vand.u32 15, %v297_v27  ;;  %v4980_v27 = vld [vmem:[#allocation2 + $0x89] sm:$0xff] }
  0x76   : > { %7713 = vst [vmem:[#allocation26_spill] sm:$0xff] %v4941_v26 }
  0x77   : > { %vm457_vm2 = vcmp.lt.s32.totalorder %v329_v37, 15 }
  0x78   : > { %v4956_v50 = vsel %vm457_vm2, 1.0, %v7567_v1 }
  0x79   : > { %7715 = vst [vmem:[#allocation28_spill] sm:$0xff] %v4956_v50 }
  0x7a   : > { %1215 = vrot.lane.b32.xlu1 %v820_v46, %s4617_s10  ;;  %v824_v46 = vmul.f32 %v4939_v24, %v4941_v26  ;;  %v5006_v26 = vsel %vm461_vm6, 1.0, %v7567_v1 }
  0x7b   : > { %1085 = vrot.lane.b32.xlu0 %v783_v52, %s4617_s10  ;;  %v1489_v52 = vld [vmem:[#allocation4 + $0x160] sm:$0xff]  ;;  %7724 = vst [vmem:[#allocation35_spill] sm:$0xff] %v5006_v26 }
  0x7c   : > { %1846 = vmatpush.msrb.mxu2 %v1489_v52  ;;  %v4989_v52 = vsel %vm4965_vm4, 1.0, %v7567_v1 }
  0x7d   : > { %1081 = vrot.lane.b32.xlu2 %v781_v49, %s4617_s10  ;;  %7722 = vst [vmem:[#allocation33_spill] sm:$0xff] %v4989_v52 }
  0x82   : > { %1089 = vrot.lane.b32.xlu1 %v785_v58, %s4617_s10  ;;  %v822_v58 = vmul.f32 %v4956_v50, %v4958_v51  ;;  %v5036_v50 = vld [vmem:[#allocation2 + $0x77] sm:$0xff] }
  0x83   : > { %1217 = vrot.lane.b32.xlu0 %v4915_v60, %s4617_s10  ;;  %v5022_v60 = vld [vmem:[#allocation2 + $0x8f] sm:$0xff] }
  0x85   : > { %1213 = vrot.lane.b32.xlu2 %v4913_v59, %s4617_s10 }
  0x8a   : > { %1221 = vrot.lane.b32.xlu1 %v4923_v5, %s4617_s10  ;;  %v762_v5 = vmul.f32 %v4989_v52, %v4998_v15 }
  0x8b   : > { %1091 = vrot.lane.b32.xlu0 %v4927_v10, %s4617_s10 }
  0x8d   : > { %1087 = vrot.lane.b32.xlu2 %v4925_v8, %s4617_s10 }
  0x8f   : > { %v4935_v18 = vpop.permute.xlu2 %4274 }
  0x91   : > { %v4951_v49 = vpop.permute.xlu1 %4264 }
  0x92   : > { %7714 = vst [vmem:[#allocation27_spill] sm:$0xff] %v4951_v49  ;;  %1095 = vrot.lane.b32.xlu1 %v4945_v33, %s4617_s10 }
  0x93   : > { %1223 = vrot.lane.b32.xlu0 %v824_v46, %s4617_s10  ;;  %v330_v46 = vand.u32 15, %v298_v11  ;;  %v617_v11 = vld [vmem:[#allocation2 + $0x7] sm:$0xff] }
  0x95   : > { %v4978_v22 = vpop.permute.xlu0 %4254  ;;  %1219 = vrot.lane.b32.xlu2 %v822_v58, %s4617_s10  ;;  %vm362_vm5 = vcmp.ge.s32.totalorder %v330_v46, 1 }
  0x96   : > { %7721 = vst [vmem:[#allocation32_spill] sm:$0xff] %v4978_v22  ;;  %v4257_v37 = vunpack.i.h.bf16 %v4978_v22  ;;  %v7565_v41 = vunpack.i.l.bf16 %v4978_v22  ;;  %v5001_v62 = vsel %vm362_vm5, 1.0, %v7567_v1  ;;  %v5008_v22 = vld [vmem:[#allocation2 + $0x71] sm:$0xff]  ;;  %v649_v1 = vmul.f32 %v4833_v35, %v617_v11 }
  0x97   : > { %v4969_v63 = vpop.permute.xlu2 %4279  ;;  %7723 = vst [vmem:[#allocation34_spill] sm:$0xff] %v5001_v62  ;;  %v826_v46 = vmul.f32 %v5006_v26, %v5008_v22 }
  0x98   : > { %7719 = vst [vmem:[#allocation30_spill] sm:$0xff] %v4969_v63  ;;  %v1333_v55 = vsel %vm546_vm0, %v665_v61, %v7565_v41  ;;  %v1365_v58 = vsel %vm546_vm0, %v4980_v27, %v4257_v37  ;;  %v1488_v61 = vld [vmem:[#allocation4 + $0x158] sm:$0xff]  ;;  %v787_v37 = vmul.f32 %v5001_v62, %v5003_v13 }
  0x99   : > { %1681 = vmatmul.f32.vlgmr.msra.gmra.mxu2 %v1333_v55  ;;  %1794 = vmatmul.f32.vlgmr.msra.gmra.mxu3 %v1365_v58  ;;  %7725 = vst [vmem:[#allocation36_spill] sm:$0xff] %v5008_v22  ;;  %v1504_v41 = vld [vmem:[#allocation4 + $0x1d8] sm:$0xff]  ;;  %v4266_v55 = vunpack.i.l.bf16 %v4951_v49 }
  0x9a   : > { %1847 = vmatpush.msrb.mxu2 %v1488_v61  ;;  %1960 = vmatpush.msrb.mxu3 %v1504_v41  ;;  %v341_v41 = vand.u32 15, %v309_v28  ;;  %v5042_v28 = vld [vmem:[#allocation2 + $0x79] sm:$0xff] }
  0x9b   : > { %1097 = vrot.lane.b32.xlu0 %v789_v54, %s4617_s10  ;;  %1227 = vrot.lane.b32.xlu1 %v826_v46, %s4617_s10  ;;  %v1366_v54 = vsel %vm546_vm0, %v762_v5, %v4266_v55  ;;  %v7728_v46 = vmov 0.0   ;;  %v1514_v5 = vld [vmem:[#allocation4 + $0x228] sm:$0xff]  ;;  %7730 = vst [vmem:[#allocation40_spill] sm:$0xff] %v5042_v28 }
  0x9c   : > { %v4270_v58 = vpop.permute.xlu1 %4269  ;;  %v5034_v52 = vsel %vm366_vm7, 1.0, %v7728_v46  ;;  %v618_v55 = vld [vmem:[#allocation2 + $0xf] sm:$0xff]  ;;  %1961 = vmatpush.msrb.mxu3 %v1503_v48  ;;  %2079 = vmatpush.msrb.mxu0 %v1514_v5  ;;  %vm469_vm8 = vcmp.lt.s32.totalorder %v341_v41, 15  ;;  %v7732_v5 = vunpack.i.h.bf16 %v4951_v49 }
  0x9d   : > { %v4260_v51 = vpop.permute.xlu0 %4259  ;;  %1093 = vrot.lane.b32.xlu2 %v787_v37, %s4617_s10  ;;  %7729 = vst [vmem:[#allocation39_spill] sm:$0xff] %v5034_v52  ;;  %v4271_v37 = vunpack.i.l.bf16 %v4270_v58  ;;  %v5069_v41 = vsel %vm469_vm8, 1.0, %v7728_v46  ;;  %v4277_v46 = vunpack.i.h.bf16 %v4935_v18 }
  0x9e   : > { %v4262_v22 = vunpack.i.h.bf16 %v4260_v51  ;;  %v4261_v26 = vunpack.i.l.bf16 %v4260_v51  ;;  %v1487_v51 = vld [vmem:[#allocation4 + $0x150] sm:$0xff]  ;;  %7733 = vst [vmem:[#allocation42_spill] sm:$0xff] %v5069_v41 }
  0x9f   : > { %v5019_v24 = vpop.permute.xlu2 %4294  ;;  %1848 = vmatpush.msrb.mxu2 %v1487_v51  ;;  %v1318_v48 = vsel %vm546_vm0, %v618_v55, %v4271_v37  ;;  %v1486_v37 = vld [vmem:[#allocation4 + $0x148] sm:$0xff] }
  0xa0   : > { %7726 = vst [vmem:[#allocation37_spill] sm:$0xff] %v5019_v24  ;;  %v1317_v61 = vsel %vm546_vm0, %v649_v1, %v4262_v22  ;;  %v5030_v11 = vsel %vm546_vm0, %v5022_v60, %v4261_v26  ;;  %v791_v1 = vmul.f32 %v5034_v52, %v5036_v50  ;;  %v4272_v22 = vunpack.i.h.bf16 %v4270_v58  ;;  %v1502_v55 = vld [vmem:[#allocation4 + $0x1c8] sm:$0xff] }
  0xa1   : > { %7727 = vst [vmem:[#allocation38_spill] sm:$0xff] %v5030_v11  ;;  %1633 = vmatmul.f32.vlgmr.msra.gmra.mxu0 %v1317_v61  ;;  %1684 = vmatmul.f32.gmra.mxu2 %v5030_v11  ;;  %v849_v61 = vmul.f32 %v4833_v35, %v4890_v40  ;;  %v4281_v35 = vunpack.i.l.bf16 %v4969_v63 }
  0xa2   : > { %1797 = vmatmul.f32.gmra.mxu3 %v1366_v54  ;;  %v1367_v11 = vsel %vm546_vm0, %v5050_v7, %v4272_v22  ;;  %v5073_v22 = vld [vmem:[#allocation2 + $0x69] sm:$0xff]  ;;  %1849 = vmatpush.msrb.mxu2 %v1486_v37  ;;  %v1485_v37 = vld [vmem:[#allocation4 + $0x140] sm:$0xff] }
  0xa3   : > { %1101 = vrot.lane.b32.xlu1 %v791_v1, %s4617_s10  ;;  %1229 = vrot.lane.b32.xlu0 %v5042_v28, %s4617_s10  ;;  %v1335_v1 = vsel %vm546_vm0, %v667_v32, %v7732_v5  ;;  %7735 = vst [vmem:[#allocation44_spill] sm:$0xff] %v5073_v22  ;;  %v5080_v32 = vld [vmem:[#allocation2 + $0x7f] sm:$0xff] }
  0xa4   : > { %v5040_v26 = vpop.permute.xlu1 %4289  ;;  %1962 = vmatpush.msrb.mxu3 %v1502_v55  ;;  %1850 = vmatpush.msrb.mxu2 %v1485_v37  ;;  %v5126_v37 = vld [vmem:[#allocation3] sm:$0xff] }
  0xa5   : > { %v7588_v54 = vunpack.i.h.bf16 %v5040_v26  ;;  %v4285_v58 = vpop.permute.xlu0 %4284  ;;  %1225 = vrot.lane.b32.xlu2 %v5073_v22, %s4617_s10  ;;  %v1501_v22 = vld [vmem:[#allocation4 + $0x1c0] sm:$0xff] }
  0xa6   : > { %v4286_v28 = vunpack.i.l.bf16 %v4285_v58  ;;  %1963 = vmatpush.msrb.mxu3 %v1501_v22 }
  0xa7   : > { %v5053_v51 = vpop.permute.xlu2 %4309  ;;  %v5063_v20 = vsel %vm546_vm0, %v849_v61, %v7588_v54  ;;  %v764_v54 = vmul.f32 %v5069_v41, %v5071_v29  ;;  %v5104_v29 = vld [vmem:[#allocation2 + $0x6f] sm:$0xff] }
  0xa8   : > { %7731 = vst [vmem:[#allocation41_spill] sm:$0xff] %v5053_v51 }
  0xa9   : > { %1636 = vmatmul.f32.gmra.mxu0 %v1318_v48  ;;  %1687 = vmatmul.f32.gmra.mxu2 %v1335_v1  ;;  %v4276_v48 = vunpack.i.l.bf16 %v4935_v18  ;;  %v311_v1 = vadd.s32 168, %v4666_v2  ;;  %v1368_v55 = vsel %vm546_vm0, %v764_v54, %v4281_v35  ;;  %v4287_v35 = vunpack.i.h.bf16 %v4285_v58 }
  0xaa   : > { %1800 = vmatmul.f32.gmra.mxu3 %v1367_v11  ;;  %v651_v11 = vmul.f32 %v4888_v38, %v4835_v36  ;;  %v1513_v38 = vld [vmem:[#allocation4 + $0x220] sm:$0xff]  ;;  %v1320_v58 = vsel %vm546_vm0, %v4852_v9, %v4286_v28  ;;  %v4291_v9 = vunpack.i.l.bf16 %v5040_v26  ;;  %v1500_v28 = vld [vmem:[#allocation4 + $0x1b8] sm:$0xff] }
  0xab   : > { %1233 = vrot.lane.b32.xlu1 %v4980_v27, %s4617_s10  ;;  %1103 = vrot.lane.b32.xlu0 %v5080_v32, %s4617_s10  ;;  %v5101_v49 = vsel %vm546_vm0, %v4703_v14, %v4276_v48  ;;  %v343_v27 = vand.u32 15, %v311_v1  ;;  %v669_v14 = vmul.f32 %v4749_v44, %v4735_v34  ;;  %v5111_v48 = vld [vmem:[#allocation2 + $0xa9] sm:$0xff]  ;;  %v1484_v1 = vld [vmem:[#allocation4 + $0x138] sm:$0xff]  ;;  %v304_v44 = vadd.s32 112, %v4666_v2 }
  0xac   : > { %v5076_v61 = vpop.permute.xlu1 %4304  ;;  %v1319_v36 = vsel %vm546_vm0, %v651_v11, %v4277_v46  ;;  %7736 = vst [vmem:[#allocation45_spill] sm:$0xff] %v5101_v49  ;;  %2080 = vmatpush.msrb.mxu0 %v1513_v38  ;;  %v7596_v46 = vunpack.i.h.bf16 %v4969_v63  ;;  %v4373_v38 = vpack.i.bf16 %v5050_v7, %v5022_v60  ;;  %v1369_v22 = vsel %vm546_vm0, %v5111_v48, %v4287_v35 }
  0xad   : > { %v5090_v5 = vpop.permute.xlu0 %4299  ;;  %1099 = vrot.lane.b32.xlu2 %v5104_v29, %s4617_s10  ;;  %vm471_vm9 = vcmp.lt.s32.totalorder %v343_v27, 15  ;;  %1851 = vmatpush.msrb.mxu2 %v1484_v1  ;;  %v653_v60 = vmul.f32 %v4893_v42, %v4890_v40  ;;  %v4296_v27 = vunpack.i.l.bf16 %v5019_v24  ;;  %v5153_v40 = vsel %vm546_vm0, %v4784_v12, %v4291_v9  ;;  %v1483_v12 = vld [vmem:[#allocation4 + $0x130] sm:$0xff]  ;;  %v5173_v42 = vld [vmem:[#allocation2 + $0xb9] sm:$0xff] }
  0xae   : > { %v1337_v34 = vsel %vm546_vm0, %v669_v14, %v7596_v46  ;;  %1964 = vmatpush.msrb.mxu3 %v1500_v28  ;;  %7740 = vst [vmem:[#allocation48_spill] sm:$0xff] %v5153_v40  ;;  %v1499_v9 = vld [vmem:[#allocation4 + $0x1b0] sm:$0xff] }
  0xaf   : > { %v5096_v18 = vpop.permute.xlu2 %4324  ;;  %1852 = vmatpush.msrb.mxu2 %v1483_v12  ;;  %7744 = vst [vmem:[#allocation52_spill] sm:$0xff] %v5173_v42 }
  0xb0   : > { %1965 = vmatpush.msrb.mxu3 %v1499_v9  ;;  %v5190_v9 = vld [vmem:[#allocation2 + $0xc1] sm:$0xff] }
  0xb1   : > { %1639 = vmatmul.f32.gmra.mxu0 %v1319_v36  ;;  %1690 = vmatmul.f32.gmra.mxu2 %v5101_v49  ;;  %v5131_v36 = vld [vmem:[#allocation2 + $0xb1] sm:$0xff] }
  0xb2   : > { %1803 = vmatmul.f32.gmra.mxu3 %v1368_v55  ;;  %v5129_v55 = vsel %vm471_vm9, 1.0, %v5126_v37 }
  0xb3   : > { %7737 = vst [vmem:[#allocation46_spill] sm:$0xff] %v5129_v55  ;;  %4374 = vrot.lane.b32.xlu1 %v4373_v38, %s4617_s10  ;;  %v766_v14 = vmul.f32 %v5129_v55, %v5131_v36  ;;  %v313_v38 = vadd.s32 184, %v4666_v2  ;;  %v1497_v55 = vld [vmem:[#allocation4 + $0x1a0] sm:$0xff] }
  0xb4   : > { %v5106_v54 = vpop.permute.xlu1 %4319 }
  0xb5   : > { %v5115_v11 = vpop.permute.xlu0 %4314  ;;  %v1370_v63 = vsel %vm546_vm0, %v766_v14, %v4296_v27  ;;  %v345_v28 = vand.u32 15, %v313_v38  ;;  %v336_v27 = vand.u32 15, %v304_v44 }
  0xb7   : > { %v5134_v7 = vpop.permute.xlu2 %4339  ;;  %vm473_vm11 = vcmp.lt.s32.totalorder %v345_v28, 15  ;;  %vm368_vm12 = vcmp.ge.s32.totalorder %v336_v27, 1  ;;  %v1498_v27 = vld [vmem:[#allocation4 + $0x1a8] sm:$0xff] }
  0xb8   : > { %7738 = vst [vmem:[#allocation47_spill] sm:$0xff] %v5134_v7  ;;  %v5188_v12 = vsel %vm473_vm11, 1.0, %v5126_v37  ;;  %v5194_v28 = vsel %vm368_vm12, 1.0, %v5126_v37  ;;  %1966 = vmatpush.msrb.mxu3 %v1498_v27  ;;  %v855_v27 = vmul.f32 %v4906_v56, %v5003_v13 }
  0xb9   : > { %1642 = vmatmul.f32.gmra.mxu0 %v1320_v58  ;;  %1693 = vmatmul.f32.gmra.mxu2 %v1337_v34  ;;  %v303_v58 = vadd.s32 104, %v4666_v2  ;;  %7745 = vst [vmem:[#allocation53_spill] sm:$0xff] %v5188_v12 }
  0xba   : > { %1806 = vmatmul.f32.gmra.mxu3 %v1369_v22  ;;  %v7739_v22 = vunpack.i.h.bf16 %v5040_v26  ;;  %v5161_v26 = vld [vmem:[#allocation2 + $0x81] sm:$0xff]  ;;  %7746 = vst [vmem:[#allocation54_spill] sm:$0xff] %v5194_v28 }
  0xbb   : > { %v335_v46 = vand.u32 15, %v303_v58  ;;  %7742 = vst [vmem:[#allocation50_spill] sm:$0xff] %v5161_v26  ;;  %v1512_v58 = vld [vmem:[#allocation4 + $0x218] sm:$0xff]  ;;  %1967 = vmatpush.msrb.mxu3 %v1497_v55 }
  0xbc   : > { %v5140_v35 = vpop.permute.xlu1 %4334  ;;  %v1321_v34 = vsel %vm546_vm0, %v653_v60, %v7739_v22  ;;  %v4301_v60 = vunpack.i.l.bf16 %v5090_v5  ;;  %2081 = vmatpush.msrb.mxu0 %v1512_v58  ;;  %v655_v58 = vmul.f32 %v4906_v56, %v4895_v43  ;;  %v315_v43 = vadd.s32 200, %v4666_v2  ;;  %v5235_v56 = vld [vmem:[#allocation2 + $0xc9] sm:$0xff] }
  0xbd   : > { %v5145_v1 = vpop.permute.xlu0 %4329  ;;  %vm463_vm10 = vcmp.lt.s32.totalorder %v335_v46, 15  ;;  %v4302_v46 = vunpack.i.h.bf16 %v5090_v5 }
  0xbe   : > { %v5159_v49 = vsel %vm463_vm10, 1.0, %v5126_v37  ;;  %v5180_v44 = vsel %vm546_vm0, %v4871_v25, %v4301_v60  ;;  %v4306_v60 = vunpack.i.l.bf16 %v5076_v61 }
  0xbf   : > { %7741 = vst [vmem:[#allocation49_spill] sm:$0xff] %v5159_v49  ;;  %v828_v22 = vmul.f32 %v5159_v49, %v5161_v26  ;;  %v5169_v38 = vpop.permute.xlu2 %4354  ;;  %v1371_v5 = vsel %vm546_vm0, %v5173_v42, %v4302_v46  ;;  %v793_v46 = vmul.f32 %v5194_v28, %v4949_v47  ;;  %v7747_v47 = vunpack.i.h.bf16 %v5076_v61  ;;  %v1481_v42 = vld [vmem:[#allocation4 + $0x120] sm:$0xff] }
  0xc0   : > { %7743 = vst [vmem:[#allocation51_spill] sm:$0xff] %v5169_v38  ;;  %v5219_v49 = vsel %vm546_vm0, %v4802_v31, %v4306_v60  ;;  %v4317_v60 = vunpack.i.h.bf16 %v5115_v11 }
  0xc1   : > { %1645 = vmatmul.f32.gmra.mxu0 %v1321_v34  ;;  %1696 = vmatmul.f32.gmra.mxu2 %v5153_v40  ;;  %v7606_v34 = vunpack.i.h.bf16 %v5019_v24  ;;  %v4401_v40 = vld [vmem:[#allocation2 + $0xb7] sm:$0xff]  ;;  %v1323_v24 = vsel %vm546_vm0, %v655_v58, %v7747_v47  ;;  %7748 = vst [vmem:[#allocation55_spill] sm:$0xff] %v5219_v49  ;;  %v7749_v47 = vunpack.i.h.bf16 %v5140_v35 }
  0xc2   : > { %1809 = vmatmul.f32.gmra.mxu3 %v1370_v63  ;;  %v671_v63 = vmul.f32 %v4401_v40, %v4772_v0  ;;  %1231 = vrot.lane.b32.xlu2 %v828_v22, %s4617_s10  ;;  %v1482_v22 = vld [vmem:[#allocation4 + $0x128] sm:$0xff]  ;;  %v4316_v0 = vunpack.i.l.bf16 %v5115_v11  ;;  %v1511_v58 = vld [vmem:[#allocation4 + $0x210] sm:$0xff] }
  0xc3   : > { %1853 = vmatpush.msrb.mxu2 %v1482_v22  ;;  %v5229_v31 = vsel %vm546_vm0, %v855_v27, %v7749_v47  ;;  %2082 = vmatpush.msrb.mxu0 %v1511_v58  ;;  %v714_v27 = vld [vmem:[#allocation2 + $0x11] sm:$0xff] }
  0xc4   : > { %v5167_v14 = vpop.permute.xlu1 %4349  ;;  %v1339_v40 = vsel %vm546_vm0, %v671_v63, %v7606_v34  ;;  %v4311_v63 = vunpack.i.l.bf16 %v5053_v51  ;;  %v5241_v11 = vsel %vm546_vm0, %v4925_v8, %v4316_v0  ;;  %v5253_v47 = vld [vmem:[#allocation2 + $0xd1] sm:$0xff]  ;;  %v4321_v8 = vunpack.i.l.bf16 %v5106_v54 }
  0xc5   : > { %v5176_v26 = vpop.permute.xlu0 %4344  ;;  %1854 = vmatpush.msrb.mxu2 %v1481_v42  ;;  %v1373_v42 = vsel %vm546_vm0, %v5235_v56, %v4317_v60  ;;  %7751 = vst [vmem:[#allocation57_spill] sm:$0xff] %v5253_v47  ;;  %v657_v60 = vmul.f32 %v5001_v62, %v4908_v57 }
  0xc7   : > { %v5210_v25 = vpop.permute.xlu2 %1139 }
  0xc9   : > { %1648 = vmatmul.f32.gmra.mxu0 %v5180_v44  ;;  %1699 = vmatmul.f32.gmra.mxu2 %v1339_v40  ;;  %v768_v40 = vmul.f32 %v5188_v12, %v5190_v9  ;;  %v347_v12 = vand.u32 15, %v315_v43  ;;  %v4402_v43 = vld [vmem:[#allocation2 + $0xc7] sm:$0xff] }
  0xca   : > { %1812 = vmatmul.f32.gmra.mxu3 %v1371_v5  ;;  %1105 = vrot.lane.b32.xlu2 %v793_v46, %s4617_s10  ;;  %v713_v46 = vld [vmem:[#allocation2 + $0x9] sm:$0xff] }
  0xcb   : > { %v1372_v22 = vsel %vm546_vm0, %v768_v40, %v4311_v63  ;;  %vm475_vm13 = vcmp.lt.s32.totalorder %v347_v12, 15  ;;  %v746_v12 = vmul.f32 %v4862_v16, %v714_v27 }
  0xcc   : > { %v5203_v34 = vpop.permute.xlu1 %4364  ;;  %v5251_v58 = vsel %vm475_vm13, 1.0, %v5126_v37 }
  0xcd   : > { %v5208_v5 = vpop.permute.xlu0 %4359  ;;  %7750 = vst [vmem:[#allocation56_spill] sm:$0xff] %v5251_v58 }
  0xcf   : > { %v5245_v55 = vpop.permute.xlu2 %1207 }
  0xd1   : > { %1651 = vmatmul.f32.gmra.mxu0 %v1323_v24  ;;  %1702 = vmatmul.f32.gmra.mxu2 %v5219_v49  ;;  %v7620_v24 = vunpack.i.h.bf16 %v5053_v51 }
  0xd2   : > { %1815 = vmatmul.f32.gmra.mxu3 %v1372_v22  ;;  %v673_v22 = vmul.f32 %v4402_v43, %v4794_v23  ;;  %v4326_v43 = vunpack.i.l.bf16 %v5096_v18  ;;  %v4403_v23 = vld [vmem:[#allocation2 + $0xcf] sm:$0xff] }
  0xd3   : > { %v5270_v57 = vsel %vm546_vm0, %v4403_v23, %v4321_v8  ;;  %v7627_v23 = vunpack.i.h.bf16 %v5096_v18  ;;  %v4404_v8 = vld [vmem:[#allocation2 + $0xd7] sm:$0xff] }
  0xd4   : > { %v1078_v63 = vpop.permute.xlu1 %1077 }
  0xd5   : > { %v1349_v40 = vsel %vm546_vm0, %v713_v46, %v1078_v63  ;;  %v5237_v49 = vpop.permute.xlu0 %4369  ;;  %v1341_v46 = vsel %vm546_vm0, %v673_v22, %v7620_v24  ;;  %v1480_v63 = vld [vmem:[#allocation4 + $0x118] sm:$0xff]  ;;  %v770_v22 = vmul.f32 %v5251_v58, %v5253_v47  ;;  %v317_v24 = vadd.s32 216, %v4666_v2  ;;  %v1495_v47 = vld [vmem:[#allocation4 + $0x190] sm:$0xff] }
  0xd6   : > { %1746 = vmatmul.f32.vlgmr.msra.gmra.mxu1 %v1349_v40  ;;  %v1496_v40 = vld [vmem:[#allocation4 + $0x198] sm:$0xff]  ;;  %1855 = vmatpush.msrb.mxu2 %v1480_v63 }
  0xd7   : > { %1968 = vmatpush.msrb.mxu3 %v1496_v40  ;;  %v1374_v51 = vsel %vm546_vm0, %v770_v22, %v4326_v43  ;;  %v1082_v63 = vpop.permute.xlu2 %1081  ;;  %v349_v40 = vand.u32 15, %v317_v24  ;;  %v675_v43 = vmul.f32 %v4404_v8, %v4807_v39  ;;  %v5282_v22 = vld [vmem:[#allocation2 + $0xd9] sm:$0xff]  ;;  %v319_v8 = vadd.s32 232, %v4666_v2 }
  0xd9   : > { %1654 = vmatmul.f32.gmra.mxu0 %v5241_v11  ;;  %1705 = vmatmul.f32.gmra.mxu2 %v1341_v46  ;;  %vm477_vm14 = vcmp.lt.s32.totalorder %v349_v40, 15  ;;  %v4336_v40 = vunpack.i.l.bf16 %v5140_v35 }
  0xda   : > { %1818 = vmatmul.f32.gmra.mxu3 %v1373_v42  ;;  %v7752_v42 = vunpack.i.h.bf16 %v5106_v54 }
  0xdb   : > { %1969 = vmatpush.msrb.mxu3 %v1495_v47  ;;  %v748_v47 = vmul.f32 %v4867_v19, %v4864_v17 }
  0xdc   : > { %v1325_v27 = vsel %vm546_vm0, %v657_v60, %v7752_v42  ;;  %v5273_v62 = vpop.permute.xlu1 %1209  ;;  %v1510_v60 = vld [vmem:[#allocation4 + $0x208] sm:$0xff]  ;;  %v4332_v42 = vunpack.i.h.bf16 %v5145_v1 }
  0xdd   : > { %v1080_v46 = vpop.permute.xlu0 %1079  ;;  %2083 = vmatpush.msrb.mxu0 %v1510_v60  ;;  %v1494_v60 = vld [vmem:[#allocation4 + $0x188] sm:$0xff] }
  0xde   : > { %v1350_v0 = vsel %vm546_vm0, %v746_v12, %v1080_v46  ;;  %v4331_v12 = vunpack.i.l.bf16 %v5145_v1  ;;  %v1479_v46 = vld [vmem:[#allocation4 + $0x110] sm:$0xff]  ;;  %v1375_v1 = vsel %vm546_vm0, %v5282_v22, %v4332_v42  ;;  %v4341_v42 = vunpack.i.l.bf16 %v5134_v7  ;;  %1970 = vmatpush.msrb.mxu3 %v1494_v60  ;;  %v1493_v60 = vld [vmem:[#allocation4 + $0x180] sm:$0xff] }
  0xdf   : > { %1749 = vmatmul.f32.gmra.mxu1 %v1350_v0  ;;  %1856 = vmatpush.msrb.mxu2 %v1479_v46  ;;  %v1351_v0 = vsel %vm546_vm0, %v4839_v45, %v1082_v63  ;;  %v1343_v45 = vsel %vm546_vm0, %v675_v43, %v7627_v23  ;;  %v5300_v63 = vld [vmem:[#allocation2 + $0xe1] sm:$0xff]  ;;  %v7754_v43 = vunpack.i.h.bf16 %v5140_v35  ;;  %v5318_v39 = vpop.permute.xlu2 %1213 }
  0xe0   : > { %v1478_v46 = vld [vmem:[#allocation4 + $0x108] sm:$0xff]  ;;  %v1477_v35 = vld [vmem:[#allocation4 + $0x100] sm:$0xff]  ;;  %1971 = vmatpush.msrb.mxu3 %v1493_v60  ;;  %v7635_v60 = vunpack.i.h.bf16 %v5167_v14 }
  0xe1   : > { %1657 = vmatmul.f32.gmra.mxu0 %v1325_v27  ;;  %1708 = vmatmul.f32.gmra.mxu2 %v5270_v57  ;;  %v5298_v27 = vsel %vm477_vm14, 1.0, %v5126_v37 }
  0xe2   : > { %1821 = vmatmul.f32.gmra.mxu3 %v1374_v51  ;;  %v5286_v51 = vsel %vm546_vm0, %v4927_v10, %v4331_v12  ;;  %7753 = vst [vmem:[#allocation58_spill] sm:$0xff] %v5298_v27  ;;  %v659_v12 = vmul.f32 %v4972_v4, %v5003_v13  ;;  %v772_v17 = vmul.f32 %v5298_v27, %v5300_v63 }
  0xe3   : > { %1857 = vmatpush.msrb.mxu2 %v1478_v46 }
  0xe4   : > { %v1084_v10 = vpop.permute.xlu1 %1083  ;;  %v1376_v23 = vsel %vm546_vm0, %v772_v17, %v4341_v42  ;;  %v4406_v17 = vld [vmem:[#allocation2 + $0xe7] sm:$0xff] }
  0xe5   : > { %v5290_v24 = vpop.permute.xlu0 %1211  ;;  %1858 = vmatpush.msrb.mxu2 %v1477_v35 }
  0xe7   : > { %1752 = vmatmul.f32.gmra.mxu1 %v1351_v0  ;;  %v1352_v0 = vsel %vm546_vm0, %v748_v47, %v1084_v10  ;;  %v351_v47 = vand.u32 15, %v319_v8  ;;  %v4346_v10 = vunpack.i.l.bf16 %v5176_v26  ;;  %v1088_v35 = vpop.permute.xlu2 %1087 }
  0xe9   : > { %1660 = vmatmul.f32.gmra.mxu0 %v5286_v51  ;;  %1711 = vmatmul.f32.gmra.mxu2 %v1343_v45  ;;  %v4405_v45 = vld [vmem:[#allocation2 + $0xdf] sm:$0xff]  ;;  %vm479_vm15 = vcmp.lt.s32.totalorder %v351_v47, 15 }
  0xea   : > { %1824 = vmatmul.f32.gmra.mxu3 %v1375_v1  ;;  %v1327_v1 = vsel %vm546_vm0, %v659_v12, %v7754_v43  ;;  %v5315_v13 = vsel %vm546_vm0, %v4405_v45, %v4336_v40  ;;  %v1509_v12 = vld [vmem:[#allocation4 + $0x200] sm:$0xff]  ;;  %v4347_v43 = vunpack.i.h.bf16 %v5176_v26  ;;  %v7630_v40 = vunpack.i.h.bf16 %v5134_v7 }
  0xeb   : > { %2084 = vmatpush.msrb.mxu0 %v1509_v12  ;;  %v305_v26 = vadd.s32 120, %v4666_v2  ;;  %v5344_v47 = vsel %vm479_vm15, 1.0, %v5126_v37  ;;  %v4351_v12 = vunpack.i.l.bf16 %v5167_v14 }
  0xec   : > { %v5336_v45 = vpop.permute.xlu1 %1215  ;;  %7755 = vst [vmem:[#allocation59_spill] sm:$0xff] %v5344_v47 }
  0xed   : > { %v1086_v46 = vpop.permute.xlu0 %1085 }
  0xee   : > { %v1353_v42 = vsel %vm546_vm0, %v4849_v3, %v1086_v46  ;;  %v750_v46 = vmul.f32 %v4882_v30, %v4869_v21  ;;  %v4356_v21 = vunpack.i.l.bf16 %v5169_v38 }
  0xef   : > { %1755 = vmatmul.f32.gmra.mxu1 %v1352_v0  ;;  %v677_v0 = vmul.f32 %v4406_v17, %v4815_v53 }
  0xf1   : > { %1663 = vmatmul.f32.gmra.mxu0 %v1327_v1  ;;  %1714 = vmatmul.f32.gmra.mxu2 %v5315_v13  ;;  %v5327_v1 = vld [vmem:[#allocation2 + $0xe9] sm:$0xff]  ;;  %v1345_v3 = vsel %vm546_vm0, %v677_v0, %v7630_v40  ;;  %v1354_v0 = vsel %vm546_vm0, %v750_v46, %v1088_v35  ;;  %v4361_v35 = vunpack.i.l.bf16 %v5208_v5 }
  0xf2   : > { %1827 = vmatmul.f32.gmra.mxu3 %v1376_v23  ;;  %v5331_v23 = vsel %vm546_vm0, %v4945_v33, %v4346_v10  ;;  %v1377_v8 = vsel %vm546_vm0, %v5327_v1, %v4347_v43  ;;  %v5346_v33 = vld [vmem:[#allocation2 + $0xf1] sm:$0xff]  ;;  %v337_v10 = vand.u32 15, %v305_v26  ;;  %v661_v43 = vmul.f32 %v5034_v52, %v4974_v6 }
  0xf4   : > { %vm465_vm1 = vcmp.lt.s32.totalorder %v337_v10, 15  ;;  %v1329_v6 = vsel %vm546_vm0, %v661_v43, %v7635_v60  ;;  %v7633_v43 = vunpack.i.h.bf16 %v5169_v38 }
  0xf5   : > { %v5357_v17 = vsel %vm465_vm1, 1.0, %v5126_v37  ;;  %v5371_v53 = vpop.permute.xlu0 %1217 }
  0xf6   : > { %7756 = vst [vmem:[#allocation60_spill] sm:$0xff] %v5357_v17  ;;  %v830_v26 = vmul.f32 %v5357_v17, %v4998_v15  ;;  %v2631_v15 = vld [vmem:[%s7558_s4 + $0x78] sm:$0xff] }
  0xf7   : > { %1758 = vmatmul.f32.gmra.mxu1 %v1353_v42  ;;  %v774_v42 = vmul.f32 %v5344_v47, %v5346_v33 }
  0xf8   : > { %1235 = vrot.lane.b32.xlu0 %v830_v26, %s4617_s10  ;;  %2764 = vmatpush.msrb.mxu1 %v2631_v15  ;;  %v7759_v15 = vld [vmem:[#allocation19_spill] sm:$0xff] }
  0xf9   : > { %1666 = vmatmul.f32.gmra.mxu0 %v5331_v23  ;;  %1717 = vmatmul.f32.gmra.mxu2 %v1345_v3  ;;  %v321_v3 = vadd.s32 248, %v4666_v2  ;;  %v1378_v40 = vsel %vm546_vm0, %v774_v42, %v4356_v21  ;;  %v1090_v2 = vpop.permute.xlu1 %1089  ;;  %v4408_v42 = vld [vmem:[#allocation2 + $0xf7] sm:$0xff] }
  0xfa   : > { %1830 = vmatmul.f32.gmra.mxu3 %v1377_v8  ;;  %v4407_v8 = vld [vmem:[#allocation2 + $0xef] sm:$0xff]  ;;  %v1355_v21 = vsel %vm546_vm0, %v4913_v59, %v1090_v2 }
  0xfb   : > { %v5367_v10 = vsel %vm546_vm0, %v4407_v8, %v4351_v12  ;;  %v353_v46 = vand.u32 15, %v321_v3  ;;  %v4362_v12 = vunpack.i.h.bf16 %v5208_v5  ;;  %v5383_v8 = vld [vmem:[#allocation2 + $0xf9] sm:$0xff]  ;;  %v2630_v59 = vld [vmem:[%s7558_s4 + $0x70] sm:$0xff] }
  0xfc   : > { %7757 = vst [vmem:[#allocation61_spill] sm:$0xff] %v5367_v10  ;;  %2765 = vmatpush.msrb.mxu1 %v2630_v59 }
  0xfd   : > { %vm481_vm2 = vcmp.lt.s32.totalorder %v353_v46, 15  ;;  %v1379_v5 = vsel %vm546_vm0, %v5383_v8, %v4362_v12  ;;  %v7634_v12 = vunpack.i.h.bf16 %v5203_v34 }
  0xfe   : > { %v5404_v46 = vsel %vm481_vm2, 1.0, %v5126_v37 }
  0xff   : > { %1761 = vmatmul.f32.gmra.mxu1 %v1354_v0  ;;  %v7758_v0 = vld [vmem:[#allocation14_spill] sm:$0xff]  ;;  %7761 = vst [vmem:[#allocation19_spill] sm:$0xff] %v5404_v46 }
 0x100   : > { %v679_v26 = vmul.f32 %v4408_v42, %v7758_v0  ;;  %1241 = vrot.lane.b32.xlu0 %v5111_v48, %s4617_s10  ;;  %v5406_v48 = vld [vmem:[#allocation2 + $0x101] sm:$0xff]  ;;  %v663_v42 = vmul.f32 %v5194_v28, %v5036_v50  ;;  %v4413_v0 = vld [vmem:[#allocation2 + $0x37] sm:$0xff] }
 0x101   : > { %1669 = vmatmul.f32.gmra.mxu0 %v1329_v6  ;;  %1720 = vmatmul.f32.gmra.mxu2 %v5367_v10  ;;  %v5387_v6 = vsel %vm546_vm0, %v5104_v29, %v4361_v35  ;;  %v7760_v29 = vld [vmem:[#allocation28_spill] sm:$0xff]  ;;  %v1092_v35 = vpop.permute.xlu0 %1091 }
 0x102   : > { %1833 = vmatmul.f32.gmra.mxu3 %v1378_v40  ;;  %v5393_v40 = vpop.permute.xlu2 %1219  ;;  %v1347_v3 = vsel %vm546_vm0, %v679_v26, %v7633_v43  ;;  %v752_v2 = vmul.f32 %v7760_v29, %v7759_v15  ;;  %v776_v26 = vmul.f32 %v5404_v46, %v5406_v48  ;;  %v1331_v59 = vsel %vm546_vm0, %v663_v42, %v7634_v12  ;;  %v4409_v15 = vld [vmem:[#allocation2 + $0xff] sm:$0xff]  ;;  %v5424_v43 = vpop.permute.xlu1 %1221  ;;  %v2629_v50 = vld [vmem:[%s7558_s4 + $0x68] sm:$0xff]  ;;  %v7764_v12 = vld [vmem:[#allocation29_spill] sm:$0xff] }
 0x103   : > { %2766 = vmatpush.msrb.mxu1 %v2629_v50  ;;  %v7763_v42 = vld [vmem:[#allocation23_spill] sm:$0xff]  ;;  %v4415_v10 = vld [vmem:[#allocation2 + $0x28] sm:$0xff] }
 0x104   : > { %v1356_v37 = vsel %vm546_vm0, %v752_v2, %v1092_v35  ;;  %v4372_v35 = vunpack.i.h.bf16 %v5237_v49  ;;  %v2628_v50 = vld [vmem:[%s7558_s4 + $0x60] sm:$0xff] }
 0x105   : > { %2767 = vmatpush.msrb.mxu1 %v2628_v50 }
 0x107   : > { %1764 = vmatmul.f32.gmra.mxu1 %v1355_v21  ;;  %v4366_v21 = vunpack.i.l.bf16 %v5203_v34 }
 0x109   : > { %1672 = vmatmul.f32.gmra.mxu0 %v5387_v6  ;;  %1723 = vmatmul.f32.gmra.mxu2 %v1347_v3  ;;  %v5420_v3 = vsel %vm546_vm0, %v4409_v15, %v4366_v21  ;;  %v4371_v21 = vunpack.i.l.bf16 %v5237_v49  ;;  %v7765_v49 = vld [vmem:[#allocation25_spill] sm:$0xff] }
 0x10a   : > { %1836 = vmatmul.f32.gmra.mxu3 %v1379_v5  ;;  %7762 = vst [vmem:[#allocation62_spill] sm:$0xff] %v5420_v3  ;;  %v1380_v5 = vsel %vm546_vm0, %v776_v26, %v5210_v25  ;;  %v1094_v2 = vpop.permute.xlu2 %1093  ;;  %v5436_v25 = vsel %vm546_vm0, %v5080_v32, %v4372_v35  ;;  %v4410_v26 = vld [vmem:[#allocation2 + $0x18] sm:$0xff]  ;;  %v5450_v32 = vld [vmem:[%s7557_s3] ss:$0 sm:$0xff] }
 0x10b   : > { %v1381_v15 = vsel %vm546_vm0, %v4410_v26, %v4371_v21 }
 0x10f   : > { %1767 = vmatmul.f32.gmra.mxu1 %v1356_v37  ;;  %v1357_v37 = vsel %vm546_vm0, %v7763_v42, %v1094_v2  ;;  %v1096_v2 = vpop.permute.xlu1 %1095 }
 0x111   : > { %1675 = vmatmul.f32.gmra.mxu0 %v1331_v59  ;;  %1726 = vmatmul.f32.gmra.mxu2 %v5420_v3  ;;  %v5439_v59 = vpop.permute.xlu0 %1223  ;;  %v7770_v3 = vld [vmem:[#allocation20_spill] sm:$0xff] }
 0x112   : > { %1839 = vmatmul.f32.gmra.mxu3 %v1380_v5  ;;  %v754_v5 = vmul.f32 %v7765_v49, %v7764_v12 }
 0x114   : > { %v1358_v42 = vsel %vm546_vm0, %v754_v5, %v1096_v2  ;;  %v2627_v5 = vld [vmem:[%s7558_s4 + $0x58] sm:$0xff] }
 0x115   : > { %2768 = vmatpush.msrb.mxu1 %v2627_v5  ;;  %v851_v5 = vmul.f32 %v4413_v0, %v7770_v3  ;;  %v2626_v0 = vld [vmem:[%s7558_s4 + $0x50] sm:$0xff] }
 0x117   : > { %1770 = vmatmul.f32.gmra.mxu1 %v1357_v37  ;;  %v834_v37 = vmul.f32 %v5069_v41, %v5131_v36  ;;  %v4412_v36 = vld [vmem:[#allocation2 + $0x29] sm:$0xff] }
 0x118   : > { %2769 = vmatpush.msrb.mxu1 %v2626_v0 }
 0x119   : > { %1678 = vmatmul.f32.gmra.mxu0 %v5436_v25  ;;  %1859 = vmatmul.f32.vlgmr.msrb.gmra.mxu2 %v1381_v15  ;;  %v4411_v15 = vld [vmem:[#allocation2 + $0x20] sm:$0xff]  ;;  %v1098_v2 = vpop.permute.xlu0 %1097 }
 0x11a   : > { %1972 = vmatmul.f32.vlgmr.msrb.gmra.mxu3 %v5063_v20  ;;  %v1382_v50 = vsel %vm546_vm0, %v4411_v15, %v5245_v55  ;;  %1243 = vrot.lane.b32.xlu1 %v834_v37, %s4617_s10  ;;  %v5464_v20 = vpop.permute.xlu2 %1225  ;;  %v7768_v37 = vld [vmem:[#allocation43_spill] sm:$0xff] }
 0x11c   : > { %v1682_v35 = vpop.f32.mrf.mxu2  ;;  %v1795_v21 = vpop.f32.mrf.mxu3 }
 0x11d   : > { %v1683_v12 = vadd.f32 %v5450_v32, %v1682_v35  ;;  %v7767_v35 = vld [vmem:[#allocation24_spill] sm:$0xff] }
 0x11e   : > { %v5457_v26 = vpop.f32.mrf.mxu0 }
 0x11f   : > { %v5462_v60 = vadd.f32 %v1795_v21, %v1683_v12  ;;  %1773 = vmatmul.f32.gmra.mxu1 %v1358_v42  ;;  %v1359_v21 = vsel %vm546_vm0, %v7767_v35, %v1098_v2  ;;  %v7769_v42 = vld [vmem:[#allocation33_spill] sm:$0xff]  ;;  %v7772_v35 = vld [vmem:[#allocation26_spill] sm:$0xff] }
 0x120   : > { %v832_v12 = vmul.f32 %v7769_v42, %v7768_v37  ;;  %v7773_v37 = vld [vmem:[#allocation35_spill] sm:$0xff] }
 0x121   : > { %7766 = vst [vmem:[#allocation23_spill] sm:$0xff] %v5462_v60  ;;  %1862 = vmatmul.f32.gmra.mxu2 %v1382_v50  ;;  %4161 = vmatmul.msk.f32.vlgmr.msrb.gmra.mxu0 %vm546_vm0, %v4412_v36  ;;  %v4414_v50 = vld [vmem:[#allocation2 + $0x31] sm:$0xff]  ;;  %v5511_v0 = vpop.permute.xlu0 %1229 }
 0x122   : > { %1975 = vmatmul.f32.gmra.mxu3 %v5180_v44  ;;  %v886_v38 = vmul.f32 %v4414_v50, %v4862_v16  ;;  %v1383_v44 = vsel %vm546_vm0, %v4415_v10, %v5273_v62  ;;  %1239 = vrot.lane.b32.xlu2 %v832_v12, %s4617_s10  ;;  %v756_v50 = vmul.f32 %v7773_v37, %v7772_v35  ;;  %v7774_v62 = vunpack.i.h.bf16 %v5076_v61  ;;  %v7775_v12 = vld [vmem:[#allocation46_spill] sm:$0xff] }
 0x123   : > { %1249 = vrot.lane.b32.xlu1 %v5235_v56, %s4617_s10  ;;  %v1100_v56 = vpop.permute.xlu2 %1099 }
 0x124   : > { %v1685_v55 = vpop.f32.mrf.mxu2  ;;  %v1415_v10 = vsel %vm546_vm0, %v851_v5, %v7774_v62 }
 0x125   : > { %v1686_v15 = vadd.f32 %v5450_v32, %v1685_v55  ;;  %v1798_v60 = vpop.f32.mrf.mxu3  ;;  %v5487_v55 = vpop.permute.xlu1 %1227 }
 0x126   : > { %v5478_v36 = vpop.f32.mrf.mxu0 }
 0x127   : > { %v5485_v2 = vadd.f32 %v1798_v60, %v1686_v15  ;;  %1776 = vmatmul.f32.gmra.mxu1 %v1359_v21  ;;  %v1360_v21 = vsel %vm546_vm0, %v756_v50, %v1100_v56  ;;  %v836_v15 = vmul.f32 %v7775_v12, %v5190_v9  ;;  %v2625_v9 = vld [vmem:[%s7558_s4 + $0x48] sm:$0xff]  ;;  %v4417_v50 = vld [vmem:[#allocation2 + $0x39] sm:$0xff] }
 0x128   : > { %2770 = vmatpush.msrb.mxu1 %v2625_v9  ;;  %v4420_v9 = vld [vmem:[#allocation2 + $0x38] sm:$0xff] }
 0x129   : > { %7771 = vst [vmem:[#allocation29_spill] sm:$0xff] %v5485_v2  ;;  %1865 = vmatmul.f32.gmra.mxu2 %v1383_v44  ;;  %4162 = vmatmul.msk.f32.gmra.mxu0 %vm546_vm0, %v886_v38  ;;  %v4416_v44 = vld [vmem:[#allocation2 + $0x30] sm:$0xff]  ;;  %v7776_v38 = vld [vmem:[#allocation52_spill] sm:$0xff] }
 0x12a   : > { %1978 = vmatmul.f32.gmra.mxu3 %v1415_v10  ;;  %v1384_v61 = vsel %vm546_vm0, %v4416_v44, %v5290_v24  ;;  %1247 = vrot.lane.b32.xlu0 %v836_v15, %s4617_s10  ;;  %v7778_v10 = vld [vmem:[#allocation44_spill] sm:$0xff] }
 0x12b   : > { %1245 = vrot.lane.b32.xlu2 %v7776_v38, %s4617_s10  ;;  %v4419_v44 = vld [vmem:[#allocation2 + $0x41] sm:$0xff] }
 0x12c   : > { %v1688_v60 = vpop.f32.mrf.mxu2  ;;  %v888_v38 = vmul.f32 %v4419_v44, %v4867_v19  ;;  %v7782_v44 = vld [vmem:[#allocation49_spill] sm:$0xff] }
 0x12d   : > { %v1689_v2 = vadd.f32 %v5450_v32, %v1688_v60  ;;  %v1801_v16 = vpop.f32.mrf.mxu3  ;;  %v1102_v24 = vpop.permute.xlu1 %1101  ;;  %v4418_v60 = vld [vmem:[#allocation2 + $0x47] sm:$0xff] }
 0x12e   : > { %v5502_v35 = vpop.f32.mrf.mxu0 }
 0x12f   : > { %v5509_v5 = vadd.f32 %v1801_v16, %v1689_v2  ;;  %1779 = vmatmul.f32.gmra.mxu1 %v1360_v21  ;;  %v1361_v16 = vsel %vm546_vm0, %v7778_v10, %v1102_v24  ;;  %v7779_v21 = vld [vmem:[#allocation21_spill] sm:$0xff]  ;;  %v5531_v24 = vpop.permute.xlu2 %1231 }
 0x130   : > { %v853_v15 = vmul.f32 %v4418_v60, %v7779_v21  ;;  %v7781_v60 = vld [vmem:[#allocation36_spill] sm:$0xff] }
 0x131   : > { %7777 = vst [vmem:[#allocation24_spill] sm:$0xff] %v5509_v5  ;;  %1868 = vmatmul.f32.gmra.mxu2 %v1384_v61  ;;  %4163 = vmatmul.msk.f32.gmra.mxu0 %vm546_vm0, %v4417_v50  ;;  %v1385_v50 = vsel %vm546_vm0, %v4420_v9, %v5318_v39  ;;  %v758_v19 = vmul.f32 %v7782_v44, %v7781_v60  ;;  %v7783_v5 = vunpack.i.h.bf16 %v5106_v54  ;;  %v7784_v60 = vld [vmem:[#allocation40_spill] sm:$0xff] }
 0x132   : > { %1981 = vmatmul.f32.gmra.mxu3 %v5241_v11  ;;  %1253 = vrot.lane.b32.xlu0 %v5282_v22, %s4617_s10  ;;  %v1104_v22 = vpop.permute.xlu0 %1103 }
 0x133   : > { %v1417_v39 = vsel %vm546_vm0, %v853_v15, %v7783_v5  ;;  %v2623_v5 = vld [vmem:[%s7558_s4 + $0x38] sm:$0xff]  ;;  %v4422_v15 = vld [vmem:[#allocation2 + $0x49] sm:$0xff] }
 0x134   : > { %v1691_v62 = vpop.f32.mrf.mxu2 }
 0x135   : > { %v1692_v2 = vadd.f32 %v5450_v32, %v1691_v62  ;;  %v1804_v56 = vpop.f32.mrf.mxu3  ;;  %v2624_v62 = vld [vmem:[%s7558_s4 + $0x40] sm:$0xff] }
 0x136   : > { %v5523_v61 = vpop.f32.mrf.mxu0  ;;  %2771 = vmatpush.msrb.mxu1 %v2624_v62  ;;  %v4421_v62 = vld [vmem:[#allocation2 + $0x40] sm:$0xff] }
 0x137   : > { %v5529_v11 = vadd.f32 %v1804_v56, %v1692_v2  ;;  %1782 = vmatmul.f32.gmra.mxu1 %v1361_v16  ;;  %v5542_v16 = vpop.permute.xlu1 %1233  ;;  %v1362_v56 = vsel %vm546_vm0, %v758_v19, %v1104_v22  ;;  %v1386_v54 = vsel %vm546_vm0, %v4421_v62, %v5336_v45  ;;  %v1106_v19 = vpop.permute.xlu2 %1105  ;;  %v4423_v22 = vld [vmem:[#allocation2 + $0x51] sm:$0xff]  ;;  %v4424_v62 = vld [vmem:[#allocation2 + $0x48] sm:$0xff] }
 0x138   : > { %2772 = vmatpush.msrb.mxu1 %v2623_v5 }
 0x139   : > { %7780 = vst [vmem:[#allocation43_spill] sm:$0xff] %v5529_v11  ;;  %1871 = vmatmul.f32.gmra.mxu2 %v1385_v50  ;;  %4164 = vmatmul.msk.f32.gmra.mxu0 %vm546_vm0, %v888_v38 }
 0x13a   : > { %1984 = vmatmul.f32.gmra.mxu3 %v1417_v39  ;;  %v1363_v39 = vsel %vm546_vm0, %v7784_v60, %v1106_v19  ;;  %v7785_v19 = vld [vmem:[#allocation50_spill] sm:$0xff] }
 0x13c   : > { %v1694_v2 = vpop.f32.mrf.mxu2 }
 0x13d   : > { %v1695_v9 = vadd.f32 %v5450_v32, %v1694_v2  ;;  %v1807_v11 = vpop.f32.mrf.mxu3  ;;  %v890_v2 = vmul.f32 %v4423_v22, %v4882_v30 }
 0x13e   : > { %v5546_v7 = vpop.f32.mrf.mxu0 }
 0x13f   : > { %v5550_v50 = vadd.f32 %v1807_v11, %v1695_v9  ;;  %1785 = vmatmul.f32.gmra.mxu1 %v1362_v56  ;;  %v5561_v56 = vpop.permute.xlu1 %4374 }
 0x141   : > { %1874 = vmatmul.f32.gmra.mxu2 %v1386_v54  ;;  %4165 = vmatmul.msk.f32.gmra.mxu0 %vm546_vm0, %v4422_v15  ;;  %v1387_v54 = vsel %vm546_vm0, %v4424_v62, %v5371_v53  ;;  %v4376_v15 = vunpack.i.l.bf16 %v5561_v56  ;;  %v4425_v62 = vld [vmem:[#allocation2 + $0x50] sm:$0xff] }
 0x142   : > { %1987 = vmatmul.f32.gmra.mxu3 %v5286_v51  ;;  %v2622_v51 = vld [vmem:[%s7558_s4 + $0x30] sm:$0xff] }
 0x143   : > { %2773 = vmatpush.msrb.mxu1 %v2622_v51  ;;  %v1388_v51 = vsel %vm546_vm0, %v4425_v62, %v5393_v40  ;;  %v4428_v62 = vld [vmem:[#allocation2 + $0x61] sm:$0xff] }
 0x144   : > { %v1697_v38 = vpop.f32.mrf.mxu2 }
 0x145   : > { %v1698_v45 = vadd.f32 %v5450_v32, %v1697_v38  ;;  %v1810_v11 = vpop.f32.mrf.mxu3  ;;  %v760_v38 = vmul.f32 %v5357_v17, %v7785_v19 }
 0x146   : > { %v5563_v9 = vpop.f32.mrf.mxu0 }
 0x147   : > { %v5567_v5 = vadd.f32 %v1810_v11, %v1698_v45  ;;  %1788 = vmatmul.f32.gmra.mxu1 %v1363_v39  ;;  %v1364_v53 = vsel %vm546_vm0, %v760_v38, %v4376_v15  ;;  %v840_v39 = vmul.f32 %v5251_v58, %v5300_v63  ;;  %v4426_v63 = vld [vmem:[#allocation2 + $0x59] sm:$0xff]  ;;  %v7787_v15 = vld [vmem:[#allocation57_spill] sm:$0xff] }
 0x148   : > { %v7788_v38 = vld [vmem:[#allocation53_spill] sm:$0xff] }
 0x149   : > { %1877 = vmatmul.f32.gmra.mxu2 %v1387_v54  ;;  %4166 = vmatmul.msk.f32.gmra.mxu0 %vm546_vm0, %v890_v2  ;;  %v838_v40 = vmul.f32 %v7788_v38, %v7787_v15  ;;  %v7791_v15 = vunpack.i.h.bf16 %v5167_v14 }
 0x14a   : > { %1990 = vmatmul.f32.gmra.mxu3 %v5229_v31  ;;  %1255 = vrot.lane.b32.xlu1 %v840_v39, %s4617_s10  ;;  %v2621_v31 = vld [vmem:[%s7558_s4 + $0x28] sm:$0xff] }
 0x14b   : > { %2774 = vmatpush.msrb.mxu1 %v2621_v31  ;;  %1251 = vrot.lane.b32.xlu2 %v838_v40, %s4617_s10 }
 0x14c   : > { %v1700_v60 = vpop.f32.mrf.mxu2 }
 0x14d   : > { %v1701_v45 = vadd.f32 %v5450_v32, %v1700_v60  ;;  %v1813_v11 = vpop.f32.mrf.mxu3 }
 0x14e   : > { %v5581_v22 = vpop.f32.mrf.mxu0 }
 0x14f   : > { %v5586_v2 = vadd.f32 %v1813_v11, %v1701_v45  ;;  %1791 = vmatmul.f32.gmra.mxu1 %v1364_v53  ;;  %v4427_v45 = vld [vmem:[#allocation2 + $0x67] sm:$0xff]  ;;  %v7789_v53 = vld [vmem:[#allocation34_spill] sm:$0xff] }
 0x150   : > { %v857_v11 = vmul.f32 %v4427_v45, %v7789_v53 }
 0x151   : > { %7786 = vst [vmem:[#allocation26_spill] sm:$0xff] %v5586_v2  ;;  %1880 = vmatmul.f32.gmra.mxu2 %v1388_v51  ;;  %4167 = vmatmul.msk.f32.gmra.mxu0 %vm546_vm0, %v4426_v63  ;;  %v892_v2 = vmul.f32 %v4428_v62, %v7760_v29  ;;  %v4429_v51 = vld [vmem:[#allocation2 + $0x58] sm:$0xff] }
 0x152   : > { %1993 = vmatmul.f32.gmra.mxu3 %v5331_v23  ;;  %v1389_v63 = vsel %vm546_vm0, %v4429_v51, %v5424_v43  ;;  %v1421_v45 = vsel %vm546_vm0, %v857_v11, %v7791_v15  ;;  %v842_v43 = vmul.f32 %v5298_v27, %v5346_v33  ;;  %v4430_v51 = vld [vmem:[#allocation2 + $0x60] sm:$0xff]  ;;  %v2619_v33 = vld [vmem:[%s7558_s4 + $0x18] sm:$0xff] }
 0x153   : > { %1257 = vrot.lane.b32.xlu2 %v5327_v1, %s4617_s10  ;;  %v4431_v15 = vld [vmem:[#allocation2 + $0x77] sm:$0xff] }
 0x154   : > { %v1703_v54 = vpop.f32.mrf.mxu2  ;;  %1259 = vrot.lane.b32.xlu0 %v842_v43, %s4617_s10 }
 0x155   : > { %v1704_v60 = vadd.f32 %v5450_v32, %v1703_v54  ;;  %v1816_v39 = vpop.f32.mrf.mxu3  ;;  %v2620_v54 = vld [vmem:[%s7558_s4 + $0x20] sm:$0xff] }
 0x156   : > { %v5598_v31 = vpop.f32.mrf.mxu0  ;;  %2775 = vmatpush.msrb.mxu1 %v2620_v54 }
 0x157   : > { %v5603_v23 = vadd.f32 %v1816_v39, %v1704_v60 }
 0x158   : > { %2776 = vmatpush.msrb.mxu1 %v2619_v33 }
 0x159   : > { %7790 = vst [vmem:[#allocation52_spill] sm:$0xff] %v5603_v23  ;;  %1883 = vmatmul.f32.gmra.mxu2 %v1389_v63  ;;  %4168 = vmatmul.msk.f32.gmra.mxu0 %vm546_vm0, %v892_v2  ;;  %v1390_v63 = vsel %vm546_vm0, %v4430_v51, %v5439_v59  ;;  %v811_v2 = vld [vmem:[#allocation2 + $0x108] sm:$0xff]  ;;  %v7794_v51 = vunpack.i.h.bf16 %v5203_v34 }
 0x15a   : > { %1996 = vmatmul.f32.gmra.mxu3 %v1421_v45  ;;  %v4378_v59 = vpack.i.bf16 %v811_v2, %v5383_v8  ;;  %v859_v45 = vmul.f32 %v4431_v15, %v4972_v4  ;;  %v2618_v8 = vld [vmem:[%s7558_s4 + $0x10] sm:$0xff]  ;;  %v2617_v34 = vld [vmem:[%s7558_s4 + $0x8] sm:$0xff]  ;;  %v4435_v15 = vld [vmem:[#allocation2 + $0x79] sm:$0xff] }
 0x15b   : > { %2777 = vmatpush.msrb.mxu1 %v2618_v8  ;;  %v4436_v8 = vld [vmem:[#allocation2 + $0x87] sm:$0xff] }
 0x15c   : > { %v1706_v62 = vpop.f32.mrf.mxu2  ;;  %4379 = vrot.lane.b32.xlu1 %v4378_v59, %s4617_s10 }
 0x15d   : > { %v1707_v40 = vadd.f32 %v5450_v32, %v1706_v62  ;;  %v1819_v60 = vpop.f32.mrf.mxu3  ;;  %v4432_v62 = vld [vmem:[#allocation2 + $0x71] sm:$0xff]  ;;  %2778 = vmatpush.msrb.mxu1 %v2617_v34 }
 0x15e   : > { %v5615_v39 = vpop.f32.mrf.mxu0  ;;  %v894_v43 = vmul.f32 %v4432_v62, %v7765_v49  ;;  %v881_v62 = vld [vmem:[#allocation2 + $0x118] sm:$0xff] }
 0x15f   : > { %v5622_v14 = vadd.f32 %v1819_v60, %v1707_v40  ;;  %v5683_v34 = vld [vmem:[#allocation2 + $0x111] sm:$0xff] }
 0x161   : > { %7792 = vst [vmem:[#allocation44_spill] sm:$0xff] %v5622_v14  ;;  %1886 = vmatmul.f32.gmra.mxu2 %v1390_v63  ;;  %4169 = vmatmul.msk.f32.gmra.mxu0 %vm546_vm0, %v7778_v10  ;;  %v4433_v10 = vld [vmem:[#allocation2 + $0x68] sm:$0xff]  ;;  %v1423_v63 = vsel %vm546_vm0, %v859_v45, %v7794_v51  ;;  %v861_v51 = vmul.f32 %v4436_v8, %v5034_v52 }
 0x162   : > { %1999 = vmatmul.f32.gmra.mxu3 %v5387_v6  ;;  %v1391_v6 = vsel %vm546_vm0, %v4433_v10, %v5464_v20  ;;  %v5659_v45 = vld [vmem:[#allocation2 + $0x109] sm:$0xff] }
 0x164   : > { %v1709_v11 = vpop.f32.mrf.mxu2 }
 0x165   : > { %v1710_v1 = vadd.f32 %v5450_v32, %v1709_v11  ;;  %v1822_v54 = vpop.f32.mrf.mxu3  ;;  %v4434_v11 = vld [vmem:[#allocation2 + $0x70] sm:$0xff] }
 0x166   : > { %v5635_v40 = vpop.f32.mrf.mxu0 }
 0x167   : > { %v5639_v60 = vadd.f32 %v1822_v54, %v1710_v1  ;;  %v1392_v1 = vsel %vm546_vm0, %v4434_v11, %v5487_v55  ;;  %v2647_v11 = vld [vmem:[%s7558_s4 + $0xf8] sm:$0xff] }
 0x168   : > { %2877 = vmatpush.msra.mxu2 %v2647_v11 }
 0x169   : > { %7793 = vst [vmem:[#allocation36_spill] sm:$0xff] %v5639_v60  ;;  %1889 = vmatmul.f32.gmra.mxu2 %v1391_v6  ;;  %4170 = vmatmul.msk.f32.gmra.mxu0 %vm546_vm0, %v894_v43  ;;  %v4388_v43 = vpack.i.bf16 %v881_v62, %v5659_v45  ;;  %v4446_v60 = vld [vmem:[#allocation2 + $0xa1] sm:$0xff] }
 0x16a   : > { %2002 = vmatmul.f32.gmra.mxu3 %v1423_v63  ;;  %v896_v63 = vmul.f32 %v7773_v37, %v7785_v19  ;;  %v2616_v19 = vld [vmem:[%s7558_s4] sm:$0xff] }
 0x16b   : > { %4389 = vrot.lane.b32.xlu0 %v4388_v43, %s4617_s10  ;;  %v846_v43 = vmul.f32 %v5404_v46, %v5683_v34  ;;  %2779 = vmatpush.msrb.mxu1 %v2616_v19 }
 0x16c   : > { %v1712_v33 = vpop.f32.mrf.mxu2 }
 0x16d   : > { %v1713_v2 = vadd.f32 %v5450_v32, %v1712_v33  ;;  %v1825_v59 = vpop.f32.mrf.mxu3 }
 0x16e   : > { %v5649_v20 = vpop.f32.mrf.mxu0 }
 0x16f   : > { %v5653_v54 = vadd.f32 %v1825_v59, %v1713_v2  ;;  %v4437_v2 = vld [vmem:[#allocation2 + $0x78] sm:$0xff] }
 0x171   : > { %7795 = vst [vmem:[#allocation40_spill] sm:$0xff] %v5653_v54  ;;  %1892 = vmatmul.f32.gmra.mxu2 %v1392_v1  ;;  %4171 = vmatmul.msk.f32.gmra.mxu0 %vm546_vm0, %v4435_v15  ;;  %v2663_v1 = vld [vmem:[%s7558_s4 + $0x178] sm:$0xff] }
 0x172   : > { %2005 = vmatmul.f32.gmra.mxu3 %v5436_v25  ;;  %v1393_v25 = vsel %vm546_vm0, %v4437_v2, %v5511_v0  ;;  %v7797_v0 = vld [vmem:[#allocation32_spill] sm:$0xff] }
 0x173   : > { %2990 = vmatpush.msra.mxu3 %v2663_v1  ;;  %v7798_v15 = vunpack.i.l.bf16 %v7797_v0  ;;  %v2316_v1 = vld [vmem:[#allocation3 + $0x7] sm:$0xff] }
 0x174   : > { %v1715_v10 = vpop.f32.mrf.mxu2 }
 0x175   : > { %v1716_v55 = vadd.f32 %v5450_v32, %v1715_v10  ;;  %v1828_v6 = vpop.f32.mrf.mxu3  ;;  %v1425_v62 = vsel %vm546_vm0, %v861_v51, %v7798_v15  ;;  %v882_v10 = vld [vmem:[#allocation2 + $0x120] sm:$0xff] }
 0x176   : > { %v5668_v33 = vpop.f32.mrf.mxu0  ;;  %v4438_v51 = vld [vmem:[#allocation2 + $0x80] sm:$0xff] }
 0x177   : > { %v5672_v59 = vadd.f32 %v1828_v6, %v1716_v55  ;;  %v4393_v55 = vpack.i.bf16 %v882_v10, %v846_v43  ;;  %v5691_v6 = vpop.f32.mrf.mxu1  ;;  %v7800_v15 = vld [vmem:[#allocation15_spill] sm:$0xff]  ;;  %v4439_v43 = vld [vmem:[#allocation2 + $0x89] sm:$0xff] }
 0x178   : > { %v2348_v19 = vmul.f32 %v7800_v15, %v2316_v1  ;;  %v5705_v10 = vld [vmem:[#allocation2 + $0x110] sm:$0xff] }
 0x179   : > { %7796 = vst [vmem:[#allocation50_spill] sm:$0xff] %v5672_v59  ;;  %1895 = vmatmul.f32.gmra.mxu2 %v1393_v25  ;;  %4172 = vmatmul.msk.f32.gmra.mxu0 %vm546_vm0, %v896_v63  ;;  %v1394_v63 = vsel %vm546_vm0, %v4438_v51, %v5531_v24  ;;  %v4441_v1 = vld [vmem:[#allocation2 + $0x91] sm:$0xff]  ;;  %v1236_v59 = vpop.permute.xlu0 %1235 }
 0x17a   : > { %2008 = vmatmul.f32.gmra.mxu3 %v1425_v62  ;;  %4394 = vrot.lane.b32.xlu1 %v4393_v55, %s4617_s10  ;;  %v844_v62 = vmul.f32 %v5344_v47, %v5406_v48  ;;  %v7801_v55 = vld [vmem:[#allocation38_spill] sm:$0xff] }
 0x17b   : > { %2780 = vmatmul.f32.vlgmr.msrb.gmra.mxu1 %v2348_v19  ;;  %v4440_v48 = vld [vmem:[#allocation2 + $0x97] sm:$0xff] }
 0x17c   : > { %v1718_v8 = vpop.f32.mrf.mxu2 }
 0x17d   : > { %v1719_v2 = vadd.f32 %v5450_v32, %v1718_v8  ;;  %v1831_v11 = vpop.f32.mrf.mxu3  ;;  %v4383_v8 = vpack.i.bf16 %v5705_v10, %v844_v62  ;;  %v2679_v62 = vld [vmem:[%s7558_s4 + $0x1f8] sm:$0xff] }
 0x17e   : > { %v5695_v25 = vpop.f32.mrf.mxu0  ;;  %3103 = vmatpush.msra.mxu0 %v2679_v62 }
 0x17f   : > { %v5699_v0 = vadd.f32 %v1831_v11, %v1719_v2  ;;  %v5709_v24 = vpop.f32.mrf.mxu1  ;;  %4384 = vrot.lane.b32.xlu2 %v4383_v8, %s4617_s10  ;;  %v2695_v8 = vld [vmem:[%s7558_s4 + $0x278] sm:$0xff] }
 0x180   : > { %3216 = vmatpush.msra.mxu1 %v2695_v8 }
 0x181   : > { %7799 = vst [vmem:[#allocation57_spill] sm:$0xff] %v5699_v0  ;;  %1898 = vmatmul.f32.gmra.mxu2 %v1394_v63  ;;  %4173 = vmatmul.msk.f32.gmra.mxu0 %vm546_vm0, %v4439_v43  ;;  %v863_v63 = vmul.f32 %v4440_v48, %v5194_v28  ;;  %v898_v43 = vmul.f32 %v4441_v1, %v7782_v44  ;;  %v2646_v48 = vld [vmem:[%s7558_s4 + $0xf0] sm:$0xff]  ;;  %v2317_v1 = vld [vmem:[#allocation3 + $0xf] sm:$0xff] }
 0x182   : > { %2011 = vmatmul.f32.gmra.mxu3 %v7801_v55  ;;  %v4442_v55 = vld [vmem:[#allocation2 + $0x88] sm:$0xff]  ;;  %2878 = vmatpush.msra.mxu2 %v2646_v48  ;;  %v4443_v48 = vld [vmem:[#allocation2 + $0x90] sm:$0xff] }
 0x183   : > { %v1395_v19 = vsel %vm546_vm0, %v4442_v55, %v5542_v16  ;;  %v7803_v16 = vld [vmem:[#allocation27_spill] sm:$0xff]  ;;  %2783 = vmatmul.f32.gmra.mxu1 %v2317_v1  ;;  %v4377_v1 = vunpack.i.h.bf16 %v5561_v56  ;;  %v2694_v56 = vld [vmem:[%s7558_s4 + $0x270] sm:$0xff] }
 0x184   : > { %v1721_v2 = vpop.f32.mrf.mxu2  ;;  %v7804_v55 = vunpack.i.h.bf16 %v7803_v16  ;;  %3217 = vmatpush.msra.mxu1 %v2694_v56 }
 0x185   : > { %v1722_v11 = vadd.f32 %v5450_v32, %v1721_v2  ;;  %v1834_v51 = vpop.f32.mrf.mxu3 }
 0x186   : > { %v5715_v0 = vpop.f32.mrf.mxu0  ;;  %v1427_v44 = vsel %vm546_vm0, %v863_v63, %v7804_v55  ;;  %v2662_v63 = vld [vmem:[%s7558_s4 + $0x170] sm:$0xff] }
 0x187   : > { %v5725_v2 = vadd.f32 %v1834_v51, %v1722_v11  ;;  %v5735_v8 = vpop.f32.mrf.mxu1  ;;  %2991 = vmatpush.msra.mxu3 %v2662_v63 }
 0x189   : > { %7802 = vst [vmem:[#allocation32_spill] sm:$0xff] %v5725_v2  ;;  %1901 = vmatmul.f32.gmra.mxu2 %v1395_v19  ;;  %4174 = vmatmul.msk.f32.gmra.mxu0 %vm546_vm0, %v898_v43  ;;  %v1396_v19 = vsel %vm546_vm0, %v4443_v48, %v1236_v59  ;;  %v7806_v43 = vld [vmem:[#allocation45_spill] sm:$0xff]  ;;  %v4445_v59 = vld [vmem:[#allocation2 + $0xa7] sm:$0xff] }
 0x18a   : > { %2014 = vmatmul.f32.gmra.mxu3 %v1427_v44  ;;  %v4444_v44 = vld [vmem:[#allocation2 + $0x99] sm:$0xff] }
 0x18b   : > { %v7807_v48 = vld [vmem:[#allocation7_spill] sm:$0xff] }
 0x18c   : > { %v1724_v11 = vpop.f32.mrf.mxu2  ;;  %v865_v54 = vmul.f32 %v4445_v59, %v7807_v48  ;;  %v1635_v59 = vadd.f32 %v5450_v32, %v5457_v26  ;;  %v2661_v26 = vld [vmem:[%s7558_s4 + $0x168] sm:$0xff] }
 0x18d   : > { %v1725_v51 = vadd.f32 %v5450_v32, %v1724_v11  ;;  %v1837_v62 = vpop.f32.mrf.mxu3  ;;  %2992 = vmatpush.msra.mxu3 %v2661_v26 }
 0x18e   : > { %v5737_v2 = vpop.f32.mrf.mxu0 }
 0x18f   : > { %v5743_v16 = vadd.f32 %v1837_v62, %v1725_v51  ;;  %v900_v51 = vmul.f32 %v4446_v60, %v5357_v17  ;;  %v4447_v60 = vld [vmem:[#allocation2 + $0x98] sm:$0xff] }
 0x190   : > { %v7809_v17 = vld [vmem:[#allocation30_spill] sm:$0xff] }
 0x191   : > { %7805 = vst [vmem:[#allocation38_spill] sm:$0xff] %v5743_v16  ;;  %1904 = vmatmul.f32.gmra.mxu2 %v1396_v19  ;;  %4175 = vmatmul.msk.f32.gmra.mxu0 %vm546_vm0, %v4444_v44  ;;  %v2678_v19 = vld [vmem:[%s7558_s4 + $0x1f0] sm:$0xff]  ;;  %v2645_v44 = vld [vmem:[%s7558_s4 + $0xe8] sm:$0xff]  ;;  %v7810_v16 = vunpack.i.h.bf16 %v7809_v17 }
 0x192   : > { %2017 = vmatmul.f32.gmra.mxu3 %v7806_v43  ;;  %3104 = vmatpush.msra.mxu0 %v2678_v19  ;;  %v5764_v43 = vpop.f32.mrf.mxu1  ;;  %v1240_v19 = vpop.permute.xlu2 %1239 }
 0x193   : > { %2879 = vmatpush.msra.mxu2 %v2645_v44 }
 0x194   : > { %v1727_v55 = vpop.f32.mrf.mxu2 }
 0x195   : > { %v1728_v11 = vadd.f32 %v5450_v32, %v1727_v55  ;;  %v1840_v37 = vpop.f32.mrf.mxu3  ;;  %v1397_v55 = vsel %vm546_vm0, %v4447_v60, %v4377_v1  ;;  %v4448_v1 = vld [vmem:[#allocation2 + $0xa0] sm:$0xff]  ;;  %v7811_v60 = vld [vmem:[#allocation48_spill] sm:$0xff] }
 0x196   : > { %v5751_v62 = vpop.f32.mrf.mxu0  ;;  %v1398_v44 = vsel %vm546_vm0, %v4448_v1, %v1240_v19  ;;  %v4451_v1 = vld [vmem:[#allocation2 + $0xb1] sm:$0xff] }
 0x197   : > { %v5759_v63 = vadd.f32 %v1840_v37, %v1728_v11  ;;  %v1429_v37 = vsel %vm546_vm0, %v865_v54, %v7810_v16  ;;  %v1748_v11 = vadd.f32 %v5691_v6, %v1635_v59  ;;  %v1638_v54 = vadd.f32 %v5450_v32, %v5478_v36  ;;  %v4449_v6 = vld [vmem:[#allocation2 + $0xa9] sm:$0xff]  ;;  %v4450_v36 = vld [vmem:[#allocation2 + $0xb7] sm:$0xff] }
 0x199   : > { %7808 = vst [vmem:[#allocation27_spill] sm:$0xff] %v5759_v63  ;;  %1907 = vmatmul.f32.gmra.mxu2 %v1397_v55  ;;  %4176 = vmatmul.msk.f32.gmra.mxu0 %vm546_vm0, %v900_v51  ;;  %v1751_v55 = vadd.f32 %v5709_v24, %v1638_v54  ;;  %v2677_v54 = vld [vmem:[%s7558_s4 + $0x1e8] sm:$0xff] }
 0x19a   : > { %2020 = vmatmul.f32.gmra.mxu3 %v1429_v37  ;;  %v5781_v51 = vpop.f32.mrf.mxu1  ;;  %v1242_v37 = vpop.permute.xlu0 %1241  ;;  %3105 = vmatpush.msra.mxu0 %v2677_v54 }
 0x19c   : > { %v1860_v56 = vpop.f32.mrf.mxu2 }
 0x19d   : > { %v1861_v63 = vadd.f32 %v1860_v56, %v1748_v11  ;;  %v1973_v49 = vpop.f32.mrf.mxu3 }
 0x19e   : > { %v2086_v14 = vpop.f32.mrf.mxu0 }
 0x19f   : > { %v1974_v17 = vadd.f32 %v1973_v49, %v1861_v63 }
 0x1a1   : > { %v2087_v16 = vadd.f32 %v2086_v14, %v1974_v17  ;;  %1910 = vmatmul.f32.gmra.mxu2 %v1398_v44  ;;  %4177 = vmatmul.msk.f32.gmra.mxu0 %vm546_vm0, %v4449_v6  ;;  %v7812_v14 = vld [vmem:[#allocation8_spill] sm:$0xff]  ;;  %v902_v44 = vmul.f32 %v4451_v1, %v7769_v42  ;;  %v1244_v1 = vpop.permute.xlu1 %1243 }
 0x1a2   : > { %2023 = vmatmul.f32.gmra.mxu3 %v7811_v60  ;;  %v867_v56 = vmul.f32 %v4450_v36, %v7812_v14  ;;  %v4452_v17 = vld [vmem:[#allocation2 + $0xa8] sm:$0xff]  ;;  %v2644_v60 = vld [vmem:[%s7558_s4 + $0xe0] sm:$0xff] }
 0x1a3   : > { %vm2182_vm3 = vcmp.gt.f32.partialorder %v2087_v16, 0.0  ;;  %v2214_v59 = vmul.f32 0.01, %v2087_v16  ;;  %v1399_v24 = vsel %vm546_vm0, %v4452_v17, %v1242_v37  ;;  %2880 = vmatpush.msra.mxu2 %v2644_v60  ;;  %v7813_v37 = vld [vmem:[#allocation37_spill] sm:$0xff]  ;;  %v5807_v17 = vpop.f32.mrf.mxu1  ;;  %v2660_v60 = vld [vmem:[%s7558_s4 + $0x160] sm:$0xff] }
 0x1a4   : > { %v1863_v11 = vpop.f32.mrf.mxu2  ;;  %2993 = vmatpush.msra.mxu3 %v2660_v60  ;;  %v7816_v60 = vld [vmem:[#allocation9_spill] sm:$0xff] }
 0x1a5   : > { %v5785_v49 = vsel %vm2182_vm3, %v2087_v16, %v2214_v59  ;;  %v1864_v63 = vadd.f32 %v1863_v11, %v1751_v55  ;;  %v1976_v19 = vpop.f32.mrf.mxu3  ;;  %v2693_v16 = vld [vmem:[%s7558_s4 + $0x268] sm:$0xff]  ;;  %v1641_v55 = vadd.f32 %v5450_v32, %v5502_v35  ;;  %v7814_v11 = vunpack.i.h.bf16 %v7813_v37 }
 0x1a6   : > { %2284 = vst [vmem:[#allocation3 + $0x18] sm:$0xff] %v5785_v49  ;;  %v2089_v26 = vpop.f32.mrf.mxu0  ;;  %3218 = vmatpush.msra.mxu1 %v2693_v16 }
 0x1a7   : > { %v1977_v6 = vadd.f32 %v1976_v19, %v1864_v63  ;;  %v1431_v36 = vsel %vm546_vm0, %v867_v56, %v7814_v11  ;;  %v1754_v63 = vadd.f32 %v5735_v8, %v1641_v55  ;;  %v4454_v11 = vld [vmem:[#allocation2 + $0xb9] sm:$0xff] }
 0x1a9   : > { %v2090_v59 = vadd.f32 %v2089_v26, %v1977_v6  ;;  %1913 = vmatmul.f32.gmra.mxu2 %v1399_v24  ;;  %4178 = vmatmul.msk.f32.gmra.mxu0 %vm546_vm0, %v902_v44  ;;  %v4453_v6 = vld [vmem:[#allocation2 + $0xb0] sm:$0xff] }
 0x1aa   : > { %2026 = vmatmul.f32.gmra.mxu3 %v1431_v36  ;;  %v1400_v8 = vsel %vm546_vm0, %v4453_v6, %v1244_v1  ;;  %v7815_v36 = vld [vmem:[#allocation55_spill] sm:$0xff]  ;;  %v1246_v1 = vpop.permute.xlu2 %1245 }
 0x1ab   : > { %vm2183_vm4 = vcmp.gt.f32.partialorder %v2090_v59, 0.0  ;;  %v2215_v19 = vmul.f32 0.01, %v2090_v59 }
 0x1ac   : > { %v1866_v54 = vpop.f32.mrf.mxu2 }
 0x1ad   : > { %v5809_v16 = vsel %vm2183_vm4, %v2090_v59, %v2215_v19  ;;  %v1867_v35 = vadd.f32 %v1866_v54, %v1754_v63  ;;  %v1979_v26 = vpop.f32.mrf.mxu3  ;;  %v5811_v24 = vld [vmem:[#allocation3 + $0x17] sm:$0xff]  ;;  %v1644_v59 = vadd.f32 %v5450_v32, %v5523_v61 }
 0x1ae   : > { %2285 = vst [vmem:[#allocation3 + $0x20] sm:$0xff] %v5809_v16  ;;  %v2092_v56 = vpop.f32.mrf.mxu0  ;;  %v2350_v44 = vmul.f32 %v7770_v3, %v5811_v24 }
 0x1af   : > { %v1980_v55 = vadd.f32 %v1979_v26, %v1867_v35  ;;  %v1757_v63 = vadd.f32 %v5764_v43, %v1644_v59  ;;  %v4457_v43 = vld [vmem:[#allocation2 + $0xb8] sm:$0xff] }
 0x1b0   : > { %2786 = vmatmul.f32.gmra.mxu1 %v2350_v44  ;;  %v4455_v44 = vld [vmem:[#allocation2 + $0xc7] sm:$0xff]  ;;  %v1401_v59 = vsel %vm546_vm0, %v4457_v43, %v1246_v1  ;;  %v1647_v1 = vadd.f32 %v5450_v32, %v5546_v7 }
 0x1b1   : > { %v2093_v37 = vadd.f32 %v2092_v56, %v1980_v55  ;;  %1916 = vmatmul.f32.gmra.mxu2 %v1400_v8  ;;  %4179 = vmatmul.msk.f32.gmra.mxu0 %vm546_vm0, %v4454_v11  ;;  %v869_v61 = vmul.f32 %v4455_v44, %v7816_v60  ;;  %v4456_v56 = vld [vmem:[#allocation2 + $0xc1] sm:$0xff]  ;;  %v5829_v55 = vpop.f32.mrf.mxu1 }
 0x1b2   : > { %2029 = vmatmul.f32.gmra.mxu3 %v7815_v36  ;;  %v904_v8 = vmul.f32 %v4456_v56, %v5069_v41  ;;  %v2692_v36 = vld [vmem:[%s7558_s4 + $0x260] sm:$0xff]  ;;  %v7817_v56 = vld [vmem:[#allocation41_spill] sm:$0xff] }
 0x1b3   : > { %vm2184_vm5 = vcmp.gt.f32.partialorder %v2093_v37, 0.0  ;;  %v2216_v19 = vmul.f32 0.01, %v2093_v37  ;;  %3219 = vmatpush.msra.mxu1 %v2692_v36  ;;  %v7818_v43 = vunpack.i.h.bf16 %v7817_v56  ;;  %v1248_v36 = vpop.permute.xlu0 %1247  ;;  %v4459_v56 = vld [vmem:[#allocation2 + $0xc9] sm:$0xff] }
 0x1b4   : > { %v1869_v54 = vpop.f32.mrf.mxu2 }
 0x1b5   : > { %v5825_v6 = vsel %vm2184_vm5, %v2093_v37, %v2216_v19  ;;  %v1870_v35 = vadd.f32 %v1869_v54, %v1757_v63  ;;  %v1982_v26 = vpop.f32.mrf.mxu3  ;;  %v2676_v37 = vld [vmem:[%s7558_s4 + $0x1e0] sm:$0xff]  ;;  %v5839_v19 = vld [vmem:[#allocation3 + $0x1f] sm:$0xff]  ;;  %v2643_v54 = vld [vmem:[%s7558_s4 + $0xd8] sm:$0xff] }
 0x1b6   : > { %2286 = vst [vmem:[#allocation3 + $0x28] sm:$0xff] %v5825_v6  ;;  %v2095_v11 = vpop.f32.mrf.mxu0  ;;  %3106 = vmatpush.msra.mxu0 %v2676_v37  ;;  %2881 = vmatpush.msra.mxu2 %v2643_v54 }
 0x1b7   : > { %v1983_v63 = vadd.f32 %v1982_v26, %v1870_v35  ;;  %v1433_v35 = vsel %vm546_vm0, %v869_v61, %v7818_v43  ;;  %v1760_v26 = vadd.f32 %v5781_v51, %v1647_v1  ;;  %v2659_v51 = vld [vmem:[%s7558_s4 + $0x158] sm:$0xff] }
 0x1b8   : > { %2789 = vmatmul.f32.gmra.mxu1 %v5839_v19  ;;  %2994 = vmatpush.msra.mxu3 %v2659_v51 }
 0x1b9   : > { %v2096_v44 = vadd.f32 %v2095_v11, %v1983_v63  ;;  %1919 = vmatmul.f32.gmra.mxu2 %v1401_v59  ;;  %4180 = vmatmul.msk.f32.gmra.mxu0 %vm546_vm0, %v904_v8  ;;  %v4458_v8 = vld [vmem:[#allocation2 + $0xc0] sm:$0xff]  ;;  %v5863_v1 = vpop.f32.mrf.mxu1 }
 0x1ba   : > { %2032 = vmatmul.f32.gmra.mxu3 %v1433_v35  ;;  %v1402_v59 = vsel %vm546_vm0, %v4458_v8, %v1248_v36  ;;  %v7819_v8 = vld [vmem:[#allocation10_spill] sm:$0xff] }
 0x1bb   : > { %vm2185_vm6 = vcmp.gt.f32.partialorder %v2096_v44, 0.0  ;;  %v2217_v37 = vmul.f32 0.01, %v2096_v44 }
 0x1bc   : > { %v1872_v41 = vpop.f32.mrf.mxu2 }
 0x1bd   : > { %v5852_v42 = vsel %vm2185_vm6, %v2096_v44, %v2217_v37  ;;  %v1873_v54 = vadd.f32 %v1872_v41, %v1760_v26  ;;  %v1985_v23 = vpop.f32.mrf.mxu3  ;;  %v5854_v7 = vld [vmem:[#allocation3 + $0x27] sm:$0xff]  ;;  %v1650_v41 = vadd.f32 %v5450_v32, %v5563_v9  ;;  %v1250_v26 = vpop.permute.xlu1 %1249 }
 0x1be   : > { %2287 = vst [vmem:[#allocation3 + $0x30] sm:$0xff] %v5852_v42  ;;  %v2098_v11 = vpop.f32.mrf.mxu0  ;;  %v2352_v61 = vmul.f32 %v7779_v21, %v5854_v7 }
 0x1bf   : > { %v1986_v63 = vadd.f32 %v1985_v23, %v1873_v54  ;;  %v1763_v43 = vadd.f32 %v5807_v17, %v1650_v41  ;;  %v2691_v41 = vld [vmem:[%s7558_s4 + $0x258] sm:$0xff] }
 0x1c0   : > { %2792 = vmatmul.f32.gmra.mxu1 %v2352_v61  ;;  %v4460_v61 = vld [vmem:[#allocation2 + $0xd7] sm:$0xff] }
 0x1c1   : > { %v2099_v44 = vadd.f32 %v2098_v11, %v1986_v63  ;;  %1922 = vmatmul.f32.gmra.mxu2 %v1402_v59  ;;  %4181 = vmatmul.msk.f32.gmra.mxu0 %vm546_vm0, %v4459_v56  ;;  %v871_v9 = vmul.f32 %v4460_v61, %v7819_v8  ;;  %v4461_v11 = vld [vmem:[#allocation2 + $0xd1] sm:$0xff] }
 0x1c2   : > { %2035 = vmatmul.f32.gmra.mxu3 %v5270_v57  ;;  %v906_v59 = vmul.f32 %v4461_v11, %v7775_v12  ;;  %v4462_v57 = vld [vmem:[#allocation2 + $0xc8] sm:$0xff]  ;;  %v2675_v63 = vld [vmem:[%s7558_s4 + $0x1d8] sm:$0xff]  ;;  %3220 = vmatpush.msra.mxu1 %v2691_v41 }
 0x1c3   : > { %vm2186_vm7 = vcmp.gt.f32.partialorder %v2099_v44, 0.0  ;;  %v2218_v35 = vmul.f32 0.01, %v2099_v44  ;;  %v1403_v17 = vsel %vm546_vm0, %v4462_v57, %v1250_v26  ;;  %3107 = vmatpush.msra.mxu0 %v2675_v63  ;;  %v1252_v57 = vpop.permute.xlu2 %1251 }
 0x1c4   : > { %v1875_v23 = vpop.f32.mrf.mxu2 }
 0x1c5   : > { %v5870_v37 = vsel %vm2186_vm7, %v2099_v44, %v2218_v35  ;;  %v1876_v36 = vadd.f32 %v1875_v23, %v1763_v43  ;;  %v1988_v54 = vpop.f32.mrf.mxu3  ;;  %v5882_v56 = vld [vmem:[#allocation3 + $0x2f] sm:$0xff]  ;;  %v2642_v43 = vld [vmem:[%s7558_s4 + $0xd0] sm:$0xff]  ;;  %v1653_v35 = vadd.f32 %v5450_v32, %v5581_v22  ;;  %v7820_v23 = vunpack.i.h.bf16 %v5096_v18 }
 0x1c6   : > { %2288 = vst [vmem:[#allocation3 + $0x38] sm:$0xff] %v5870_v37  ;;  %v2101_v51 = vpop.f32.mrf.mxu0  ;;  %2882 = vmatpush.msra.mxu2 %v2642_v43 }
 0x1c7   : > { %v1989_v44 = vadd.f32 %v1988_v54, %v1876_v36  ;;  %v1435_v36 = vsel %vm546_vm0, %v871_v9, %v7820_v23  ;;  %v1771_v54 = vpop.f32.mrf.mxu1  ;;  %v1766_v61 = vadd.f32 %v5829_v55, %v1653_v35  ;;  %v7821_v9 = vld [vmem:[#allocation22_spill] sm:$0xff]  ;;  %v2658_v55 = vld [vmem:[%s7558_s4 + $0x150] sm:$0xff] }
 0x1c8   : > { %2795 = vmatmul.f32.gmra.mxu1 %v5882_v56  ;;  %2995 = vmatpush.msra.mxu3 %v2658_v55  ;;  %v4465_v55 = vld [vmem:[#allocation2 + $0xe7] sm:$0xff] }
 0x1c9   : > { %v2102_v26 = vadd.f32 %v2101_v51, %v1989_v44  ;;  %1925 = vmatmul.f32.gmra.mxu2 %v1403_v17  ;;  %4182 = vmatmul.msk.f32.gmra.mxu0 %vm546_vm0, %v906_v59  ;;  %v4463_v17 = vld [vmem:[#allocation2 + $0xd0] sm:$0xff] }
 0x1ca   : > { %2038 = vmatmul.f32.gmra.mxu3 %v1435_v36  ;;  %v1404_v44 = vsel %vm546_vm0, %v4463_v17, %v1252_v57  ;;  %v4464_v36 = vld [vmem:[#allocation2 + $0xd9] sm:$0xff]  ;;  %v1254_v57 = vpop.permute.xlu0 %1253 }
 0x1cb   : > { %vm2187_vm8 = vcmp.gt.f32.partialorder %v2102_v26, 0.0  ;;  %v2219_v11 = vmul.f32 0.01, %v2102_v26 }
 0x1cc   : > { %v1878_v63 = vpop.f32.mrf.mxu2 }
 0x1cd   : > { %v5895_v41 = vsel %vm2187_vm8, %v2102_v26, %v2219_v11  ;;  %v1879_v43 = vadd.f32 %v1878_v63, %v1766_v61  ;;  %v1991_v22 = vpop.f32.mrf.mxu3  ;;  %v5897_v51 = vld [vmem:[#allocation3 + $0x37] sm:$0xff]  ;;  %v1656_v26 = vadd.f32 %v5450_v32, %v5598_v31 }
 0x1ce   : > { %2289 = vst [vmem:[#allocation3 + $0x40] sm:$0xff] %v5895_v41  ;;  %v2104_v18 = vpop.f32.mrf.mxu0  ;;  %v2354_v59 = vmul.f32 %v7821_v9, %v5897_v51  ;;  %v7823_v31 = vld [vmem:[#allocation11_spill] sm:$0xff] }
 0x1cf   : > { %v1992_v35 = vadd.f32 %v1991_v22, %v1879_v43  ;;  %v1769_v61 = vadd.f32 %v5863_v1, %v1656_v26  ;;  %v1774_v63 = vpop.f32.mrf.mxu1  ;;  %v2674_v26 = vld [vmem:[%s7558_s4 + $0x1d0] sm:$0xff] }
 0x1d0   : > { %2798 = vmatmul.f32.gmra.mxu1 %v2354_v59  ;;  %3108 = vmatpush.msra.mxu0 %v2674_v26 }
 0x1d1   : > { %v2105_v23 = vadd.f32 %v2104_v18, %v1992_v35  ;;  %1928 = vmatmul.f32.gmra.mxu2 %v1404_v44  ;;  %4183 = vmatmul.msk.f32.gmra.mxu0 %vm546_vm0, %v4464_v36  ;;  %v873_v18 = vmul.f32 %v4465_v55, %v7823_v31  ;;  %v4466_v44 = vld [vmem:[#allocation2 + $0xe1] sm:$0xff]  ;;  %v4467_v36 = vld [vmem:[#allocation2 + $0xd8] sm:$0xff] }
 0x1d2   : > { %2041 = vmatmul.f32.gmra.mxu3 %v5315_v13  ;;  %v908_v35 = vmul.f32 %v4466_v44, %v7788_v38  ;;  %v1405_v1 = vsel %vm546_vm0, %v4467_v36, %v1254_v57  ;;  %v1659_v57 = vadd.f32 %v5450_v32, %v5615_v39  ;;  %v7824_v44 = vld [vmem:[#allocation47_spill] sm:$0xff] }
 0x1d3   : > { %vm2188_vm9 = vcmp.gt.f32.partialorder %v2105_v23, 0.0  ;;  %v2220_v11 = vmul.f32 0.01, %v2105_v23  ;;  %v7825_v36 = vunpack.i.h.bf16 %v7824_v44  ;;  %v7826_v44 = vld [vmem:[#allocation61_spill] sm:$0xff] }
 0x1d4   : > { %v1881_v17 = vpop.f32.mrf.mxu2 }
 0x1d5   : > { %v5911_v43 = vsel %vm2188_vm9, %v2105_v23, %v2220_v11  ;;  %v1882_v22 = vadd.f32 %v1881_v17, %v1769_v61  ;;  %v1994_v59 = vpop.f32.mrf.mxu3  ;;  %v2690_v23 = vld [vmem:[%s7558_s4 + $0x250] sm:$0xff]  ;;  %v2641_v17 = vld [vmem:[%s7558_s4 + $0xc8] sm:$0xff] }
 0x1d6   : > { %7822 = vst [vmem:[#allocation45_spill] sm:$0xff] %v5911_v43  ;;  %v2107_v13 = vpop.f32.mrf.mxu0  ;;  %v5923_v11 = vld [vmem:[#allocation3 + $0x3f] sm:$0xff]  ;;  %3221 = vmatpush.msra.mxu1 %v2690_v23  ;;  %2883 = vmatpush.msra.mxu2 %v2641_v17  ;;  %v1256_v23 = vpop.permute.xlu1 %1255 }
 0x1d7   : > { %2290 = vst [vmem:[#allocation3 + $0x48] sm:$0xff] %v5911_v43  ;;  %v1995_v61 = vadd.f32 %v1994_v59, %v1882_v22  ;;  %v1437_v22 = vsel %vm546_vm0, %v873_v18, %v7825_v36  ;;  %v1772_v59 = vadd.f32 %v1771_v54, %v1659_v57  ;;  %v1777_v39 = vpop.f32.mrf.mxu1 }
 0x1d8   : > { %2801 = vmatmul.f32.gmra.mxu1 %v5923_v11 }
 0x1d9   : > { %v2108_v55 = vadd.f32 %v2107_v13, %v1995_v61  ;;  %1931 = vmatmul.f32.gmra.mxu2 %v1405_v1  ;;  %4184 = vmatmul.msk.f32.gmra.mxu0 %vm546_vm0, %v908_v35  ;;  %v4468_v35 = vld [vmem:[#allocation2 + $0xe0] sm:$0xff]  ;;  %v2657_v1 = vld [vmem:[%s7558_s4 + $0x148] sm:$0xff] }
 0x1da   : > { %2044 = vmatmul.f32.gmra.mxu3 %v1437_v22  ;;  %v1406_v54 = vsel %vm546_vm0, %v4468_v35, %v1256_v23  ;;  %v7828_v35 = vld [vmem:[#allocation12_spill] sm:$0xff] }
 0x1db   : > { %vm2189_vm10 = vcmp.gt.f32.partialorder %v2108_v55, 0.0  ;;  %v2221_v26 = vmul.f32 0.01, %v2108_v55  ;;  %2996 = vmatpush.msra.mxu3 %v2657_v1 }
 0x1dc   : > { %v1884_v38 = vpop.f32.mrf.mxu2 }
 0x1dd   : > { %v5935_v12 = vsel %vm2189_vm10, %v2108_v55, %v2221_v26  ;;  %v1885_v17 = vadd.f32 %v1884_v38, %v1772_v59  ;;  %v1997_v31 = vpop.f32.mrf.mxu3  ;;  %v1662_v38 = vadd.f32 %v5450_v32, %v5635_v40  ;;  %v4469_v55 = vld [vmem:[#allocation2 + $0xe9] sm:$0xff]  ;;  %v1258_v59 = vpop.permute.xlu2 %1257  ;;  %v4471_v32 = vld [vmem:[#allocation2 + $0xf1] sm:$0xff] }
 0x1de   : > { %v5937_v43 = vld [vmem:[#allocation3 + $0x47] sm:$0xff]  ;;  %2291 = vst [vmem:[#allocation3 + $0x50] sm:$0xff] %v5935_v12  ;;  %v2110_v13 = vpop.f32.mrf.mxu0  ;;  %v910_v40 = vmul.f32 %v4471_v32, %v5251_v58 }
 0x1df   : > { %v2356_v18 = vmul.f32 %v7789_v53, %v5937_v43  ;;  %v1998_v61 = vadd.f32 %v1997_v31, %v1885_v17  ;;  %v1775_v36 = vadd.f32 %v1774_v63, %v1662_v38  ;;  %v2689_v38 = vld [vmem:[%s7558_s4 + $0x248] sm:$0xff]  ;;  %v2670_v58 = vld [vmem:[%s7558_s4 + $0x1b0] sm:$0xff] }
 0x1e0   : > { %3222 = vmatpush.msra.mxu1 %v2689_v38 }
 0x1e1   : > { %2804 = vmatmul.f32.gmra.mxu1 %v2356_v18  ;;  %v2111_v57 = vadd.f32 %v2110_v13, %v1998_v61  ;;  %1934 = vmatmul.f32.gmra.mxu2 %v1406_v54  ;;  %v4470_v18 = vld [vmem:[#allocation2 + $0xf7] sm:$0xff]  ;;  %v4472_v54 = vld [vmem:[#allocation2 + $0xe8] sm:$0xff] }
 0x1e2   : > { %4185 = vmatmul.msk.f32.gmra.mxu0 %vm546_vm0, %v4469_v55  ;;  %2047 = vmatmul.f32.gmra.mxu3 %v7826_v44  ;;  %v875_v1 = vmul.f32 %v4470_v18, %v7828_v35  ;;  %v1407_v63 = vsel %vm546_vm0, %v4472_v54, %v1258_v59  ;;  %v2673_v61 = vld [vmem:[%s7558_s4 + $0x1c8] sm:$0xff]  ;;  %v2640_v44 = vld [vmem:[%s7558_s4 + $0xc0] sm:$0xff]  ;;  %v2639_v54 = vld [vmem:[%s7558_s4 + $0xb8] sm:$0xff] }
 0x1e3   : > { %vm2190_vm11 = vcmp.gt.f32.partialorder %v2111_v57, 0.0  ;;  %v2222_v22 = vmul.f32 0.01, %v2111_v57  ;;  %3109 = vmatpush.msra.mxu0 %v2673_v61  ;;  %2884 = vmatpush.msra.mxu2 %v2640_v44  ;;  %v5974_v59 = vld [vmem:[%s7557_s3] ss:$0 sm:$0xff]  ;;  %v2655_v61 = vld [vmem:[%s7558_s4 + $0x138] sm:$0xff] }
 0x1e4   : > { %v1887_v26 = vpop.f32.mrf.mxu2 }
 0x1e5   : > { %v5950_v23 = vsel %vm2190_vm11, %v2111_v57, %v2222_v22  ;;  %v1888_v31 = vadd.f32 %v1887_v26, %v1775_v36  ;;  %v2000_v17 = vpop.f32.mrf.mxu3  ;;  %v5962_v55 = vld [vmem:[#allocation3 + $0x4f] sm:$0xff]  ;;  %v1780_v36 = vpop.f32.mrf.mxu1  ;;  %v1665_v26 = vadd.f32 %v5974_v59, %v5649_v20  ;;  %2885 = vmatpush.msra.mxu2 %v2639_v54 }
 0x1e6   : > { %7827 = vst [vmem:[#allocation7_spill] sm:$0xff] %v5950_v23  ;;  %v2113_v13 = vpop.f32.mrf.mxu0  ;;  %v2656_v22 = vld [vmem:[%s7558_s4 + $0x140] sm:$0xff] }
 0x1e7   : > { %2292 = vst [vmem:[#allocation3 + $0x58] sm:$0xff] %v5950_v23  ;;  %v2001_v57 = vadd.f32 %v2000_v17, %v1888_v31  ;;  %v7829_v17 = vld [vmem:[#allocation51_spill] sm:$0xff]  ;;  %v1778_v38 = vadd.f32 %v1777_v39, %v1665_v26  ;;  %2997 = vmatpush.msra.mxu3 %v2656_v22  ;;  %v4474_v26 = vld [vmem:[#allocation2 + $0xf0] sm:$0xff] }
 0x1e8   : > { %v7830_v18 = vunpack.i.h.bf16 %v7829_v17 }
 0x1e9   : > { %2807 = vmatmul.f32.gmra.mxu1 %v5962_v55  ;;  %v2114_v31 = vadd.f32 %v2113_v13, %v2001_v57  ;;  %1937 = vmatmul.f32.gmra.mxu2 %v1407_v63  ;;  %v1260_v13 = vpop.permute.xlu0 %1259 }
 0x1ea   : > { %v1439_v32 = vsel %vm546_vm0, %v875_v1, %v7830_v18  ;;  %4186 = vmatmul.msk.f32.gmra.mxu0 %vm546_vm0, %v910_v40  ;;  %v2638_v1 = vld [vmem:[%s7558_s4 + $0xb0] sm:$0xff]  ;;  %2998 = vmatpush.msra.mxu3 %v2655_v61  ;;  %v1668_v61 = vadd.f32 %v5974_v59, %v5668_v33 }
 0x1eb   : > { %2050 = vmatmul.f32.gmra.mxu3 %v1439_v32  ;;  %vm2191_vm12 = vcmp.gt.f32.partialorder %v2114_v31, 0.0  ;;  %v2223_v20 = vmul.f32 0.01, %v2114_v31  ;;  %v2654_v40 = vld [vmem:[%s7558_s4 + $0x130] sm:$0xff]  ;;  %2886 = vmatpush.msra.mxu2 %v2638_v1  ;;  %v1408_v32 = vsel %vm546_vm0, %v4474_v26, %v1260_v13  ;;  %v2672_v13 = vld [vmem:[%s7558_s4 + $0x1c0] sm:$0xff] }
 0x1ec   : > { %v1890_v63 = vpop.f32.mrf.mxu2  ;;  %2999 = vmatpush.msra.mxu3 %v2654_v40  ;;  %v4475_v40 = vld [vmem:[#allocation2 + $0xf9] sm:$0xff]  ;;  %3110 = vmatpush.msra.mxu0 %v2672_v13 }
 0x1ed   : > { %v5994_v57 = vsel %vm2191_vm12, %v2114_v31, %v2223_v20  ;;  %v1891_v44 = vadd.f32 %v1890_v63, %v1778_v38  ;;  %v2003_v17 = vpop.f32.mrf.mxu3  ;;  %v2637_v31 = vld [vmem:[%s7558_s4 + $0xa8] sm:$0xff]  ;;  %v4380_v38 = vpop.permute.xlu1 %4379  ;;  %v2636_v63 = vld [vmem:[%s7558_s4 + $0xa0] sm:$0xff] }
 0x1ee   : > { %7831 = vst [vmem:[#allocation30_spill] sm:$0xff] %v5994_v57  ;;  %v5996_v18 = vld [vmem:[#allocation3 + $0x57] sm:$0xff]  ;;  %v2116_v39 = vpop.f32.mrf.mxu0  ;;  %2887 = vmatpush.msra.mxu2 %v2637_v31  ;;  %v1783_v33 = vpop.f32.mrf.mxu1  ;;  %v2635_v31 = vld [vmem:[%s7558_s4 + $0x98] sm:$0xff] }
 0x1ef   : > { %2293 = vst [vmem:[#allocation3 + $0x60] sm:$0xff] %v5994_v57  ;;  %v2358_v22 = vmul.f32 %v4972_v4, %v5996_v18  ;;  %v2004_v54 = vadd.f32 %v2003_v17, %v1891_v44  ;;  %v2653_v20 = vld [vmem:[%s7558_s4 + $0x128] sm:$0xff]  ;;  %v1781_v44 = vadd.f32 %v1780_v36, %v1668_v61  ;;  %v7832_v17 = vld [vmem:[#allocation62_spill] sm:$0xff]  ;;  %v2652_v26 = vld [vmem:[%s7558_s4 + $0x120] sm:$0xff]  ;;  %v4382_v36 = vunpack.i.h.bf16 %v4380_v38 }
 0x1f0   : > { %v7833_v61 = vld [vmem:[#allocation13_spill] sm:$0xff]  ;;  %3000 = vmatpush.msra.mxu3 %v2653_v20  ;;  %2888 = vmatpush.msra.mxu2 %v2636_v63 }
 0x1f1   : > { %2810 = vmatmul.f32.gmra.mxu1 %v2358_v22  ;;  %v2117_v1 = vadd.f32 %v2116_v39, %v2004_v54  ;;  %1940 = vmatmul.f32.gmra.mxu2 %v1408_v32  ;;  %v4381_v22 = vunpack.i.l.bf16 %v4380_v38  ;;  %v2671_v39 = vld [vmem:[%s7558_s4 + $0x1b8] sm:$0xff]  ;;  %v4476_v54 = vld [vmem:[#allocation2 + $0x107] sm:$0xff]  ;;  %v2634_v20 = vld [vmem:[%s7558_s4 + $0x90] sm:$0xff] }
 0x1f2   : > { %4187 = vmatmul.msk.f32.gmra.mxu0 %vm546_vm0, %v4475_v40  ;;  %v877_v40 = vmul.f32 %v4476_v54, %v7833_v61  ;;  %v4477_v38 = vld [vmem:[#allocation2 + $0x101] sm:$0xff]  ;;  %3001 = vmatpush.msra.mxu3 %v2652_v26 }
 0x1f3   : > { %2053 = vmatmul.f32.gmra.mxu3 %v7832_v17  ;;  %vm2192_vm13 = vcmp.gt.f32.partialorder %v2117_v1, 0.0  ;;  %v2224_v32 = vmul.f32 0.01, %v2117_v1  ;;  %v2651_v17 = vld [vmem:[%s7558_s4 + $0x118] sm:$0xff]  ;;  %3111 = vmatpush.msra.mxu0 %v2671_v39  ;;  %v912_v23 = vmul.f32 %v4477_v38, %v5298_v27  ;;  %v2668_v38 = vld [vmem:[%s7558_s4 + $0x1a0] sm:$0xff]  ;;  %v4480_v27 = vld [vmem:[#allocation2 + $0x10f] sm:$0xff] }
 0x1f4   : > { %v1893_v13 = vpop.f32.mrf.mxu2  ;;  %2889 = vmatpush.msra.mxu2 %v2635_v31  ;;  %v4478_v39 = vld [vmem:[#allocation2 + $0xf8] sm:$0xff]  ;;  %v1441_v26 = vsel %vm546_vm0, %v877_v40, %v4382_v36  ;;  %v4385_v31 = vpop.permute.xlu2 %4384  ;;  %3002 = vmatpush.msra.mxu3 %v2651_v17  ;;  %v2632_v36 = vld [vmem:[%s7558_s4 + $0x80] sm:$0xff]  ;;  %v2649_v17 = vld [vmem:[%s7558_s4 + $0x108] sm:$0xff] }
 0x1f5   : > { %v6034_v57 = vsel %vm2192_vm13, %v2117_v1, %v2224_v32  ;;  %v1894_v4 = vadd.f32 %v1893_v13, %v1781_v44  ;;  %v2006_v35 = vpop.f32.mrf.mxu3  ;;  %v1409_v54 = vsel %vm546_vm0, %v4478_v39, %v4381_v22  ;;  %v2688_v1 = vld [vmem:[%s7558_s4 + $0x240] sm:$0xff]  ;;  %3112 = vmatpush.msra.mxu0 %v2670_v58  ;;  %v2633_v13 = vld [vmem:[%s7558_s4 + $0x88] sm:$0xff]  ;;  %v2650_v22 = vld [vmem:[%s7558_s4 + $0x110] sm:$0xff]  ;;  %v1671_v58 = vadd.f32 %v5974_v59, %v5695_v25 }
 0x1f6   : > { %2294 = vst [vmem:[#allocation3 + $0x68] sm:$0xff] %v6034_v57  ;;  %v2119_v63 = vpop.f32.mrf.mxu0  ;;  %v6045_v32 = vld [vmem:[#allocation3 + $0x5f] sm:$0xff]  ;;  %3223 = vmatpush.msra.mxu1 %v2688_v1  ;;  %2890 = vmatpush.msra.mxu2 %v2634_v20  ;;  %v4386_v40 = vunpack.i.l.bf16 %v4385_v31  ;;  %v2667_v1 = vld [vmem:[%s7558_s4 + $0x198] sm:$0xff] }
 0x1f7   : > { %v2007_v44 = vadd.f32 %v2006_v35, %v1894_v4  ;;  %v2669_v4 = vld [vmem:[%s7558_s4 + $0x1a8] sm:$0xff]  ;;  %v1784_v25 = vadd.f32 %v1783_v33, %v1671_v58  ;;  %3003 = vmatpush.msra.mxu3 %v2650_v22 }
 0x1f8   : > { %2891 = vmatpush.msra.mxu2 %v2633_v13  ;;  %3113 = vmatpush.msra.mxu0 %v2669_v4  ;;  %v4479_v4 = vld [vmem:[#allocation2 + $0x100] sm:$0xff] }
 0x1f9   : > { %2813 = vmatmul.f32.gmra.mxu1 %v6045_v32  ;;  %v2120_v35 = vadd.f32 %v2119_v63, %v2007_v44  ;;  %1943 = vmatmul.f32.gmra.mxu2 %v1409_v54  ;;  %v4387_v63 = vunpack.i.h.bf16 %v4385_v31  ;;  %v2648_v54 = vld [vmem:[%s7558_s4 + $0x100] sm:$0xff]  ;;  %v1410_v58 = vsel %vm546_vm0, %v4479_v4, %v4386_v40 }
 0x1fa   : > { %4188 = vmatmul.msk.f32.gmra.mxu0 %vm546_vm0, %v912_v23  ;;  %v1786_v23 = vpop.f32.mrf.mxu1  ;;  %2892 = vmatpush.msra.mxu2 %v2632_v36 }
 0x1fb   : > { %2056 = vmatmul.f32.gmra.mxu3 %v1441_v26  ;;  %vm2193_vm14 = vcmp.gt.f32.partialorder %v2120_v35, 0.0  ;;  %v2225_v20 = vmul.f32 0.01, %v2120_v35  ;;  %3114 = vmatpush.msra.mxu0 %v2668_v38  ;;  %v1674_v38 = vadd.f32 %v5974_v59, %v5715_v0 }
 0x1fc   : > { %v1896_v39 = vpop.f32.mrf.mxu2  ;;  %3004 = vmatpush.msra.mxu3 %v2649_v17  ;;  %v2666_v17 = vld [vmem:[%s7558_s4 + $0x190] sm:$0xff] }
 0x1fd   : > { %v6076_v44 = vsel %vm2193_vm14, %v2120_v35, %v2225_v20  ;;  %v1897_v26 = vadd.f32 %v1896_v39, %v1784_v25  ;;  %v2009_v33 = vpop.f32.mrf.mxu3  ;;  %v6078_v13 = vld [vmem:[#allocation3 + $0x67] sm:$0xff]  ;;  %v1442_v35 = vsel %vm546_vm0, %v4480_v27, %v4387_v63  ;;  %v4390_v20 = vpop.permute.xlu0 %4389  ;;  %3115 = vmatpush.msra.mxu0 %v2667_v1  ;;  %v2665_v27 = vld [vmem:[%s7558_s4 + $0x188] sm:$0xff]  ;;  %v1787_v40 = vadd.f32 %v1786_v23, %v1674_v38 }
 0x1fe   : > { %2295 = vst [vmem:[#allocation3 + $0x70] sm:$0xff] %v6076_v44  ;;  %v2122_v31 = vpop.f32.mrf.mxu0  ;;  %v2360_v22 = vmul.f32 %v5034_v52, %v6078_v13  ;;  %3005 = vmatpush.msra.mxu3 %v2648_v54  ;;  %v847_v25 = vld [vmem:[#allocation2 + $0x117] sm:$0xff]  ;;  %v4391_v63 = vunpack.i.l.bf16 %v4390_v20  ;;  %v4392_v1 = vunpack.i.h.bf16 %v4390_v20  ;;  %v914_v23 = vmul.f32 %v5344_v47, %v5683_v34 }
 0x1ff   : > { %v2010_v36 = vadd.f32 %v2009_v33, %v1897_v26  ;;  %3116 = vmatpush.msra.mxu0 %v2666_v17  ;;  %v7834_v26 = vld [vmem:[#allocation14_spill] sm:$0xff]  ;;  %v2664_v33 = vld [vmem:[%s7558_s4 + $0x180] sm:$0xff]  ;;  %v1677_v34 = vadd.f32 %v5974_v59, %v5737_v2 }
 0x200   : > { %v879_v0 = vmul.f32 %v7834_v26, %v847_v25  ;;  %v2687_v17 = vld [vmem:[%s7558_s4 + $0x238] sm:$0xff] }
 0x201   : > { %2816 = vmatmul.f32.gmra.mxu1 %v2360_v22  ;;  %v2123_v39 = vadd.f32 %v2122_v31, %v2010_v36  ;;  %1946 = vmatmul.f32.gmra.mxu2 %v1410_v58 }
 0x202   : > { %4189 = vmatmul.msk.f32.gmra.mxu0 %vm546_vm0, %v5659_v45  ;;  %v1789_v58 = vpop.f32.mrf.mxu1  ;;  %3224 = vmatpush.msra.mxu1 %v2687_v17 }
 0x203   : > { %2059 = vmatmul.f32.gmra.mxu3 %v1442_v35  ;;  %vm2194_vm15 = vcmp.gt.f32.partialorder %v2123_v39, 0.0  ;;  %v2226_v54 = vmul.f32 0.01, %v2123_v39  ;;  %3117 = vmatpush.msra.mxu0 %v2665_v27  ;;  %v4481_v35 = vld [vmem:[#allocation2 + $0x108] sm:$0xff]  ;;  %v4395_v27 = vpop.permute.xlu1 %4394 }
 0x204   : > { %v1899_v31 = vpop.f32.mrf.mxu2  ;;  %v1411_v20 = vsel %vm546_vm0, %v4481_v35, %v4391_v63  ;;  %v4396_v63 = vunpack.i.l.bf16 %v4395_v27 }
 0x205   : > { %v6099_v45 = vsel %vm2194_vm15, %v2123_v39, %v2226_v54  ;;  %v1900_v22 = vadd.f32 %v1899_v31, %v1787_v40  ;;  %v2012_v4 = vpop.f32.mrf.mxu3  ;;  %3118 = vmatpush.msra.mxu0 %v2664_v33  ;;  %v6108_v25 = vld [vmem:[#allocation3 + $0x6f] sm:$0xff]  ;;  %v1443_v39 = vsel %vm546_vm0, %v879_v0, %v4392_v1  ;;  %v1790_v54 = vadd.f32 %v1789_v58, %v1677_v34 }
 0x206   : > { %2296 = vst [vmem:[#allocation3 + $0x78] sm:$0xff] %v6099_v45  ;;  %v2125_v36 = vpop.f32.mrf.mxu0  ;;  %v4397_v31 = vunpack.i.h.bf16 %v4395_v27  ;;  %v1412_v58 = vsel %vm546_vm0, %v5705_v10, %v4396_v63  ;;  %v1680_v27 = vadd.f32 %v5974_v59, %v5751_v62  ;;  %v2686_v62 = vld [vmem:[%s7558_s4 + $0x230] sm:$0xff] }
 0x207   : > { %v2013_v38 = vadd.f32 %v2012_v4, %v1900_v22  ;;  %v848_v4 = vld [vmem:[#allocation2 + $0x11f] sm:$0xff]  ;;  %3225 = vmatpush.msra.mxu1 %v2686_v62 }
 0x209   : > { %2819 = vmatmul.f32.gmra.mxu1 %v6108_v25  ;;  %v2126_v40 = vadd.f32 %v2125_v36, %v2013_v38  ;;  %1949 = vmatmul.f32.gmra.mxu2 %v1411_v20  ;;  %v883_v36 = vld [vmem:[#allocation2 + $0x119] sm:$0xff]  ;;  %v1444_v38 = vsel %vm546_vm0, %v848_v4, %v4397_v31 }
 0x20a   : > { %4190 = vmatmul.msk.f32.gmra.mxu0 %vm546_vm0, %v914_v23 }
 0x20b   : > { %2062 = vmatmul.f32.gmra.mxu3 %v1443_v39  ;;  %vm2195_vm1 = vcmp.gt.f32.partialorder %v2126_v40, 0.0  ;;  %v2227_v33 = vmul.f32 0.01, %v2126_v40  ;;  %v1792_v39 = vpop.f32.mrf.mxu1 }
 0x20c   : > { %v1902_v22 = vpop.f32.mrf.mxu2 }
 0x20d   : > { %v6115_v1 = vsel %vm2195_vm1, %v2126_v40, %v2227_v33  ;;  %v1903_v0 = vadd.f32 %v1902_v22, %v1790_v54  ;;  %v2015_v35 = vpop.f32.mrf.mxu3  ;;  %v6117_v17 = vld [vmem:[#allocation3 + $0x77] sm:$0xff]  ;;  %v1793_v54 = vadd.f32 %v1792_v39, %v1680_v27 }
 0x20e   : > { %2297 = vst [vmem:[#allocation3 + $0x80] sm:$0xff] %v6115_v1  ;;  %v2128_v2 = vpop.f32.mrf.mxu0  ;;  %v2362_v23 = vmul.f32 %v5194_v28, %v6117_v17  ;;  %v884_v40 = vld [vmem:[#allocation2 + $0x121] sm:$0xff] }
 0x20f   : > { %v2016_v20 = vadd.f32 %v2015_v35, %v1903_v0  ;;  %v916_v31 = vmul.f32 %v5404_v46, %v884_v40  ;;  %v7835_v27 = vld [vmem:[#allocation23_spill] sm:$0xff] }
 0x211   : > { %2822 = vmatmul.f32.gmra.mxu1 %v2362_v23  ;;  %v2129_v34 = vadd.f32 %v2128_v2, %v2016_v20  ;;  %1952 = vmatmul.f32.gmra.mxu2 %v1412_v58  ;;  %v2412_v2 = vld [vmem:[#allocation3 + $0x9] sm:$0xff]  ;;  %v4482_v58 = vld [vmem:[#allocation3] sm:$0xff] }
 0x212   : > { %4191 = vmatmul.msk.f32.gmra.mxu0 %vm546_vm0, %v883_v36 }
 0x213   : > { %2065 = vmatmul.f32.gmra.mxu3 %v1444_v38  ;;  %vm2196_vm2 = vcmp.gt.f32.partialorder %v2129_v34, 0.0  ;;  %v2228_v33 = vmul.f32 0.01, %v2129_v34  ;;  %v6139_v36 = vpop.f32.mrf.mxu1 }
 0x214   : > { %v1905_v22 = vpop.f32.mrf.mxu2 }
 0x215   : > { %v6128_v10 = vsel %vm2196_vm2, %v2129_v34, %v2228_v33  ;;  %v1906_v63 = vadd.f32 %v1905_v22, %v1793_v54  ;;  %v2018_v0 = vpop.f32.mrf.mxu3  ;;  %v6135_v35 = vld [vmem:[#allocation3 + $0x7f] sm:$0xff]  ;;  %v2413_v33 = vld [vmem:[#allocation3 + $0x11] sm:$0xff] }
 0x216   : > { %2298 = vst [vmem:[#allocation3 + $0x88] sm:$0xff] %v6128_v10  ;;  %v2131_v4 = vpop.f32.mrf.mxu0 }
 0x217   : > { %v2019_v59 = vadd.f32 %v2018_v0, %v1906_v63  ;;  %v2478_v0 = vmul.f32 %v7800_v15, %v5811_v24 }
 0x219   : > { %2825 = vmatmul.f32.gmra.mxu1 %v6135_v35  ;;  %v2132_v23 = vadd.f32 %v2131_v4, %v2019_v59  ;;  %2893 = vmatmul.f32.vlgmr.msra.gmra.mxu2 %v4482_v58  ;;  %v7836_v4 = vld [vmem:[#allocation16_spill] sm:$0xff] }
 0x21a   : > { %4192 = vmatmul.msk.f32.gmra.mxu0 %vm546_vm0, %v916_v31  ;;  %v2445_v62 = vmul.f32 %v7836_v4, %v2413_v33 }
 0x21b   : > { %3006 = vmatmul.f32.vlgmr.msra.gmra.mxu3 %v2412_v2  ;;  %vm2197_vm3 = vcmp.gt.f32.partialorder %v2132_v23, 0.0  ;;  %v2229_v20 = vmul.f32 0.01, %v2132_v23 }
 0x21c   : > { %v1908_v38 = vpop.f32.mrf.mxu2 }
 0x21d   : > { %v6141_v39 = vsel %vm2197_vm3, %v2132_v23, %v2229_v20  ;;  %v1909_v34 = vadd.f32 %v1908_v38, %v7835_v27  ;;  %v2021_v40 = vpop.f32.mrf.mxu3  ;;  %v6144_v54 = vld [vmem:[#allocation3 + $0x87] sm:$0xff]  ;;  %v6152_v23 = vpop.f32.mrf.mxu1 }
 0x21e   : > { %2299 = vst [vmem:[#allocation3 + $0x90] sm:$0xff] %v6141_v39  ;;  %v2134_v22 = vpop.f32.mrf.mxu0  ;;  %v2364_v63 = vmul.f32 %v7807_v48, %v6144_v54  ;;  %v7837_v27 = vld [vmem:[#allocation29_spill] sm:$0xff] }
 0x21f   : > { %v2022_v31 = vadd.f32 %v2021_v40, %v1909_v34  ;;  %v2685_v34 = vld [vmem:[%s7558_s4 + $0x228] sm:$0xff] }
 0x220   : > { %3226 = vmatpush.msra.mxu1 %v2685_v34  ;;  %v7839_v34 = vld [vmem:[#allocation17_spill] sm:$0xff] }
 0x221   : > { %2828 = vmatmul.f32.gmra.mxu1 %v2364_v63  ;;  %v2135_v59 = vadd.f32 %v2134_v22, %v2022_v31  ;;  %2896 = vmatmul.f32.gmra.mxu2 %v4482_v58  ;;  %v2414_v22 = vld [vmem:[#allocation3 + $0x19] sm:$0xff] }
 0x222   : > { %3119 = vmatmul.f32.vlgmr.msra.gmra.mxu0 %v2478_v0 }
 0x223   : > { %3009 = vmatmul.f32.gmra.mxu3 %v2445_v62  ;;  %vm2198_vm4 = vcmp.gt.f32.partialorder %v2135_v59, 0.0  ;;  %v2230_v2 = vmul.f32 0.01, %v2135_v59  ;;  %v7838_v62 = vld [vmem:[#allocation24_spill] sm:$0xff] }
 0x224   : > { %v1911_v20 = vpop.f32.mrf.mxu2 }
 0x225   : > { %v6154_v38 = vsel %vm2198_vm4, %v2135_v59, %v2230_v2  ;;  %v1912_v46 = vadd.f32 %v1911_v20, %v7837_v27  ;;  %v2024_v47 = vpop.f32.mrf.mxu3  ;;  %v6161_v40 = vld [vmem:[#allocation3 + $0x8f] sm:$0xff]  ;;  %v2415_v20 = vld [vmem:[#allocation3 + $0x21] sm:$0xff] }
 0x226   : > { %2300 = vst [vmem:[#allocation3 + $0x98] sm:$0xff] %v6154_v38  ;;  %v2137_v24 = vpop.f32.mrf.mxu0 }
 0x227   : > { %v2025_v58 = vadd.f32 %v2024_v47, %v1912_v46 }
 0x229   : > { %2831 = vmatmul.f32.gmra.mxu1 %v6161_v40  ;;  %v2138_v33 = vadd.f32 %v2137_v24, %v2025_v58  ;;  %2899 = vmatmul.f32.gmra.mxu2 %v5785_v49  ;;  %v2480_v24 = vmul.f32 %v7770_v3, %v5854_v7  ;;  %v2447_v58 = vmul.f32 %v7839_v34, %v2415_v20  ;;  %v7849_v34 = vld [vmem:[#allocation36_spill] sm:$0xff] }
 0x22a   : > { %3122 = vmatmul.f32.gmra.mxu0 %v5839_v19 }
 0x22b   : > { %3012 = vmatmul.f32.gmra.mxu3 %v2414_v22  ;;  %vm2199_vm5 = vcmp.gt.f32.partialorder %v2138_v33, 0.0  ;;  %v2231_v63 = vmul.f32 0.01, %v2138_v33 }
 0x22c   : > { %v1914_v0 = vpop.f32.mrf.mxu2 }
 0x22d   : > { %v6166_v31 = vsel %vm2199_vm5, %v2138_v33, %v2231_v63  ;;  %v1915_v59 = vadd.f32 %v1914_v0, %v7838_v62  ;;  %v2027_v47 = vpop.f32.mrf.mxu3  ;;  %v6169_v46 = vpop.f32.mrf.mxu1  ;;  %v6171_v2 = vld [vmem:[#allocation3 + $0x97] sm:$0xff] }
 0x22e   : > { %2301 = vst [vmem:[#allocation3 + $0xa0] sm:$0xff] %v6166_v31  ;;  %v2140_v49 = vpop.f32.mrf.mxu0  ;;  %v2366_v19 = vmul.f32 %v7812_v14, %v6171_v2  ;;  %v7840_v62 = vld [vmem:[#allocation43_spill] sm:$0xff] }
 0x22f   : > { %v2028_v27 = vadd.f32 %v2027_v47, %v1915_v59  ;;  %v2684_v47 = vld [vmem:[%s7558_s4 + $0x220] sm:$0xff] }
 0x230   : > { %3227 = vmatpush.msra.mxu1 %v2684_v47 }
 0x231   : > { %2834 = vmatmul.f32.gmra.mxu1 %v2366_v19  ;;  %v2141_v33 = vadd.f32 %v2140_v49, %v2028_v27  ;;  %2902 = vmatmul.f32.gmra.mxu2 %v5809_v16  ;;  %v2416_v19 = vld [vmem:[#allocation3 + $0x29] sm:$0xff] }
 0x232   : > { %3125 = vmatmul.f32.gmra.mxu0 %v2480_v24 }
 0x233   : > { %3015 = vmatmul.f32.gmra.mxu3 %v2447_v58  ;;  %vm2200_vm6 = vcmp.gt.f32.partialorder %v2141_v33, 0.0  ;;  %v2232_v22 = vmul.f32 0.01, %v2141_v33 }
 0x234   : > { %v1917_v63 = vpop.f32.mrf.mxu2 }
 0x235   : > { %v6180_v0 = vsel %vm2200_vm6, %v2141_v33, %v2232_v22  ;;  %v1918_v4 = vadd.f32 %v1917_v63, %v7840_v62  ;;  %v2030_v15 = vpop.f32.mrf.mxu3  ;;  %v6183_v59 = vpop.f32.mrf.mxu1  ;;  %v6189_v20 = vld [vmem:[#allocation3 + $0x9f] sm:$0xff]  ;;  %v2417_v63 = vld [vmem:[#allocation3 + $0x31] sm:$0xff] }
 0x236   : > { %2302 = vst [vmem:[#allocation3 + $0xa8] sm:$0xff] %v6180_v0  ;;  %v2143_v7 = vpop.f32.mrf.mxu0  ;;  %v2449_v47 = vmul.f32 %v4882_v30, %v2417_v63 }
 0x237   : > { %v2031_v16 = vadd.f32 %v2030_v15, %v1918_v4 }
 0x239   : > { %2837 = vmatmul.f32.gmra.mxu1 %v6189_v20  ;;  %v2144_v49 = vadd.f32 %v2143_v7, %v2031_v16  ;;  %2905 = vmatmul.f32.gmra.mxu2 %v5825_v6  ;;  %v2482_v7 = vmul.f32 %v7779_v21, %v5897_v51 }
 0x23a   : > { %3128 = vmatmul.f32.gmra.mxu0 %v5882_v56 }
 0x23b   : > { %3018 = vmatmul.f32.gmra.mxu3 %v2416_v19  ;;  %vm2201_vm7 = vcmp.gt.f32.partialorder %v2144_v49, 0.0  ;;  %v2233_v27 = vmul.f32 0.01, %v2144_v49 }
 0x23c   : > { %v1920_v24 = vpop.f32.mrf.mxu2 }
 0x23d   : > { %v6194_v58 = vsel %vm2201_vm7, %v2144_v49, %v2233_v27  ;;  %v1921_v33 = vadd.f32 %v1920_v24, %v5550_v50  ;;  %v2033_v15 = vpop.f32.mrf.mxu3  ;;  %v6197_v4 = vpop.f32.mrf.mxu1  ;;  %v6199_v22 = vld [vmem:[#allocation3 + $0xa7] sm:$0xff] }
 0x23e   : > { %2303 = vst [vmem:[#allocation3 + $0xb0] sm:$0xff] %v6194_v58  ;;  %v2146_v6 = vpop.f32.mrf.mxu0  ;;  %v2368_v56 = vmul.f32 %v7816_v60, %v6199_v22 }
 0x23f   : > { %v2034_v62 = vadd.f32 %v2033_v15, %v1921_v33  ;;  %v2683_v15 = vld [vmem:[%s7558_s4 + $0x218] sm:$0xff] }
 0x240   : > { %3228 = vmatpush.msra.mxu1 %v2683_v15  ;;  %v2484_v15 = vmul.f32 %v7821_v9, %v5937_v43 }
 0x241   : > { %2840 = vmatmul.f32.gmra.mxu1 %v2368_v56  ;;  %v2147_v50 = vadd.f32 %v2146_v6, %v2034_v62  ;;  %2908 = vmatmul.f32.gmra.mxu2 %v5852_v42 }
 0x242   : > { %3131 = vmatmul.f32.gmra.mxu0 %v2482_v7 }
 0x243   : > { %3021 = vmatmul.f32.gmra.mxu3 %v2449_v47  ;;  %vm2202_vm8 = vcmp.gt.f32.partialorder %v2147_v50, 0.0  ;;  %v2234_v16 = vmul.f32 0.01, %v2147_v50  ;;  %v7841_v47 = vld [vmem:[#allocation26_spill] sm:$0xff] }
 0x244   : > { %v1923_v49 = vpop.f32.mrf.mxu2 }
 0x245   : > { %v6208_v19 = vsel %vm2202_vm8, %v2147_v50, %v2234_v16  ;;  %v1924_v27 = vadd.f32 %v1923_v49, %v5567_v5  ;;  %v2036_v24 = vpop.f32.mrf.mxu3  ;;  %v6211_v33 = vpop.f32.mrf.mxu1  ;;  %v6217_v63 = vld [vmem:[#allocation3 + $0xaf] sm:$0xff]  ;;  %v2418_v5 = vld [vmem:[#allocation3 + $0x39] sm:$0xff] }
 0x246   : > { %2304 = vst [vmem:[#allocation3 + $0xb8] sm:$0xff] %v6208_v19  ;;  %v2149_v51 = vpop.f32.mrf.mxu0 }
 0x247   : > { %v2037_v42 = vadd.f32 %v2036_v24, %v1924_v27  ;;  %v2419_v24 = vld [vmem:[#allocation3 + $0x41] sm:$0xff] }
 0x249   : > { %2843 = vmatmul.f32.gmra.mxu1 %v6217_v63  ;;  %v2150_v6 = vadd.f32 %v2149_v51, %v2037_v42  ;;  %2911 = vmatmul.f32.gmra.mxu2 %v5870_v37  ;;  %v2451_v42 = vmul.f32 %v7760_v29, %v2419_v24 }
 0x24a   : > { %3134 = vmatmul.f32.gmra.mxu0 %v5923_v11 }
 0x24b   : > { %3024 = vmatmul.f32.gmra.mxu3 %v2418_v5  ;;  %vm2203_vm9 = vcmp.gt.f32.partialorder %v2150_v6, 0.0  ;;  %v2235_v56 = vmul.f32 0.01, %v2150_v6 }
 0x24c   : > { %v1926_v62 = vpop.f32.mrf.mxu2 }
 0x24d   : > { %v6222_v7 = vsel %vm2203_vm9, %v2150_v6, %v2235_v56  ;;  %v1927_v50 = vadd.f32 %v1926_v62, %v7841_v47  ;;  %v2039_v16 = vpop.f32.mrf.mxu3  ;;  %v6225_v49 = vpop.f32.mrf.mxu1  ;;  %v6227_v27 = vld [vmem:[#allocation3 + $0xb7] sm:$0xff] }
 0x24e   : > { %2305 = vst [vmem:[#allocation3 + $0xc0] sm:$0xff] %v6222_v7  ;;  %v2152_v37 = vpop.f32.mrf.mxu0  ;;  %v2370_v11 = vmul.f32 %v7819_v8, %v6227_v27  ;;  %v7842_v47 = vld [vmem:[#allocation52_spill] sm:$0xff] }
 0x24f   : > { %v2040_v51 = vadd.f32 %v2039_v16, %v1927_v50  ;;  %v2682_v16 = vld [vmem:[%s7558_s4 + $0x210] sm:$0xff] }
 0x250   : > { %3229 = vmatpush.msra.mxu1 %v2682_v16  ;;  %v2421_v16 = vld [vmem:[#allocation3 + $0x51] sm:$0xff] }
 0x251   : > { %2846 = vmatmul.f32.gmra.mxu1 %v2370_v11  ;;  %v2153_v6 = vadd.f32 %v2152_v37, %v2040_v51  ;;  %2914 = vmatmul.f32.gmra.mxu2 %v5895_v41  ;;  %v7843_v11 = vld [vmem:[#allocation45_spill] sm:$0xff]  ;;  %v2420_v51 = vld [vmem:[#allocation3 + $0x49] sm:$0xff] }
 0x252   : > { %3137 = vmatmul.f32.gmra.mxu0 %v2484_v15 }
 0x253   : > { %3027 = vmatmul.f32.gmra.mxu3 %v2451_v42  ;;  %vm2204_vm10 = vcmp.gt.f32.partialorder %v2153_v6, 0.0  ;;  %v2236_v5 = vmul.f32 0.01, %v2153_v6 }
 0x254   : > { %v1929_v56 = vpop.f32.mrf.mxu2 }
 0x255   : > { %v6236_v62 = vsel %vm2204_vm10, %v2153_v6, %v2236_v5  ;;  %v1930_v30 = vadd.f32 %v1929_v56, %v7842_v47  ;;  %v2042_v21 = vpop.f32.mrf.mxu3  ;;  %v6239_v50 = vpop.f32.mrf.mxu1  ;;  %v6245_v24 = vld [vmem:[#allocation3 + $0xbf] sm:$0xff] }
 0x256   : > { %2306 = vst [vmem:[#allocation3 + $0xc8] sm:$0xff] %v6236_v62  ;;  %v2155_v43 = vpop.f32.mrf.mxu0  ;;  %v7845_v5 = vld [vmem:[#allocation44_spill] sm:$0xff] }
 0x257   : > { %v2043_v41 = vadd.f32 %v2042_v21, %v1930_v30 }
 0x259   : > { %2849 = vmatmul.f32.gmra.mxu1 %v6245_v24  ;;  %v2156_v37 = vadd.f32 %v2155_v43, %v2043_v41  ;;  %2917 = vmatmul.f32.gmra.mxu2 %v7843_v11  ;;  %v7846_v41 = vld [vmem:[#allocation11_spill] sm:$0xff] }
 0x25a   : > { %3140 = vmatmul.f32.gmra.mxu0 %v5962_v55 }
 0x25b   : > { %3030 = vmatmul.f32.gmra.mxu3 %v2420_v51  ;;  %vm2205_vm11 = vcmp.gt.f32.partialorder %v2156_v37, 0.0  ;;  %v2237_v15 = vmul.f32 0.01, %v2156_v37  ;;  %v2486_v51 = vmul.f32 %v7789_v53, %v5996_v18 }
 0x25c   : > { %v1932_v42 = vpop.f32.mrf.mxu2 }
 0x25d   : > { %v6250_v6 = vsel %vm2205_vm11, %v2156_v37, %v2237_v15  ;;  %v1933_v56 = vadd.f32 %v1932_v42, %v7845_v5  ;;  %v2045_v30 = vpop.f32.mrf.mxu3  ;;  %v6255_v47 = vld [vmem:[#allocation3 + $0xc7] sm:$0xff] }
 0x25e   : > { %7844 = vst [vmem:[#allocation48_spill] sm:$0xff] %v6250_v6  ;;  %v6253_v21 = vpop.f32.mrf.mxu1  ;;  %v2372_v55 = vmul.f32 %v7846_v41, %v6255_v47  ;;  %v7847_v37 = vld [vmem:[#allocation25_spill] sm:$0xff] }
 0x25f   : > { %2307 = vst [vmem:[#allocation3 + $0xd0] sm:$0xff] %v6250_v6  ;;  %v2158_v43 = vpop.f32.mrf.mxu0  ;;  %v2046_v11 = vadd.f32 %v2045_v30, %v1933_v56  ;;  %v2453_v15 = vmul.f32 %v7847_v37, %v2421_v16  ;;  %v2681_v30 = vld [vmem:[%s7558_s4 + $0x208] sm:$0xff] }
 0x260   : > { %3230 = vmatpush.msra.mxu1 %v2681_v30  ;;  %v2423_v30 = vld [vmem:[#allocation3 + $0x61] sm:$0xff] }
 0x261   : > { %2852 = vmatmul.f32.gmra.mxu1 %v2372_v55  ;;  %v2159_v42 = vadd.f32 %v2158_v43, %v2046_v11  ;;  %2920 = vmatmul.f32.gmra.mxu2 %v5935_v12  ;;  %v7851_v55 = vld [vmem:[#allocation7_spill] sm:$0xff] }
 0x262   : > { %3143 = vmatmul.f32.gmra.mxu0 %v2486_v51 }
 0x263   : > { %3033 = vmatmul.f32.gmra.mxu3 %v2453_v15  ;;  %vm2206_vm12 = vcmp.gt.f32.partialorder %v2159_v42, 0.0  ;;  %v2238_v5 = vmul.f32 0.01, %v2159_v42  ;;  %v7853_v15 = vld [vmem:[#allocation40_spill] sm:$0xff] }
 0x264   : > { %v1935_v29 = vpop.f32.mrf.mxu2 }
 0x265   : > { %v6264_v9 = vsel %vm2206_vm12, %v2159_v42, %v2238_v5  ;;  %v1936_v3 = vadd.f32 %v1935_v29, %v7849_v34  ;;  %v2048_v6 = vpop.f32.mrf.mxu3  ;;  %v2422_v29 = vld [vmem:[#allocation3 + $0x59] sm:$0xff] }
 0x266   : > { %7848 = vst [vmem:[#allocation8_spill] sm:$0xff] %v6264_v9  ;;  %v6267_v56 = vpop.f32.mrf.mxu1  ;;  %v6273_v16 = vld [vmem:[#allocation3 + $0xcf] sm:$0xff] }
 0x267   : > { %7850 = vst [vmem:[#allocation37_spill] sm:$0xff] %v6267_v56  ;;  %v2161_v18 = vpop.f32.mrf.mxu0  ;;  %v2049_v12 = vadd.f32 %v2048_v6, %v1936_v3 }
 0x268   : > { %2308 = vst [vmem:[#allocation3 + $0xd8] sm:$0xff] %v6264_v9  ;;  %v7859_v9 = vld [vmem:[#allocation50_spill] sm:$0xff] }
 0x269   : > { %2855 = vmatmul.f32.gmra.mxu1 %v6273_v16  ;;  %v2162_v43 = vadd.f32 %v2161_v18, %v2049_v12  ;;  %2923 = vmatmul.f32.gmra.mxu2 %v7851_v55  ;;  %v7855_v12 = vld [vmem:[#allocation12_spill] sm:$0xff] }
 0x26a   : > { %3146 = vmatmul.f32.gmra.mxu0 %v6045_v32 }
 0x26b   : > { %3036 = vmatmul.f32.gmra.mxu3 %v2422_v29  ;;  %vm2207_vm13 = vcmp.gt.f32.partialorder %v2162_v43, 0.0  ;;  %v2239_v34 = vmul.f32 0.01, %v2162_v43  ;;  %v7856_v29 = vld [vmem:[#allocation31_spill] sm:$0xff] }
 0x26c   : > { %v1938_v11 = vpop.f32.mrf.mxu2  ;;  %v2488_v37 = vmul.f32 %v7856_v29, %v6078_v13 }
 0x26d   : > { %v6278_v51 = vsel %vm2207_vm13, %v2162_v43, %v2239_v34  ;;  %v1939_v42 = vadd.f32 %v1938_v11, %v7853_v15  ;;  %v7857_v43 = vld [vmem:[#allocation35_spill] sm:$0xff]  ;;  %v7858_v15 = vld [vmem:[#allocation30_spill] sm:$0xff] }
 0x26e   : > { %7852 = vst [vmem:[#allocation55_spill] sm:$0xff] %v6278_v51  ;;  %v2051_v3 = vpop.f32.mrf.mxu3  ;;  %v6281_v6 = vpop.f32.mrf.mxu1  ;;  %v2455_v34 = vmul.f32 %v7857_v43, %v2423_v30  ;;  %v7866_v43 = vld [vmem:[#allocation33_spill] sm:$0xff] }
 0x26f   : > { %7854 = vst [vmem:[#allocation9_spill] sm:$0xff] %v6281_v6  ;;  %v6283_v5 = vld [vmem:[#allocation3 + $0xd7] sm:$0xff]  ;;  %v2164_v18 = vpop.f32.mrf.mxu0  ;;  %v2052_v55 = vadd.f32 %v2051_v3, %v1939_v42 }
 0x270   : > { %2309 = vst [vmem:[#allocation3 + $0xe0] sm:$0xff] %v6278_v51  ;;  %v2374_v32 = vmul.f32 %v7855_v12, %v6283_v5  ;;  %v2680_v3 = vld [vmem:[%s7558_s4 + $0x200] sm:$0xff] }
 0x271   : > { %v2165_v11 = vadd.f32 %v2164_v18, %v2052_v55  ;;  %2926 = vmatmul.f32.gmra.mxu2 %v7858_v15  ;;  %3231 = vmatpush.msra.mxu1 %v2680_v3  ;;  %v2425_v3 = vld [vmem:[#allocation3 + $0x71] sm:$0xff] }
 0x272   : > { %2858 = vmatmul.f32.gmra.mxu1 %v2374_v32  ;;  %3149 = vmatmul.f32.gmra.mxu0 %v2488_v37  ;;  %v7860_v32 = vld [vmem:[#allocation57_spill] sm:$0xff] }
 0x273   : > { %3039 = vmatmul.f32.gmra.mxu3 %v2455_v34  ;;  %vm2208_vm14 = vcmp.gt.f32.partialorder %v2165_v11, 0.0  ;;  %v2240_v53 = vmul.f32 0.01, %v2165_v11 }
 0x274   : > { %v1941_v6 = vpop.f32.mrf.mxu2 }
 0x275   : > { %v6292_v51 = vsel %vm2208_vm14, %v2165_v11, %v2240_v53  ;;  %v1942_v56 = vadd.f32 %v1941_v6, %v7859_v9  ;;  %v2711_v53 = vld [vmem:[%s7558_s4 + $0x2f8] sm:$0xff] }
 0x276   : > { %v2054_v12 = vpop.f32.mrf.mxu3  ;;  %v6295_v42 = vpop.f32.mrf.mxu1  ;;  %2310 = vst [vmem:[#allocation3 + $0xe8] sm:$0xff] %v6292_v51  ;;  %3329 = vmatpush.msrb.mxu2 %v2711_v53  ;;  %v2424_v6 = vld [vmem:[#allocation3 + $0x69] sm:$0xff]  ;;  %v2490_v53 = vmul.f32 %v5034_v52, %v6117_v17  ;;  %v2758_v52 = vld [vmem:[%s7558_s4 + $0x470] sm:$0xff] }
 0x277   : > { %v2167_v13 = vpop.f32.mrf.mxu0  ;;  %v2055_v30 = vadd.f32 %v2054_v12, %v1942_v56  ;;  %v6301_v37 = vld [vmem:[#allocation3 + $0xdf] sm:$0xff] }
 0x279   : > { %v2168_v9 = vadd.f32 %v2167_v13, %v2055_v30  ;;  %2929 = vmatmul.f32.gmra.mxu2 %v6034_v57  ;;  %v2727_v13 = vld [vmem:[%s7558_s4 + $0x378] sm:$0xff] }
 0x27a   : > { %2861 = vmatmul.f32.gmra.mxu1 %v6301_v37  ;;  %3152 = vmatmul.f32.gmra.mxu0 %v6108_v25 }
 0x27b   : > { %3042 = vmatmul.f32.gmra.mxu3 %v2424_v6  ;;  %vm2209_vm15 = vcmp.gt.f32.partialorder %v2168_v9, 0.0  ;;  %v2241_v18 = vmul.f32 0.01, %v2168_v9 }
 0x27c   : > { %v1944_v56 = vpop.f32.mrf.mxu2  ;;  %3442 = vmatpush.msrb.mxu3 %v2727_v13 }
 0x27d   : > { %v6309_v12 = vsel %vm2209_vm15, %v2168_v9, %v2241_v18  ;;  %v1945_v55 = vadd.f32 %v1944_v56, %v7860_v32  ;;  %v6314_v15 = vld [vmem:[#allocation3 + $0xe7] sm:$0xff] }
 0x27e   : > { %v2057_v34 = vpop.f32.mrf.mxu3  ;;  %v6312_v11 = vpop.f32.mrf.mxu1  ;;  %2311 = vst [vmem:[#allocation3 + $0xf0] sm:$0xff] %v6309_v12  ;;  %v2376_v25 = vmul.f32 %v7833_v61, %v6314_v15  ;;  %v7861_v9 = vld [vmem:[#allocation49_spill] sm:$0xff]  ;;  %v2743_v56 = vld [vmem:[%s7558_s4 + $0x3f8] sm:$0xff] }
 0x27f   : > { %v2170_v57 = vpop.f32.mrf.mxu0  ;;  %v2058_v30 = vadd.f32 %v2057_v34, %v1945_v55  ;;  %v2457_v6 = vmul.f32 %v7861_v9, %v2425_v3  ;;  %v2759_v32 = vld [vmem:[%s7558_s4 + $0x478] sm:$0xff]  ;;  %3555 = vmatpush.msrb.mxu0 %v2743_v56  ;;  %v7862_v3 = vld [vmem:[#allocation32_spill] sm:$0xff] }
 0x280   : > { %3668 = vmatpush.msrb.mxu1 %v2759_v32  ;;  %v2426_v56 = vld [vmem:[#allocation3 + $0x79] sm:$0xff] }
 0x281   : > { %v2171_v18 = vadd.f32 %v2170_v57, %v2058_v30  ;;  %2932 = vmatmul.f32.gmra.mxu2 %v6076_v44  ;;  %v2726_v32 = vld [vmem:[%s7558_s4 + $0x370] sm:$0xff] }
 0x282   : > { %2864 = vmatmul.f32.gmra.mxu1 %v2376_v25  ;;  %3155 = vmatmul.f32.gmra.mxu0 %v2490_v53 }
 0x283   : > { %3045 = vmatmul.f32.gmra.mxu3 %v2457_v6  ;;  %vm2210_vm1 = vcmp.gt.f32.partialorder %v2171_v18, 0.0  ;;  %v2242_v17 = vmul.f32 0.01, %v2171_v18  ;;  %v2710_v6 = vld [vmem:[%s7558_s4 + $0x2f0] sm:$0xff]  ;;  %3669 = vmatpush.msrb.mxu1 %v2758_v52  ;;  %v2709_v52 = vld [vmem:[%s7558_s4 + $0x2e8] sm:$0xff] }
 0x284   : > { %v1947_v55 = vpop.f32.mrf.mxu2  ;;  %3330 = vmatpush.msrb.mxu2 %v2710_v6  ;;  %3443 = vmatpush.msrb.mxu3 %v2726_v32  ;;  %v2492_v32 = vmul.f32 %v5194_v28, %v6144_v54  ;;  %v2494_v28 = vmul.f32 %v7807_v48, %v6171_v2 }
 0x285   : > { %v6332_v34 = vsel %vm2210_vm1, %v2171_v18, %v2242_v17  ;;  %v1948_v57 = vadd.f32 %v1947_v55, %v7862_v3  ;;  %v6338_v53 = vld [vmem:[#allocation3 + $0xef] sm:$0xff] }
 0x286   : > { %v2060_v44 = vpop.f32.mrf.mxu3  ;;  %v6335_v25 = vpop.f32.mrf.mxu1  ;;  %2312 = vst [vmem:[#allocation3 + $0xf8] sm:$0xff] %v6332_v34  ;;  %3331 = vmatpush.msrb.mxu2 %v2709_v52 }
 0x287   : > { %v2173_v13 = vpop.f32.mrf.mxu0  ;;  %v2061_v30 = vadd.f32 %v2060_v44, %v1948_v57  ;;  %v7863_v57 = vld [vmem:[#allocation38_spill] sm:$0xff] }
 0x289   : > { %v2174_v18 = vadd.f32 %v2173_v13, %v2061_v30  ;;  %2935 = vmatmul.f32.gmra.mxu2 %v6099_v45  ;;  %v2427_v30 = vld [vmem:[#allocation3 + $0x81] sm:$0xff] }
 0x28a   : > { %2867 = vmatmul.f32.gmra.mxu1 %v6338_v53  ;;  %3158 = vmatmul.f32.gmra.mxu0 %v6135_v35 }
 0x28b   : > { %3048 = vmatmul.f32.gmra.mxu3 %v2426_v56  ;;  %vm2211_vm2 = vcmp.gt.f32.partialorder %v2174_v18, 0.0  ;;  %v2243_v17 = vmul.f32 0.01, %v2174_v18 }
 0x28c   : > { %v1950_v55 = vpop.f32.mrf.mxu2 }
 0x28d   : > { %v6349_v3 = vsel %vm2211_vm2, %v2174_v18, %v2243_v17  ;;  %v1951_v44 = vadd.f32 %v1950_v55, %v7863_v57  ;;  %v6354_v45 = vld [vmem:[#allocation3 + $0xf7] sm:$0xff]  ;;  %v2742_v57 = vld [vmem:[%s7558_s4 + $0x3f0] sm:$0xff] }
 0x28e   : > { %v2063_v6 = vpop.f32.mrf.mxu3  ;;  %v6352_v13 = vpop.f32.mrf.mxu1  ;;  %2313 = vst [vmem:[#allocation3 + $0x100] sm:$0xff] %v6349_v3  ;;  %v2378_v56 = vmul.f32 %v7834_v26, %v6354_v45  ;;  %v7864_v18 = vld [vmem:[#allocation60_spill] sm:$0xff]  ;;  %3556 = vmatpush.msrb.mxu0 %v2742_v57  ;;  %v2428_v57 = vld [vmem:[#allocation3 + $0x89] sm:$0xff] }
 0x28f   : > { %v2176_v35 = vpop.f32.mrf.mxu0  ;;  %v2064_v9 = vadd.f32 %v2063_v6, %v1951_v44  ;;  %v2459_v17 = vmul.f32 %v7864_v18, %v2427_v30  ;;  %v7865_v30 = vld [vmem:[#allocation27_spill] sm:$0xff] }
 0x291   : > { %v2177_v55 = vadd.f32 %v2176_v35, %v2064_v9  ;;  %2938 = vmatmul.f32.gmra.mxu2 %v6115_v1 }
 0x292   : > { %2870 = vmatmul.f32.gmra.mxu1 %v2378_v56  ;;  %3161 = vmatmul.f32.gmra.mxu0 %v2492_v32  ;;  %v6375_v32 = vld [vmem:[%s7559_s5] ss:$0 sm:$0xff] }
 0x293   : > { %3051 = vmatmul.f32.gmra.mxu3 %v2459_v17  ;;  %vm2212_vm3 = vcmp.gt.f32.partialorder %v2177_v55, 0.0  ;;  %v2244_v44 = vmul.f32 0.01, %v2177_v55  ;;  %v2785_v2 = vadd.f32 %v6375_v32, %v6152_v23  ;;  %v6414_v23 = vld [vmem:[#allocation3 + $0x99] sm:$0xff] }
 0x294   : > { %v1953_v54 = vpop.f32.mrf.mxu2 }
 0x295   : > { %v2276_v6 = vsel %vm2212_vm3, %v2177_v55, %v2244_v44  ;;  %v1954_v9 = vadd.f32 %v1953_v54, %v7865_v30  ;;  %v6377_v17 = vld [vmem:[#allocation3 + $0xff] sm:$0xff]  ;;  %v2782_v54 = vadd.f32 %v6375_v32, %v6139_v36 }
 0x296   : > { %v2066_v35 = vpop.f32.mrf.mxu3  ;;  %v6370_v1 = vpop.f32.mrf.mxu1  ;;  %2314 = vst [vmem:[#allocation3 + $0x108] sm:$0xff] %v2276_v6  ;;  %v2725_v44 = vld [vmem:[%s7558_s4 + $0x368] sm:$0xff] }
 0x297   : > { %v2179_v56 = vpop.f32.mrf.mxu0  ;;  %v2067_v18 = vadd.f32 %v2066_v35, %v1954_v9  ;;  %3444 = vmatpush.msrb.mxu3 %v2725_v44  ;;  %v2757_v44 = vld [vmem:[%s7558_s4 + $0x468] sm:$0xff] }
 0x298   : > { %3670 = vmatpush.msrb.mxu1 %v2757_v44 }
 0x299   : > { %v2180_v55 = vadd.f32 %v2179_v56, %v2067_v18  ;;  %2941 = vmatmul.f32.gmra.mxu2 %v6128_v10  ;;  %v2429_v10 = vld [vmem:[#allocation3 + $0x91] sm:$0xff] }
 0x29a   : > { %2873 = vmatmul.f32.gmra.mxu1 %v6377_v17  ;;  %3164 = vmatmul.f32.gmra.mxu0 %v6161_v40  ;;  %v2461_v36 = vmul.f32 %v7866_v43, %v2429_v10 }
 0x29b   : > { %3054 = vmatmul.f32.gmra.mxu3 %v2428_v57  ;;  %vm2213_vm4 = vcmp.gt.f32.partialorder %v2180_v55, 0.0  ;;  %v2245_v6 = vmul.f32 0.01, %v2180_v55  ;;  %v4483_v57 = vld [vmem:[#allocation3 + $0x18] sm:$0xff] }
 0x29c   : > { %v2894_v30 = vpop.f32.mrf.mxu2 }
 0x29d   : > { %v2277_v9 = vsel %vm2213_vm4, %v2180_v55, %v2245_v6  ;;  %v2895_v35 = vadd.f32 %v2894_v30, %v2782_v54  ;;  %v2741_v55 = vld [vmem:[%s7558_s4 + $0x3e8] sm:$0xff] }
 0x29e   : > { %v3007_v18 = vpop.f32.mrf.mxu3  ;;  %v6390_v56 = vpop.f32.mrf.mxu1  ;;  %2315 = vst [vmem:[#allocation3 + $0x110] sm:$0xff] %v2277_v9  ;;  %3557 = vmatpush.msrb.mxu0 %v2741_v55 }
 0x29f   : > { %v3120_v40 = vpop.f32.mrf.mxu0  ;;  %v3008_v52 = vadd.f32 %v3007_v18, %v2895_v35  ;;  %v2708_v35 = vld [vmem:[%s7558_s4 + $0x2e0] sm:$0xff]  ;;  %v4484_v18 = vld [vmem:[#allocation3 + $0x20] sm:$0xff] }
 0x2a0   : > { %3332 = vmatpush.msrb.mxu2 %v2708_v35  ;;  %v2791_v35 = vadd.f32 %v6375_v32, %v6183_v59  ;;  %v6456_v59 = vld [vmem:[#allocation3 + $0xa9] sm:$0xff] }
 0x2a1   : > { %v6395_v29 = vadd.f32 %v3120_v40, %v3008_v52  ;;  %2944 = vmatmul.f32.gmra.mxu2 %v6141_v39  ;;  %v2724_v40 = vld [vmem:[%s7558_s4 + $0x360] sm:$0xff]  ;;  %v2788_v52 = vadd.f32 %v6375_v32, %v6169_v46 }
 0x2a2   : > { %3232 = vmatmul.f32.vlgmr.msra.gmra.mxu1 %v4483_v57  ;;  %3167 = vmatmul.f32.gmra.mxu0 %v2494_v28 }
 0x2a3   : > { %7867 = vst [vmem:[#allocation41_spill] sm:$0xff] %v6395_v29  ;;  %3057 = vmatmul.f32.gmra.mxu3 %v2461_v36  ;;  %v6576_v29 = vld [vmem:[#allocation3 + $0x60] sm:$0xff] }
 0x2a4   : > { %v2897_v54 = vpop.f32.mrf.mxu2  ;;  %3445 = vmatpush.msrb.mxu3 %v2724_v40 }
 0x2a5   : > { %v2898_v6 = vadd.f32 %v2897_v54, %v2785_v2 }
 0x2a6   : > { %v3010_v30 = vpop.f32.mrf.mxu3  ;;  %v6406_v9 = vpop.f32.mrf.mxu1 }
 0x2a7   : > { %v3123_v28 = vpop.f32.mrf.mxu0  ;;  %v3011_v39 = vadd.f32 %v3010_v30, %v2898_v6  ;;  %v6429_v6 = vld [vmem:[#allocation3 + $0x28] sm:$0xff] }
 0x2a8   : > { %v7869_v30 = vld [vmem:[#allocation42_spill] sm:$0xff] }
 0x2a9   : > { %v6411_v10 = vadd.f32 %v3123_v28, %v3011_v39  ;;  %2947 = vmatmul.f32.gmra.mxu2 %v6154_v38  ;;  %v6425_v38 = vld [vmem:[#allocation3 + $0xa1] sm:$0xff]  ;;  %v2740_v39 = vld [vmem:[%s7558_s4 + $0x3e0] sm:$0xff] }
 0x2aa   : > { %3235 = vmatmul.f32.gmra.mxu1 %v4484_v18  ;;  %3170 = vmatmul.f32.gmra.mxu0 %v6189_v20  ;;  %v2496_v20 = vmul.f32 %v7812_v14, %v6199_v22  ;;  %v2463_v46 = vmul.f32 %v7869_v30, %v6425_v38  ;;  %v2756_v22 = vld [vmem:[%s7558_s4 + $0x460] sm:$0xff] }
 0x2ab   : > { %7868 = vst [vmem:[#allocation10_spill] sm:$0xff] %v6411_v10  ;;  %3060 = vmatmul.f32.gmra.mxu3 %v6414_v23  ;;  %3558 = vmatpush.msrb.mxu0 %v2740_v39  ;;  %v2704_v10 = vld [vmem:[%s7558_s4 + $0x2c0] sm:$0xff] }
 0x2ac   : > { %v2900_v57 = vpop.f32.mrf.mxu2  ;;  %3671 = vmatpush.msrb.mxu1 %v2756_v22 }
 0x2ad   : > { %v2901_v36 = vadd.f32 %v2900_v57, %v2788_v52 }
 0x2ae   : > { %v3013_v55 = vpop.f32.mrf.mxu3  ;;  %v6423_v44 = vpop.f32.mrf.mxu1 }
 0x2af   : > { %v3126_v2 = vpop.f32.mrf.mxu0  ;;  %v3014_v54 = vadd.f32 %v3013_v55, %v2901_v36  ;;  %v2707_v55 = vld [vmem:[%s7558_s4 + $0x2d8] sm:$0xff] }
 0x2b0   : > { %3333 = vmatpush.msrb.mxu2 %v2707_v55 }
 0x2b1   : > { %v6434_v28 = vadd.f32 %v3126_v2, %v3014_v54  ;;  %2950 = vmatmul.f32.gmra.mxu2 %v6166_v31  ;;  %v6450_v2 = vld [vmem:[#allocation3 + $0x30] sm:$0xff] }
 0x2b2   : > { %3238 = vmatmul.f32.gmra.mxu1 %v6429_v6  ;;  %3173 = vmatmul.f32.gmra.mxu0 %v2496_v20  ;;  %v2723_v20 = vld [vmem:[%s7558_s4 + $0x358] sm:$0xff] }
 0x2b3   : > { %7870 = vst [vmem:[#allocation47_spill] sm:$0xff] %v6434_v28  ;;  %3063 = vmatmul.f32.gmra.mxu3 %v2463_v46  ;;  %v2794_v46 = vadd.f32 %v6375_v32, %v6197_v4 }
 0x2b4   : > { %v2903_v18 = vpop.f32.mrf.mxu2  ;;  %3446 = vmatpush.msrb.mxu3 %v2723_v20  ;;  %v2739_v20 = vld [vmem:[%s7558_s4 + $0x3d8] sm:$0xff] }
 0x2b5   : > { %v2904_v40 = vadd.f32 %v2903_v18, %v2791_v35  ;;  %3559 = vmatpush.msrb.mxu0 %v2739_v20  ;;  %v2722_v20 = vld [vmem:[%s7558_s4 + $0x350] sm:$0xff] }
 0x2b6   : > { %v3016_v52 = vpop.f32.mrf.mxu3  ;;  %v6445_v57 = vpop.f32.mrf.mxu1  ;;  %3447 = vmatpush.msrb.mxu3 %v2722_v20 }
 0x2b7   : > { %v3129_v31 = vpop.f32.mrf.mxu0  ;;  %v3017_v36 = vadd.f32 %v3016_v52, %v2904_v40 }
 0x2b9   : > { %v6453_v54 = vadd.f32 %v3129_v31, %v3017_v36  ;;  %2953 = vmatmul.f32.gmra.mxu2 %v6180_v0  ;;  %v6467_v0 = vld [vmem:[#allocation3 + $0xb1] sm:$0xff]  ;;  %v7872_v36 = vld [vmem:[#allocation46_spill] sm:$0xff] }
 0x2ba   : > { %3241 = vmatmul.f32.gmra.mxu1 %v6450_v2  ;;  %3176 = vmatmul.f32.gmra.mxu0 %v6217_v63  ;;  %v2498_v63 = vmul.f32 %v7816_v60, %v6227_v27  ;;  %v6471_v31 = vld [vmem:[#allocation3 + $0x38] sm:$0xff]  ;;  %v2465_v4 = vmul.f32 %v7872_v36, %v6467_v0  ;;  %v2755_v27 = vld [vmem:[%s7558_s4 + $0x458] sm:$0xff] }
 0x2bb   : > { %7871 = vst [vmem:[#allocation61_spill] sm:$0xff] %v6453_v54  ;;  %3066 = vmatmul.f32.gmra.mxu3 %v6456_v59  ;;  %3672 = vmatpush.msrb.mxu1 %v2755_v27  ;;  %v2800_v27 = vadd.f32 %v6375_v32, %v6225_v49  ;;  %v6534_v54 = vld [vmem:[#allocation3 + $0x50] sm:$0xff] }
 0x2bc   : > { %v2906_v39 = vpop.f32.mrf.mxu2 }
 0x2bd   : > { %v2907_v22 = vadd.f32 %v2906_v39, %v2794_v46  ;;  %v2797_v46 = vadd.f32 %v6375_v32, %v6211_v33  ;;  %v6498_v33 = vld [vmem:[#allocation3 + $0xb9] sm:$0xff] }
 0x2be   : > { %v3019_v35 = vpop.f32.mrf.mxu3  ;;  %v6465_v18 = vpop.f32.mrf.mxu1 }
 0x2bf   : > { %v3132_v40 = vpop.f32.mrf.mxu0  ;;  %v3020_v52 = vadd.f32 %v3019_v35, %v2907_v22 }
 0x2c1   : > { %v6476_v55 = vadd.f32 %v3132_v40, %v3020_v52  ;;  %2956 = vmatmul.f32.gmra.mxu2 %v6194_v58 }
 0x2c2   : > { %3244 = vmatmul.f32.gmra.mxu1 %v6471_v31  ;;  %3179 = vmatmul.f32.gmra.mxu0 %v2498_v63  ;;  %v2706_v63 = vld [vmem:[%s7558_s4 + $0x2d0] sm:$0xff] }
 0x2c3   : > { %7873 = vst [vmem:[#allocation51_spill] sm:$0xff] %v6476_v55  ;;  %3069 = vmatmul.f32.gmra.mxu3 %v2465_v4  ;;  %v6492_v55 = vld [vmem:[#allocation3 + $0x40] sm:$0xff]  ;;  %3334 = vmatpush.msrb.mxu2 %v2706_v63  ;;  %v6513_v63 = vld [vmem:[#allocation3 + $0x48] sm:$0xff] }
 0x2c4   : > { %v2909_v39 = vpop.f32.mrf.mxu2 }
 0x2c5   : > { %v2910_v22 = vadd.f32 %v2909_v39, %v2797_v46 }
 0x2c6   : > { %v3022_v35 = vpop.f32.mrf.mxu3  ;;  %v6487_v40 = vpop.f32.mrf.mxu1 }
 0x2c7   : > { %v3135_v58 = vpop.f32.mrf.mxu0  ;;  %v3023_v52 = vadd.f32 %v3022_v35, %v2910_v22 }
 0x2c9   : > { %v6495_v4 = vadd.f32 %v3135_v58, %v3023_v52  ;;  %2959 = vmatmul.f32.gmra.mxu2 %v6208_v19  ;;  %v6509_v19 = vld [vmem:[#allocation3 + $0xc1] sm:$0xff] }
 0x2ca   : > { %3247 = vmatmul.f32.gmra.mxu1 %v6492_v55  ;;  %3182 = vmatmul.f32.gmra.mxu0 %v6245_v24  ;;  %v2500_v24 = vmul.f32 %v7819_v8, %v6255_v47  ;;  %v2754_v47 = vld [vmem:[%s7558_s4 + $0x450] sm:$0xff] }
 0x2cb   : > { %7874 = vst [vmem:[#allocation62_spill] sm:$0xff] %v6495_v4  ;;  %3072 = vmatmul.f32.gmra.mxu3 %v6498_v33  ;;  %v7875_v4 = vld [vmem:[#allocation53_spill] sm:$0xff]  ;;  %3673 = vmatpush.msrb.mxu1 %v2754_v47  ;;  %v2806_v47 = vadd.f32 %v6375_v32, %v6253_v21 }
 0x2cc   : > { %v2912_v46 = vpop.f32.mrf.mxu2  ;;  %v2467_v49 = vmul.f32 %v7875_v4, %v6509_v19  ;;  %v6612_v4 = vld [vmem:[#allocation3 + $0x68] sm:$0xff] }
 0x2cd   : > { %v2913_v39 = vadd.f32 %v2912_v46, %v2800_v27  ;;  %v2738_v27 = vld [vmem:[%s7558_s4 + $0x3d0] sm:$0xff]  ;;  %v2803_v46 = vadd.f32 %v6375_v32, %v6239_v50  ;;  %v6540_v50 = vld [vmem:[#allocation3 + $0xc9] sm:$0xff] }
 0x2ce   : > { %v3025_v22 = vpop.f32.mrf.mxu3  ;;  %v6507_v35 = vpop.f32.mrf.mxu1  ;;  %3560 = vmatpush.msrb.mxu0 %v2738_v27  ;;  %v2721_v27 = vld [vmem:[%s7558_s4 + $0x348] sm:$0xff] }
 0x2cf   : > { %v3138_v58 = vpop.f32.mrf.mxu0  ;;  %v3026_v52 = vadd.f32 %v3025_v22, %v2913_v39  ;;  %3448 = vmatpush.msrb.mxu3 %v2721_v27 }
 0x2d1   : > { %v6518_v20 = vadd.f32 %v3138_v58, %v3026_v52  ;;  %2962 = vmatmul.f32.gmra.mxu2 %v6222_v7 }
 0x2d2   : > { %3250 = vmatmul.f32.gmra.mxu1 %v6513_v63  ;;  %3185 = vmatmul.f32.gmra.mxu0 %v2500_v24 }
 0x2d3   : > { %7876 = vst [vmem:[#allocation23_spill] sm:$0xff] %v6518_v20  ;;  %3075 = vmatmul.f32.gmra.mxu3 %v2467_v49  ;;  %v2705_v20 = vld [vmem:[%s7558_s4 + $0x2c8] sm:$0xff] }
 0x2d4   : > { %v2915_v39 = vpop.f32.mrf.mxu2  ;;  %3335 = vmatpush.msrb.mxu2 %v2705_v20 }
 0x2d5   : > { %v2916_v22 = vadd.f32 %v2915_v39, %v2803_v46 }
 0x2d6   : > { %v3028_v58 = vpop.f32.mrf.mxu3  ;;  %v6529_v52 = vpop.f32.mrf.mxu1  ;;  %3336 = vmatpush.msrb.mxu2 %v2704_v10  ;;  %v2719_v10 = vld [vmem:[%s7558_s4 + $0x338] sm:$0xff] }
 0x2d7   : > { %v3141_v7 = vpop.f32.mrf.mxu0  ;;  %v3029_v24 = vadd.f32 %v3028_v58, %v2916_v22 }
 0x2d9   : > { %v6537_v49 = vadd.f32 %v3141_v7, %v3029_v24  ;;  %2965 = vmatmul.f32.gmra.mxu2 %v6236_v62  ;;  %v6551_v62 = vld [vmem:[#allocation3 + $0xd1] sm:$0xff] }
 0x2da   : > { %3253 = vmatmul.f32.gmra.mxu1 %v6534_v54  ;;  %3188 = vmatmul.f32.gmra.mxu0 %v6273_v16  ;;  %v2502_v16 = vmul.f32 %v7846_v41, %v6283_v5  ;;  %v6555_v24 = vld [vmem:[#allocation3 + $0x58] sm:$0xff] }
 0x2db   : > { %7877 = vst [vmem:[#allocation29_spill] sm:$0xff] %v6537_v49  ;;  %3078 = vmatmul.f32.gmra.mxu3 %v6540_v50  ;;  %v7878_v49 = vld [vmem:[#allocation56_spill] sm:$0xff] }
 0x2dc   : > { %v2918_v46 = vpop.f32.mrf.mxu2  ;;  %v2469_v21 = vmul.f32 %v7878_v49, %v6551_v62  ;;  %v2753_v5 = vld [vmem:[%s7558_s4 + $0x448] sm:$0xff]  ;;  %v6605_v49 = vld [vmem:[#allocation3 + $0xe1] sm:$0xff] }
 0x2dd   : > { %v2919_v20 = vadd.f32 %v2918_v46, %v2806_v47  ;;  %v7880_v47 = vld [vmem:[#allocation48_spill] sm:$0xff]  ;;  %3674 = vmatpush.msrb.mxu1 %v2753_v5  ;;  %7886 = vst [vmem:[#allocation52_spill] sm:$0xff] %v6605_v49 }
 0x2de   : > { %v3031_v39 = vpop.f32.mrf.mxu3  ;;  %v6549_v22 = vpop.f32.mrf.mxu1  ;;  %v2737_v46 = vld [vmem:[%s7558_s4 + $0x3c8] sm:$0xff] }
 0x2df   : > { %v3144_v58 = vpop.f32.mrf.mxu0  ;;  %v3032_v7 = vadd.f32 %v3031_v39, %v2919_v20  ;;  %3561 = vmatpush.msrb.mxu0 %v2737_v46  ;;  %v7881_v20 = vld [vmem:[#allocation37_spill] sm:$0xff] }
 0x2e0   : > { %v2809_v39 = vadd.f32 %v6375_v32, %v7881_v20  ;;  %v6585_v5 = vld [vmem:[#allocation3 + $0xd9] sm:$0xff]  ;;  %v2703_v20 = vld [vmem:[%s7558_s4 + $0x2b8] sm:$0xff] }
 0x2e1   : > { %v6560_v27 = vadd.f32 %v3144_v58, %v3032_v7  ;;  %2968 = vmatmul.f32.gmra.mxu2 %v7880_v47  ;;  %7884 = vst [vmem:[#allocation26_spill] sm:$0xff] %v6585_v5 }
 0x2e2   : > { %3256 = vmatmul.f32.gmra.mxu1 %v6555_v24  ;;  %3191 = vmatmul.f32.gmra.mxu0 %v2502_v16 }
 0x2e3   : > { %7879 = vst [vmem:[#allocation24_spill] sm:$0xff] %v6560_v27  ;;  %3081 = vmatmul.f32.gmra.mxu3 %v2469_v21  ;;  %v2720_v21 = vld [vmem:[%s7558_s4 + $0x340] sm:$0xff]  ;;  %3337 = vmatpush.msrb.mxu2 %v2703_v20 }
 0x2e4   : > { %v2921_v28 = vpop.f32.mrf.mxu2  ;;  %3449 = vmatpush.msrb.mxu3 %v2720_v21  ;;  %v2701_v21 = vld [vmem:[%s7558_s4 + $0x2a8] sm:$0xff] }
 0x2e5   : > { %v2922_v58 = vadd.f32 %v2921_v28, %v2809_v39  ;;  %v7883_v28 = vld [vmem:[#allocation8_spill] sm:$0xff]  ;;  %v7885_v39 = vld [vmem:[#allocation9_spill] sm:$0xff] }
 0x2e6   : > { %v3034_v7 = vpop.f32.mrf.mxu3  ;;  %v6571_v27 = vpop.f32.mrf.mxu1  ;;  %3450 = vmatpush.msrb.mxu3 %v2719_v10  ;;  %v2717_v10 = vld [vmem:[%s7558_s4 + $0x328] sm:$0xff] }
 0x2e7   : > { %v3147_v16 = vpop.f32.mrf.mxu0  ;;  %v3035_v47 = vadd.f32 %v3034_v7, %v2922_v58  ;;  %v2812_v58 = vadd.f32 %v6375_v32, %v7885_v39 }
 0x2e9   : > { %v6582_v46 = vadd.f32 %v3147_v16, %v3035_v47  ;;  %2971 = vmatmul.f32.gmra.mxu2 %v7883_v28  ;;  %v2718_v16 = vld [vmem:[%s7558_s4 + $0x330] sm:$0xff] }
 0x2ea   : > { %3259 = vmatmul.f32.gmra.mxu1 %v6576_v29  ;;  %3194 = vmatmul.f32.gmra.mxu0 %v6301_v37  ;;  %v2702_v37 = vld [vmem:[%s7558_s4 + $0x2b0] sm:$0xff] }
 0x2eb   : > { %7882 = vst [vmem:[#allocation43_spill] sm:$0xff] %v6582_v46  ;;  %3084 = vmatmul.f32.gmra.mxu3 %v6585_v5  ;;  %3338 = vmatpush.msrb.mxu2 %v2702_v37  ;;  %v7887_v5 = vld [vmem:[#allocation12_spill] sm:$0xff]  ;;  %v2736_v37 = vld [vmem:[%s7558_s4 + $0x3c0] sm:$0xff] }
 0x2ec   : > { %v2924_v7 = vpop.f32.mrf.mxu2  ;;  %v2504_v41 = vmul.f32 %v7887_v5, %v6314_v15  ;;  %3451 = vmatpush.msrb.mxu3 %v2718_v16  ;;  %v2700_v15 = vld [vmem:[%s7558_s4 + $0x2a0] sm:$0xff]  ;;  %3562 = vmatpush.msrb.mxu0 %v2736_v37  ;;  %v2698_v37 = vld [vmem:[%s7558_s4 + $0x290] sm:$0xff] }
 0x2ed   : > { %v2925_v47 = vadd.f32 %v2924_v7, %v2812_v58  ;;  %3339 = vmatpush.msrb.mxu2 %v2701_v21  ;;  %v7888_v58 = vld [vmem:[#allocation58_spill] sm:$0xff]  ;;  %v2716_v21 = vld [vmem:[%s7558_s4 + $0x320] sm:$0xff] }
 0x2ee   : > { %v3037_v28 = vpop.f32.mrf.mxu3  ;;  %v2471_v7 = vmul.f32 %v7888_v58, %v6605_v49  ;;  %v2699_v58 = vld [vmem:[%s7558_s4 + $0x298] sm:$0xff]  ;;  %3452 = vmatpush.msrb.mxu3 %v2717_v10  ;;  %v6660_v49 = vld [vmem:[#allocation3 + $0x70] sm:$0xff] }
 0x2ef   : > { %v6603_v46 = vpop.f32.mrf.mxu1  ;;  %v3150_v39 = vpop.f32.mrf.mxu0  ;;  %v3038_v20 = vadd.f32 %v3037_v28, %v2925_v47  ;;  %v7890_v47 = vld [vmem:[#allocation55_spill] sm:$0xff]  ;;  %3340 = vmatpush.msrb.mxu2 %v2700_v15  ;;  %v2733_v15 = vld [vmem:[%s7558_s4 + $0x3a8] sm:$0xff] }
 0x2f0   : > { %v2752_v28 = vld [vmem:[%s7558_s4 + $0x440] sm:$0xff]  ;;  %3453 = vmatpush.msrb.mxu3 %v2716_v21 }
 0x2f1   : > { %v6626_v16 = vadd.f32 %v3150_v39, %v3038_v20  ;;  %2974 = vmatmul.f32.gmra.mxu2 %v7890_v47  ;;  %v2735_v39 = vld [vmem:[%s7558_s4 + $0x3b8] sm:$0xff]  ;;  %3675 = vmatpush.msrb.mxu1 %v2752_v28  ;;  %v2734_v47 = vld [vmem:[%s7558_s4 + $0x3b0] sm:$0xff]  ;;  %v2732_v21 = vld [vmem:[%s7558_s4 + $0x3a0] sm:$0xff] }
 0x2f2   : > { %3262 = vmatmul.f32.gmra.mxu1 %v6612_v4  ;;  %3197 = vmatmul.f32.gmra.mxu0 %v2504_v41  ;;  %v2815_v41 = vadd.f32 %v6375_v32, %v6295_v42 }
 0x2f3   : > { %7889 = vst [vmem:[#allocation45_spill] sm:$0xff] %v6626_v16  ;;  %3087 = vmatmul.f32.gmra.mxu3 %v2471_v7  ;;  %v2715_v7 = vld [vmem:[%s7558_s4 + $0x318] sm:$0xff]  ;;  %3563 = vmatpush.msrb.mxu0 %v2735_v39  ;;  %v2697_v39 = vld [vmem:[%s7558_s4 + $0x288] sm:$0xff] }
 0x2f4   : > { %v2927_v20 = vpop.f32.mrf.mxu2  ;;  %3341 = vmatpush.msrb.mxu2 %v2699_v58  ;;  %3454 = vmatpush.msrb.mxu3 %v2715_v7  ;;  %v2714_v58 = vld [vmem:[%s7558_s4 + $0x310] sm:$0xff]  ;;  %v2731_v7 = vld [vmem:[%s7558_s4 + $0x398] sm:$0xff] }
 0x2f5   : > { %v2928_v16 = vadd.f32 %v2927_v20, %v2815_v41  ;;  %3564 = vmatpush.msrb.mxu0 %v2734_v47  ;;  %v2696_v41 = vld [vmem:[%s7558_s4 + $0x280] sm:$0xff]  ;;  %v2713_v20 = vld [vmem:[%s7558_s4 + $0x308] sm:$0xff]  ;;  %v2730_v47 = vld [vmem:[%s7558_s4 + $0x390] sm:$0xff] }
 0x2f6   : > { %v3040_v5 = vpop.f32.mrf.mxu3  ;;  %3342 = vmatpush.msrb.mxu2 %v2698_v37  ;;  %3455 = vmatpush.msrb.mxu3 %v2714_v58  ;;  %v2712_v37 = vld [vmem:[%s7558_s4 + $0x300] sm:$0xff] }
 0x2f7   : > { %v6652_v42 = vpop.f32.mrf.mxu1  ;;  %v3153_v10 = vpop.f32.mrf.mxu0  ;;  %v3041_v28 = vadd.f32 %v3040_v5, %v2928_v16  ;;  %3565 = vmatpush.msrb.mxu0 %v2733_v15  ;;  %v6672_v16 = vld [vmem:[#allocation3 + $0xe9] sm:$0xff] }
 0x2f8   : > { %7892 = vst [vmem:[#allocation36_spill] sm:$0xff] %v6672_v16  ;;  %3343 = vmatpush.msrb.mxu2 %v2697_v39  ;;  %v6695_v39 = vld [vmem:[#allocation3 + $0xf1] sm:$0xff]  ;;  %3456 = vmatpush.msrb.mxu3 %v2713_v20 }
 0x2f9   : > { %v6669_v5 = vadd.f32 %v3153_v10, %v3041_v28  ;;  %2977 = vmatmul.f32.gmra.mxu2 %v6292_v51  ;;  %v2818_v51 = vadd.f32 %v6375_v32, %v6312_v11  ;;  %3566 = vmatpush.msrb.mxu0 %v2732_v21  ;;  %7893 = vst [vmem:[#allocation7_spill] sm:$0xff] %v6695_v39 }
 0x2fa   : > { %3265 = vmatmul.f32.gmra.mxu1 %v6660_v49  ;;  %3200 = vmatmul.f32.gmra.mxu0 %v6338_v53  ;;  %v2506_v21 = vmul.f32 %v7833_v61, %v6354_v45  ;;  %v2728_v45 = vld [vmem:[%s7558_s4 + $0x380] sm:$0xff]  ;;  %v7906_v61 = vld [vmem:[#allocation16_spill] sm:$0xff] }
 0x2fb   : > { %7891 = vst [vmem:[#allocation44_spill] sm:$0xff] %v6669_v5  ;;  %3090 = vmatmul.f32.gmra.mxu3 %v6672_v16  ;;  %3344 = vmatpush.msrb.mxu2 %v2696_v41  ;;  %v2729_v41 = vld [vmem:[%s7558_s4 + $0x388] sm:$0xff] }
 0x2fc   : > { %v2930_v53 = vpop.f32.mrf.mxu2  ;;  %3567 = vmatpush.msrb.mxu0 %v2731_v7  ;;  %3457 = vmatpush.msrb.mxu3 %v2712_v37  ;;  %v6702_v5 = vld [vmem:[#allocation3 + $0x78] sm:$0xff]  ;;  %v2751_v7 = vld [vmem:[%s7558_s4 + $0x438] sm:$0xff]  ;;  %v2821_v37 = vadd.f32 %v6375_v32, %v6335_v25  ;;  %v2824_v25 = vadd.f32 %v6375_v32, %v6352_v13  ;;  %v7900_v13 = vld [vmem:[#allocation19_spill] sm:$0xff] }
 0x2fd   : > { %v2931_v10 = vadd.f32 %v2930_v53, %v2818_v51  ;;  %v7894_v51 = vld [vmem:[#allocation59_spill] sm:$0xff]  ;;  %3676 = vmatpush.msrb.mxu1 %v2751_v7 }
 0x2fe   : > { %v3043_v15 = vpop.f32.mrf.mxu3  ;;  %3568 = vmatpush.msrb.mxu0 %v2730_v47  ;;  %v2473_v53 = vmul.f32 %v7894_v51, %v6695_v39 }
 0x2ff   : > { %v6693_v28 = vpop.f32.mrf.mxu1  ;;  %v3156_v11 = vpop.f32.mrf.mxu0  ;;  %v3044_v58 = vadd.f32 %v3043_v15, %v2931_v10 }
 0x300   : > { %3569 = vmatpush.msrb.mxu0 %v2729_v41  ;;  %v6726_v41 = vld [vmem:[#allocation3 + $0xf9] sm:$0xff] }
 0x301   : > { %v6707_v20 = vadd.f32 %v3156_v11, %v3044_v58  ;;  %2980 = vmatmul.f32.gmra.mxu2 %v6309_v12  ;;  %7897 = vst [vmem:[#allocation50_spill] sm:$0xff] %v6726_v41 }
 0x302   : > { %3268 = vmatmul.f32.gmra.mxu1 %v6702_v5  ;;  %3203 = vmatmul.f32.gmra.mxu0 %v2506_v21  ;;  %v6720_v21 = vld [vmem:[#allocation3 + $0x80] sm:$0xff] }
 0x303   : > { %7895 = vst [vmem:[#allocation40_spill] sm:$0xff] %v6707_v20  ;;  %3093 = vmatmul.f32.gmra.mxu3 %v2473_v53  ;;  %3570 = vmatpush.msrb.mxu0 %v2728_v45  ;;  %v6732_v45 = vld [vmem:[#allocation3 + $0x107] sm:$0xff] }
 0x304   : > { %v2933_v47 = vpop.f32.mrf.mxu2  ;;  %7898 = vst [vmem:[#allocation57_spill] sm:$0xff] %v6732_v45 }
 0x305   : > { %v2934_v10 = vadd.f32 %v2933_v47, %v2821_v37 }
 0x306   : > { %v3046_v15 = vpop.f32.mrf.mxu3 }
 0x307   : > { %v6718_v12 = vpop.f32.mrf.mxu1  ;;  %v3159_v11 = vpop.f32.mrf.mxu0  ;;  %v3047_v58 = vadd.f32 %v3046_v15, %v2934_v10  ;;  %v6736_v10 = vld [vmem:[#allocation3 + $0x101] sm:$0xff] }
 0x308   : > { %7899 = vst [vmem:[#allocation32_spill] sm:$0xff] %v6736_v10 }
 0x309   : > { %v6723_v20 = vadd.f32 %v3159_v11, %v3047_v58  ;;  %2983 = vmatmul.f32.gmra.mxu2 %v6332_v34  ;;  %v2508_v11 = vmul.f32 %v7834_v26, %v6732_v45  ;;  %v2475_v58 = vmul.f32 %v7900_v13, %v6736_v10  ;;  %v6759_v10 = vld [vmem:[#allocation3 + $0x10f] sm:$0xff] }
 0x30a   : > { %3271 = vmatmul.f32.gmra.mxu1 %v6720_v21  ;;  %3206 = vmatmul.f32.gmra.mxu0 %v6377_v17  ;;  %v6740_v17 = vld [vmem:[#allocation3 + $0x88] sm:$0xff]  ;;  %7903 = vst [vmem:[#allocation27_spill] sm:$0xff] %v6759_v10 }
 0x30b   : > { %7896 = vst [vmem:[#allocation30_spill] sm:$0xff] %v6723_v20  ;;  %3096 = vmatmul.f32.gmra.mxu3 %v6726_v41  ;;  %v4501_v41 = vld [vmem:[#allocation3 + $0x21] sm:$0xff] }
 0x30c   : > { %v2936_v53 = vpop.f32.mrf.mxu2  ;;  %v2515_v45 = vmul.f32 %v4501_v41, %v7906_v61 }
 0x30d   : > { %v2937_v7 = vadd.f32 %v2936_v53, %v2824_v25  ;;  %v2750_v25 = vld [vmem:[%s7558_s4 + $0x430] sm:$0xff]  ;;  %v2827_v53 = vadd.f32 %v6375_v32, %v6370_v1 }
 0x30e   : > { %v3049_v37 = vpop.f32.mrf.mxu3  ;;  %3677 = vmatpush.msrb.mxu1 %v2750_v25  ;;  %v4500_v1 = vld [vmem:[#allocation3 + $0x19] sm:$0xff]  ;;  %v2830_v25 = vadd.f32 %v6375_v32, %v6390_v56 }
 0x30f   : > { %v6734_v47 = vpop.f32.mrf.mxu1  ;;  %v3162_v15 = vpop.f32.mrf.mxu0  ;;  %v3050_v34 = vadd.f32 %v3049_v37, %v2937_v7  ;;  %v2749_v56 = vld [vmem:[%s7558_s4 + $0x428] sm:$0xff] }
 0x310   : > { %3678 = vmatpush.msrb.mxu1 %v2749_v56  ;;  %v6788_v56 = vld [vmem:[#allocation3 + $0x29] sm:$0xff] }
 0x311   : > { %v6745_v20 = vadd.f32 %v3162_v15, %v3050_v34  ;;  %2986 = vmatmul.f32.gmra.mxu2 %v6349_v3  ;;  %v4498_v34 = vld [vmem:[#allocation3 + $0x27] sm:$0xff] }
 0x312   : > { %3274 = vmatmul.f32.gmra.mxu1 %v6740_v17  ;;  %3209 = vmatmul.f32.gmra.mxu0 %v2508_v11  ;;  %v6756_v11 = vld [vmem:[#allocation3 + $0x90] sm:$0xff] }
 0x313   : > { %7901 = vst [vmem:[#allocation38_spill] sm:$0xff] %v6745_v20  ;;  %3099 = vmatmul.f32.gmra.mxu3 %v2475_v58  ;;  %v7902_v20 = vld [vmem:[#allocation15_spill] sm:$0xff] }
 0x314   : > { %v2939_v7 = vpop.f32.mrf.mxu2  ;;  %v2548_v3 = vmul.f32 %v4498_v34, %v7902_v20 }
 0x315   : > { %v2940_v37 = vadd.f32 %v2939_v7, %v2827_v53 }
 0x316   : > { %v3052_v26 = vpop.f32.mrf.mxu3 }
 0x317   : > { %v6753_v51 = vpop.f32.mrf.mxu1  ;;  %v3165_v13 = vpop.f32.mrf.mxu0  ;;  %v3053_v15 = vadd.f32 %v3052_v26, %v2940_v37 }
 0x319   : > { %v6761_v58 = vadd.f32 %v3165_v13, %v3053_v15  ;;  %3345 = vmatmul.f32.vlgmr.msrb.gmra.mxu2 %v4500_v1  ;;  %v6769_v13 = vld [vmem:[#allocation3 + $0x98] sm:$0xff]  ;;  %v2833_v1 = vadd.f32 %v6375_v32, %v6406_v9  ;;  %v2836_v9 = vadd.f32 %v6375_v32, %v6423_v44  ;;  %v2748_v44 = vld [vmem:[%s7558_s4 + $0x420] sm:$0xff] }
 0x31a   : > { %3277 = vmatmul.f32.gmra.mxu1 %v6756_v11  ;;  %3212 = vmatmul.f32.gmra.mxu0 %v6759_v10 }
 0x31b   : > { %7904 = vst [vmem:[#allocation33_spill] sm:$0xff] %v6761_v58  ;;  %3458 = vmatmul.f32.vlgmr.msrb.gmra.mxu3 %v2548_v3  ;;  %v4503_v3 = vld [vmem:[#allocation3 + $0x2f] sm:$0xff]  ;;  %3679 = vmatpush.msrb.mxu1 %v2748_v44  ;;  %v6819_v44 = vld [vmem:[#allocation3 + $0x39] sm:$0xff] }
 0x31c   : > { %v2942_v26 = vpop.f32.mrf.mxu2 }
 0x31d   : > { %v2943_v53 = vadd.f32 %v2942_v26, %v2830_v25 }
 0x31e   : > { %v3055_v7 = vpop.f32.mrf.mxu3 }
 0x31f   : > { %v6766_v20 = vpop.f32.mrf.mxu1  ;;  %v3168_v37 = vpop.f32.mrf.mxu0  ;;  %v3056_v34 = vadd.f32 %v3055_v7, %v2943_v53 }
 0x320   : > { %7905 = vst [vmem:[#allocation42_spill] sm:$0xff] %v6766_v20 }
 0x321   : > { %v6772_v15 = vadd.f32 %v3168_v37, %v3056_v34  ;;  %3348 = vmatmul.f32.gmra.mxu2 %v2515_v45  ;;  %v6782_v45 = vld [vmem:[#allocation3 + $0xa0] sm:$0xff]  ;;  %v7909_v34 = vld [vmem:[#allocation20_spill] sm:$0xff] }
 0x322   : > { %3280 = vmatmul.f32.gmra.mxu1 %v6769_v13  ;;  %3571 = vmatmul.f32.vlgmr.msrb.gmra.mxu0 %v6429_v6  ;;  %v4505_v6 = vld [vmem:[#allocation3 + $0x37] sm:$0xff] }
 0x323   : > { %7907 = vst [vmem:[#allocation46_spill] sm:$0xff] %v6772_v15  ;;  %3461 = vmatmul.f32.gmra.mxu3 %v4503_v3  ;;  %v2550_v15 = vmul.f32 %v4505_v6, %v7909_v34  ;;  %v6796_v6 = vld [vmem:[#allocation3 + $0x31] sm:$0xff]  ;;  %v6800_v34 = vld [vmem:[#allocation3 + $0xa8] sm:$0xff] }
 0x324   : > { %v2945_v41 = vpop.f32.mrf.mxu2 }
 0x325   : > { %v2946_v25 = vadd.f32 %v2945_v41, %v2833_v1 }
 0x326   : > { %v3058_v26 = vpop.f32.mrf.mxu3 }
 0x327   : > { %v6780_v53 = vpop.f32.mrf.mxu1  ;;  %v3171_v7 = vpop.f32.mrf.mxu0  ;;  %v3059_v37 = vadd.f32 %v3058_v26, %v2946_v25 }
 0x328   : > { %7908 = vst [vmem:[#allocation48_spill] sm:$0xff] %v6780_v53 }
 0x329   : > { %v6786_v58 = vadd.f32 %v3171_v7, %v3059_v37  ;;  %3351 = vmatmul.f32.gmra.mxu2 %v6788_v56  ;;  %v7912_v7 = vld [vmem:[#allocation17_spill] sm:$0xff] }
 0x32a   : > { %3283 = vmatmul.f32.gmra.mxu1 %v6782_v45  ;;  %3574 = vmatmul.f32.gmra.mxu0 %v6450_v2  ;;  %v2517_v37 = vmul.f32 %v6796_v6, %v7912_v7 }
 0x32b   : > { %7910 = vst [vmem:[#allocation37_spill] sm:$0xff] %v6786_v58  ;;  %3464 = vmatmul.f32.gmra.mxu3 %v2550_v15  ;;  %v4509_v15 = vld [vmem:[#allocation3 + $0x3f] sm:$0xff] }
 0x32c   : > { %v2948_v3 = vpop.f32.mrf.mxu2 }
 0x32d   : > { %v2949_v1 = vadd.f32 %v2948_v3, %v2836_v9  ;;  %v2839_v9 = vadd.f32 %v6375_v32, %v6445_v57  ;;  %v2842_v57 = vadd.f32 %v6375_v32, %v6465_v18  ;;  %v2747_v18 = vld [vmem:[%s7558_s4 + $0x418] sm:$0xff] }
 0x32e   : > { %v3061_v41 = vpop.f32.mrf.mxu3  ;;  %3680 = vmatpush.msrb.mxu1 %v2747_v18  ;;  %v6850_v18 = vld [vmem:[#allocation3 + $0x49] sm:$0xff] }
 0x32f   : > { %v6794_v25 = vpop.f32.mrf.mxu1  ;;  %v3174_v26 = vpop.f32.mrf.mxu0  ;;  %v3062_v53 = vadd.f32 %v3061_v41, %v2949_v1 }
 0x330   : > { %7911 = vst [vmem:[#allocation8_spill] sm:$0xff] %v6794_v25 }
 0x331   : > { %v6803_v2 = vadd.f32 %v3174_v26, %v3062_v53  ;;  %3354 = vmatmul.f32.gmra.mxu2 %v2517_v37  ;;  %v6813_v37 = vld [vmem:[#allocation3 + $0xb0] sm:$0xff] }
 0x332   : > { %3286 = vmatmul.f32.gmra.mxu1 %v6800_v34  ;;  %3577 = vmatmul.f32.gmra.mxu0 %v6471_v31  ;;  %v4511_v31 = vld [vmem:[#allocation3 + $0x47] sm:$0xff] }
 0x333   : > { %7913 = vst [vmem:[#allocation9_spill] sm:$0xff] %v6803_v2  ;;  %3467 = vmatmul.f32.gmra.mxu3 %v4509_v15  ;;  %v7915_v2 = vld [vmem:[#allocation21_spill] sm:$0xff] }
 0x334   : > { %v2951_v3 = vpop.f32.mrf.mxu2  ;;  %v2552_v25 = vmul.f32 %v4511_v31, %v7915_v2  ;;  %v6827_v2 = vld [vmem:[#allocation3 + $0x41] sm:$0xff]  ;;  %v6831_v31 = vld [vmem:[#allocation3 + $0xb8] sm:$0xff] }
 0x335   : > { %v2952_v1 = vadd.f32 %v2951_v3, %v2839_v9 }
 0x336   : > { %v3064_v41 = vpop.f32.mrf.mxu3 }
 0x337   : > { %v6811_v58 = vpop.f32.mrf.mxu1  ;;  %v3177_v53 = vpop.f32.mrf.mxu0  ;;  %v3065_v26 = vadd.f32 %v3064_v41, %v2952_v1 }
 0x338   : > { %7914 = vst [vmem:[#allocation55_spill] sm:$0xff] %v6811_v58 }
 0x339   : > { %v6817_v20 = vadd.f32 %v3177_v53, %v3065_v26  ;;  %3357 = vmatmul.f32.gmra.mxu2 %v6819_v44  ;;  %v7918_v53 = vld [vmem:[#allocation18_spill] sm:$0xff] }
 0x33a   : > { %3289 = vmatmul.f32.gmra.mxu1 %v6813_v37  ;;  %3580 = vmatmul.f32.gmra.mxu0 %v6492_v55  ;;  %v2519_v26 = vmul.f32 %v6827_v2, %v7918_v53 }
 0x33b   : > { %7916 = vst [vmem:[#allocation15_spill] sm:$0xff] %v6817_v20  ;;  %3470 = vmatmul.f32.gmra.mxu3 %v2552_v25  ;;  %v4515_v25 = vld [vmem:[#allocation3 + $0x4f] sm:$0xff] }
 0x33c   : > { %v2954_v15 = vpop.f32.mrf.mxu2 }
 0x33d   : > { %v2955_v9 = vadd.f32 %v2954_v15, %v2842_v57  ;;  %v2845_v57 = vadd.f32 %v6375_v32, %v6487_v40  ;;  %v2848_v40 = vadd.f32 %v6375_v32, %v6507_v35  ;;  %v2746_v35 = vld [vmem:[%s7558_s4 + $0x410] sm:$0xff] }
 0x33e   : > { %v3067_v3 = vpop.f32.mrf.mxu3  ;;  %3681 = vmatpush.msrb.mxu1 %v2746_v35  ;;  %v6881_v35 = vld [vmem:[#allocation3 + $0x59] sm:$0xff] }
 0x33f   : > { %v6825_v1 = vpop.f32.mrf.mxu1  ;;  %v3180_v41 = vpop.f32.mrf.mxu0  ;;  %v3068_v58 = vadd.f32 %v3067_v3, %v2955_v9 }
 0x340   : > { %7917 = vst [vmem:[#allocation16_spill] sm:$0xff] %v6825_v1 }
 0x341   : > { %v6834_v55 = vadd.f32 %v3180_v41, %v3068_v58  ;;  %3360 = vmatmul.f32.gmra.mxu2 %v2519_v26  ;;  %v6844_v26 = vld [vmem:[#allocation3 + $0xc0] sm:$0xff] }
 0x342   : > { %3292 = vmatmul.f32.gmra.mxu1 %v6831_v31  ;;  %3583 = vmatmul.f32.gmra.mxu0 %v6513_v63  ;;  %v4517_v63 = vld [vmem:[#allocation3 + $0x57] sm:$0xff] }
 0x343   : > { %7919 = vst [vmem:[#allocation20_spill] sm:$0xff] %v6834_v55  ;;  %3473 = vmatmul.f32.gmra.mxu3 %v4515_v25  ;;  %v7921_v55 = vld [vmem:[#allocation22_spill] sm:$0xff] }
 0x344   : > { %v2957_v15 = vpop.f32.mrf.mxu2  ;;  %v2554_v1 = vmul.f32 %v4517_v63, %v7921_v55  ;;  %v6858_v55 = vld [vmem:[#allocation3 + $0x51] sm:$0xff]  ;;  %v6862_v63 = vld [vmem:[#allocation3 + $0xc8] sm:$0xff] }
 0x345   : > { %v2958_v9 = vadd.f32 %v2957_v15, %v2845_v57 }
 0x346   : > { %v3070_v3 = vpop.f32.mrf.mxu3 }
 0x347   : > { %v6842_v20 = vpop.f32.mrf.mxu1  ;;  %v3183_v58 = vpop.f32.mrf.mxu0  ;;  %v3071_v41 = vadd.f32 %v3070_v3, %v2958_v9 }
 0x348   : > { %7920 = vst [vmem:[#allocation17_spill] sm:$0xff] %v6842_v20 }
 0x349   : > { %v6848_v10 = vadd.f32 %v3183_v58, %v3071_v41  ;;  %3363 = vmatmul.f32.gmra.mxu2 %v6850_v18  ;;  %v7924_v58 = vld [vmem:[#allocation28_spill] sm:$0xff] }
 0x34a   : > { %3295 = vmatmul.f32.gmra.mxu1 %v6844_v26  ;;  %3586 = vmatmul.f32.gmra.mxu0 %v6534_v54  ;;  %v2521_v41 = vmul.f32 %v6858_v55, %v7924_v58 }
 0x34b   : > { %7922 = vst [vmem:[#allocation21_spill] sm:$0xff] %v6848_v10  ;;  %3476 = vmatmul.f32.gmra.mxu3 %v2554_v1  ;;  %v4521_v1 = vld [vmem:[#allocation3 + $0x5f] sm:$0xff] }
 0x34c   : > { %v2960_v25 = vpop.f32.mrf.mxu2 }
 0x34d   : > { %v2961_v57 = vadd.f32 %v2960_v25, %v2848_v40  ;;  %v2851_v40 = vadd.f32 %v6375_v32, %v6529_v52  ;;  %v2854_v52 = vadd.f32 %v6375_v32, %v6549_v22  ;;  %v2745_v22 = vld [vmem:[%s7558_s4 + $0x408] sm:$0xff] }
 0x34e   : > { %v3073_v15 = vpop.f32.mrf.mxu3  ;;  %3682 = vmatpush.msrb.mxu1 %v2745_v22  ;;  %v6912_v22 = vld [vmem:[#allocation3 + $0x69] sm:$0xff] }
 0x34f   : > { %v6856_v9 = vpop.f32.mrf.mxu1  ;;  %v3186_v3 = vpop.f32.mrf.mxu0  ;;  %v3074_v20 = vadd.f32 %v3073_v15, %v2961_v57 }
 0x350   : > { %7923 = vst [vmem:[#allocation18_spill] sm:$0xff] %v6856_v9 }
 0x351   : > { %v6865_v54 = vadd.f32 %v3186_v3, %v3074_v20  ;;  %3366 = vmatmul.f32.gmra.mxu2 %v2521_v41  ;;  %v6875_v41 = vld [vmem:[#allocation3 + $0xd0] sm:$0xff] }
 0x352   : > { %3298 = vmatmul.f32.gmra.mxu1 %v6862_v63  ;;  %3589 = vmatmul.f32.gmra.mxu0 %v6555_v24  ;;  %v4523_v24 = vld [vmem:[#allocation3 + $0x67] sm:$0xff] }
 0x353   : > { %7925 = vst [vmem:[#allocation22_spill] sm:$0xff] %v6865_v54  ;;  %3479 = vmatmul.f32.gmra.mxu3 %v4521_v1  ;;  %v7927_v54 = vld [vmem:[#allocation34_spill] sm:$0xff] }
 0x354   : > { %v2963_v25 = vpop.f32.mrf.mxu2  ;;  %v2556_v9 = vmul.f32 %v4523_v24, %v7927_v54  ;;  %v6889_v54 = vld [vmem:[#allocation3 + $0x61] sm:$0xff]  ;;  %v6893_v24 = vld [vmem:[#allocation3 + $0xd8] sm:$0xff] }
 0x355   : > { %v2964_v57 = vadd.f32 %v2963_v25, %v2851_v40 }
 0x356   : > { %v3076_v15 = vpop.f32.mrf.mxu3 }
 0x357   : > { %v6873_v10 = vpop.f32.mrf.mxu1  ;;  %v3189_v20 = vpop.f32.mrf.mxu0  ;;  %v3077_v3 = vadd.f32 %v3076_v15, %v2964_v57 }
 0x358   : > { %7926 = vst [vmem:[#allocation28_spill] sm:$0xff] %v6873_v10 }
 0x359   : > { %v6879_v39 = vadd.f32 %v3189_v20, %v3077_v3  ;;  %3369 = vmatmul.f32.gmra.mxu2 %v6881_v35  ;;  %v7930_v20 = vld [vmem:[#allocation25_spill] sm:$0xff] }
 0x35a   : > { %3301 = vmatmul.f32.gmra.mxu1 %v6875_v41  ;;  %3592 = vmatmul.f32.gmra.mxu0 %v6576_v29  ;;  %v2523_v3 = vmul.f32 %v6889_v54, %v7930_v20 }
 0x35b   : > { %7928 = vst [vmem:[#allocation34_spill] sm:$0xff] %v6879_v39  ;;  %3482 = vmatmul.f32.gmra.mxu3 %v2556_v9  ;;  %v4527_v9 = vld [vmem:[#allocation3 + $0x6f] sm:$0xff] }
 0x35c   : > { %v2966_v1 = vpop.f32.mrf.mxu2 }
 0x35d   : > { %v2967_v40 = vadd.f32 %v2966_v1, %v2854_v52  ;;  %v2857_v52 = vadd.f32 %v6375_v32, %v6571_v27  ;;  %v2860_v27 = vadd.f32 %v6375_v32, %v6603_v46  ;;  %v2744_v46 = vld [vmem:[%s7558_s4 + $0x400] sm:$0xff] }
 0x35e   : > { %v3079_v25 = vpop.f32.mrf.mxu3  ;;  %3683 = vmatpush.msrb.mxu1 %v2744_v46  ;;  %v6943_v46 = vld [vmem:[#allocation3 + $0x79] sm:$0xff] }
 0x35f   : > { %v6887_v57 = vpop.f32.mrf.mxu1  ;;  %v3192_v15 = vpop.f32.mrf.mxu0  ;;  %v3080_v10 = vadd.f32 %v3079_v25, %v2967_v40 }
 0x360   : > { %7929 = vst [vmem:[#allocation63_spill] sm:$0xff] %v6887_v57 }
 0x361   : > { %v6896_v29 = vadd.f32 %v3192_v15, %v3080_v10  ;;  %3372 = vmatmul.f32.gmra.mxu2 %v2523_v3  ;;  %v6906_v3 = vld [vmem:[#allocation3 + $0xe0] sm:$0xff] }
 0x362   : > { %3304 = vmatmul.f32.gmra.mxu1 %v6893_v24  ;;  %3595 = vmatmul.f32.gmra.mxu0 %v6612_v4  ;;  %v4529_v4 = vld [vmem:[#allocation3 + $0x77] sm:$0xff] }
 0x363   : > { %7931 = vst [vmem:[#allocation25_spill] sm:$0xff] %v6896_v29  ;;  %3485 = vmatmul.f32.gmra.mxu3 %v4527_v9  ;;  %v7933_v29 = vld [vmem:[#allocation31_spill] sm:$0xff] }
 0x364   : > { %v2969_v1 = vpop.f32.mrf.mxu2  ;;  %v2558_v57 = vmul.f32 %v4529_v4, %v7933_v29  ;;  %v6920_v29 = vld [vmem:[#allocation3 + $0x71] sm:$0xff]  ;;  %v6924_v4 = vld [vmem:[#allocation3 + $0xe8] sm:$0xff] }
 0x365   : > { %v2970_v40 = vadd.f32 %v2969_v1, %v2857_v52 }
 0x366   : > { %v3082_v25 = vpop.f32.mrf.mxu3 }
 0x367   : > { %v6904_v39 = vpop.f32.mrf.mxu1  ;;  %v3195_v10 = vpop.f32.mrf.mxu0  ;;  %v3083_v15 = vadd.f32 %v3082_v25, %v2970_v40 }
 0x368   : > { %7932 = vst [vmem:[#allocation64_spill] sm:$0xff] %v6904_v39 }
 0x369   : > { %v6910_v16 = vadd.f32 %v3195_v10, %v3083_v15  ;;  %3375 = vmatmul.f32.gmra.mxu2 %v6912_v22  ;;  %v7936_v10 = vld [vmem:[#allocation35_spill] sm:$0xff] }
 0x36a   : > { %3307 = vmatmul.f32.gmra.mxu1 %v6906_v3  ;;  %3598 = vmatmul.f32.gmra.mxu0 %v6660_v49  ;;  %v2525_v15 = vmul.f32 %v6920_v29, %v7936_v10 }
 0x36b   : > { %7934 = vst [vmem:[#allocation31_spill] sm:$0xff] %v6910_v16  ;;  %3488 = vmatmul.f32.gmra.mxu3 %v2558_v57  ;;  %v4533_v57 = vld [vmem:[#allocation3 + $0x7f] sm:$0xff] }
 0x36c   : > { %v2972_v9 = vpop.f32.mrf.mxu2 }
 0x36d   : > { %v2973_v52 = vadd.f32 %v2972_v9, %v2860_v27  ;;  %v2863_v27 = vadd.f32 %v6375_v32, %v6652_v42  ;;  %v2866_v42 = vadd.f32 %v6375_v32, %v6693_v28  ;;  %v4539_v32 = vld [vmem:[#allocation3 + $0x8f] sm:$0xff] }
 0x36e   : > { %v3085_v1 = vpop.f32.mrf.mxu3  ;;  %v4540_v28 = vld [vmem:[%s7559_s5] ss:$0 sm:$0xff] }
 0x36f   : > { %v6918_v40 = vpop.f32.mrf.mxu1  ;;  %v3198_v25 = vpop.f32.mrf.mxu0  ;;  %v3086_v39 = vadd.f32 %v3085_v1, %v2973_v52 }
 0x370   : > { %7935 = vst [vmem:[#allocation65_spill] sm:$0xff] %v6918_v40 }
 0x371   : > { %v6927_v49 = vadd.f32 %v3198_v25, %v3086_v39  ;;  %3378 = vmatmul.f32.gmra.mxu2 %v2525_v15  ;;  %v6937_v15 = vld [vmem:[#allocation3 + $0xf0] sm:$0xff] }
 0x372   : > { %3310 = vmatmul.f32.gmra.mxu1 %v6924_v4  ;;  %3601 = vmatmul.f32.gmra.mxu0 %v6702_v5  ;;  %v4535_v5 = vld [vmem:[#allocation3 + $0x87] sm:$0xff] }
 0x373   : > { %7937 = vst [vmem:[#allocation66_spill] sm:$0xff] %v6927_v49  ;;  %3491 = vmatmul.f32.gmra.mxu3 %v4533_v57  ;;  %v7939_v49 = vld [vmem:[#allocation39_spill] sm:$0xff] }
 0x374   : > { %v2975_v9 = vpop.f32.mrf.mxu2  ;;  %v2560_v40 = vmul.f32 %v4535_v5, %v7939_v49  ;;  %v6951_v49 = vld [vmem:[#allocation3 + $0x81] sm:$0xff]  ;;  %v6955_v5 = vld [vmem:[#allocation3 + $0xf8] sm:$0xff] }
 0x375   : > { %v2976_v52 = vadd.f32 %v2975_v9, %v2863_v27 }
 0x376   : > { %v3088_v1 = vpop.f32.mrf.mxu3 }
 0x377   : > { %v6935_v16 = vpop.f32.mrf.mxu1  ;;  %v3201_v39 = vpop.f32.mrf.mxu0  ;;  %v3089_v25 = vadd.f32 %v3088_v1, %v2976_v52 }
 0x378   : > { %7938 = vst [vmem:[#allocation67_spill] sm:$0xff] %v6935_v16 }
 0x379   : > { %v6941_v10 = vadd.f32 %v3201_v39, %v3089_v25  ;;  %3381 = vmatmul.f32.gmra.mxu2 %v6943_v46  ;;  %v7942_v39 = vld [vmem:[#allocation49_spill] sm:$0xff] }
 0x37a   : > { %3313 = vmatmul.f32.gmra.mxu1 %v6937_v15  ;;  %3604 = vmatmul.f32.gmra.mxu0 %v6720_v21  ;;  %v2527_v25 = vmul.f32 %v6951_v49, %v7942_v39 }
 0x37b   : > { %7940 = vst [vmem:[#allocation39_spill] sm:$0xff] %v6941_v10  ;;  %3494 = vmatmul.f32.gmra.mxu3 %v2560_v40  ;;  %v2869_v40 = vadd.f32 %v4540_v28, %v6718_v12  ;;  %v2872_v12 = vadd.f32 %v4540_v28, %v6734_v47  ;;  %v4545_v47 = vld [vmem:[#allocation3 + $0x9f] sm:$0xff] }
 0x37c   : > { %v2978_v57 = vpop.f32.mrf.mxu2 }
 0x37d   : > { %v2979_v27 = vadd.f32 %v2978_v57, %v2866_v42 }
 0x37e   : > { %v3091_v9 = vpop.f32.mrf.mxu3 }
 0x37f   : > { %v6949_v52 = vpop.f32.mrf.mxu1  ;;  %v3204_v1 = vpop.f32.mrf.mxu0  ;;  %v3092_v16 = vadd.f32 %v3091_v9, %v2979_v27 }
 0x380   : > { %7941 = vst [vmem:[#allocation68_spill] sm:$0xff] %v6949_v52 }
 0x381   : > { %v6958_v21 = vadd.f32 %v3204_v1, %v3092_v16  ;;  %3384 = vmatmul.f32.gmra.mxu2 %v2527_v25  ;;  %v6967_v16 = vld [vmem:[#allocation3 + $0x100] sm:$0xff]  ;;  %v7946_v1 = vld [vmem:[#allocation54_spill] sm:$0xff] }
 0x382   : > { %3316 = vmatmul.f32.gmra.mxu1 %v6955_v5  ;;  %3607 = vmatmul.f32.gmra.mxu0 %v6740_v17  ;;  %7945 = vst [vmem:[#allocation71_spill] sm:$0xff] %v6967_v16  ;;  %v4542_v17 = vld [vmem:[#allocation3 + $0x97] sm:$0xff] }
 0x383   : > { %7943 = vst [vmem:[#allocation69_spill] sm:$0xff] %v6958_v21  ;;  %3497 = vmatmul.f32.gmra.mxu3 %v4539_v32  ;;  %v2562_v25 = vmul.f32 %v4542_v17, %v7946_v1  ;;  %v6973_v21 = vld [vmem:[#allocation3 + $0x89] sm:$0xff]  ;;  %v2875_v1 = vadd.f32 %v4540_v28, %v6753_v51 }
 0x384   : > { %v2981_v42 = vpop.f32.mrf.mxu2  ;;  %v4547_v28 = vld [vmem:[#allocation3 + $0xaf] sm:$0xff] }
 0x385   : > { %v2982_v57 = vadd.f32 %v2981_v42, %v2869_v40 }
 0x386   : > { %v3094_v27 = vpop.f32.mrf.mxu3 }
 0x387   : > { %v6965_v9 = vpop.f32.mrf.mxu1  ;;  %v3207_v10 = vpop.f32.mrf.mxu0  ;;  %v3095_v52 = vadd.f32 %v3094_v27, %v2982_v57 }
 0x388   : > { %7944 = vst [vmem:[#allocation70_spill] sm:$0xff] %v6965_v9 }
 0x389   : > { %v6971_v32 = vadd.f32 %v3207_v10, %v3095_v52  ;;  %3387 = vmatmul.f32.gmra.mxu2 %v6973_v21  ;;  %v6982_v10 = vld [vmem:[#allocation3 + $0x91] sm:$0xff] }
 0x38a   : > { %3319 = vmatmul.f32.gmra.mxu1 %v6967_v16  ;;  %3610 = vmatmul.f32.gmra.mxu0 %v6756_v11  ;;  %v6980_v16 = vld [vmem:[#allocation3 + $0x108] sm:$0xff]  ;;  %v7949_v52 = vld [vmem:[#allocation60_spill] sm:$0xff] }
 0x38b   : > { %7947 = vst [vmem:[#allocation54_spill] sm:$0xff] %v6971_v32  ;;  %3500 = vmatmul.f32.gmra.mxu3 %v2562_v25  ;;  %v2529_v17 = vmul.f32 %v6982_v10, %v7949_v52  ;;  %v6993_v32 = vld [vmem:[#allocation3 + $0x110] sm:$0xff] }
 0x38c   : > { %v2984_v40 = vpop.f32.mrf.mxu2 }
 0x38d   : > { %v2985_v42 = vadd.f32 %v2984_v40, %v2872_v12 }
 0x38e   : > { %v3097_v57 = vpop.f32.mrf.mxu3 }
 0x38f   : > { %v6978_v27 = vpop.f32.mrf.mxu1  ;;  %v3210_v9 = vpop.f32.mrf.mxu0  ;;  %v3098_v39 = vadd.f32 %v3097_v57, %v2985_v42 }
 0x390   : > { %7948 = vst [vmem:[#allocation72_spill] sm:$0xff] %v6978_v27 }
 0x391   : > { %v6987_v11 = vadd.f32 %v3210_v9, %v3098_v39  ;;  %3390 = vmatmul.f32.gmra.mxu2 %v2529_v17  ;;  %v4546_v39 = vld [vmem:[#allocation3 + $0xa7] sm:$0xff] }
 0x392   : > { %3322 = vmatmul.f32.gmra.mxu1 %v6980_v16  ;;  %3613 = vmatmul.f32.gmra.mxu0 %v6769_v13  ;;  %v2564_v9 = vmul.f32 %v4546_v39, %v7807_v48  ;;  %v2531_v13 = vmul.f32 %v7866_v43, %v6425_v38  ;;  %v7956_v39 = vld [vmem:[#allocation56_spill] sm:$0xff] }
 0x393   : > { %7950 = vst [vmem:[#allocation60_spill] sm:$0xff] %v6987_v11  ;;  %3503 = vmatmul.f32.gmra.mxu3 %v4545_v47  ;;  %v2591_v47 = vmul.f32 %v6889_v54, %v7924_v58  ;;  %v4555_v58 = vld [vmem:[#allocation3 + $0xef] sm:$0xff]  ;;  %v7978_v11 = vld [vmem:[#allocation48_spill] sm:$0xff] }
 0x394   : > { %v2987_v25 = vpop.f32.mrf.mxu2 }
 0x395   : > { %v2988_v12 = vadd.f32 %v2987_v25, %v2875_v1  ;;  %v7953_v1 = vld [vmem:[#allocation11_spill] sm:$0xff]  ;;  %v7954_v25 = vld [vmem:[#allocation26_spill] sm:$0xff] }
 0x396   : > { %v3100_v42 = vpop.f32.mrf.mxu3 }
 0x397   : > { %v6991_v40 = vpop.f32.mrf.mxu1  ;;  %v3101_v57 = vadd.f32 %v3100_v42, %v2988_v12  ;;  %v3213_v27 = vpop.f32.mrf.mxu0 }
 0x399   : > { %v6997_v17 = vadd.f32 %v3213_v27, %v3101_v57  ;;  %3393 = vmatmul.f32.gmra.mxu2 %v6414_v23  ;;  %v2585_v23 = vmul.f32 %v6796_v6, %v7906_v61  ;;  %v4549_v61 = vld [vmem:[#allocation3 + $0xbf] sm:$0xff] }
 0x39a   : > { %3325 = vmatmul.f32.gmra.mxu1 %v6993_v32  ;;  %3616 = vmatmul.f32.gmra.mxu0 %v6782_v45  ;;  %v4548_v45 = vld [vmem:[#allocation3 + $0xb7] sm:$0xff] }
 0x39b   : > { %7951 = vst [vmem:[#allocation73_spill] sm:$0xff] %v6997_v17  ;;  %3506 = vmatmul.f32.gmra.mxu3 %v2564_v9  ;;  %v2566_v27 = vmul.f32 %v4548_v45, %v7812_v14  ;;  %v2587_v14 = vmul.f32 %v6827_v2, %v7912_v7  ;;  %v4551_v7 = vld [vmem:[#allocation3 + $0xcf] sm:$0xff]  ;;  %v7955_v57 = vld [vmem:[#allocation52_spill] sm:$0xff] }
 0x39c   : > { %v2539_v9 = vmul.f32 %v7956_v39, %v7955_v57  ;;  %v7957_v45 = vld [vmem:[#allocation12_spill] sm:$0xff]  ;;  %v7967_v57 = vld [vmem:[#allocation59_spill] sm:$0xff] }
 0x39f   : > { %v7001_v51 = vpop.f32.mrf.mxu1 }
 0x3a1   : > { %3396 = vmatmul.f32.gmra.mxu2 %v2531_v13 }
 0x3a2   : > { %3684 = vmatmul.f32.vlgmr.msrb.gmra.mxu1 %v6788_v56  ;;  %3619 = vmatmul.f32.gmra.mxu0 %v6800_v34  ;;  %v2533_v56 = vmul.f32 %v7869_v30, %v6467_v0 }
 0x3a3   : > { %3509 = vmatmul.f32.gmra.mxu3 %v4547_v28 }
 0x3a7   : > { %v7007_v48 = vpop.f32.mrf.mxu1 }
 0x3a9   : > { %3399 = vmatmul.f32.gmra.mxu2 %v6456_v59  ;;  %v4550_v59 = vld [vmem:[#allocation3 + $0xc7] sm:$0xff] }
 0x3aa   : > { %3687 = vmatmul.f32.gmra.mxu1 %v2585_v23  ;;  %3622 = vmatmul.f32.gmra.mxu0 %v6813_v37  ;;  %v2568_v34 = vmul.f32 %v4550_v59, %v7816_v60  ;;  %v2535_v37 = vmul.f32 %v7872_v36, %v6509_v19  ;;  %v2589_v60 = vmul.f32 %v6858_v55, %v7918_v53  ;;  %v7040_v19 = vpop.f32.mrf.mxu2  ;;  %v4556_v23 = vld [vmem:[#allocation3 + $0xf7] sm:$0xff]  ;;  %v7960_v59 = vld [vmem:[#allocation58_spill] sm:$0xff] }
 0x3ab   : > { %3512 = vmatmul.f32.gmra.mxu3 %v2566_v27  ;;  %v2574_v27 = vmul.f32 %v4556_v23, %v7957_v45  ;;  %v2546_v23 = vld [vmem:[#allocation3 + $0x117] sm:$0xff]  ;;  %v7970_v45 = vld [vmem:[#allocation49_spill] sm:$0xff] }
 0x3af   : > { %v7014_v38 = vpop.f32.mrf.mxu1 }
 0x3b1   : > { %3402 = vmatmul.f32.gmra.mxu2 %v2533_v56 }
 0x3b2   : > { %3690 = vmatmul.f32.gmra.mxu1 %v6819_v44  ;;  %3625 = vmatmul.f32.gmra.mxu0 %v6831_v31  ;;  %v7042_v31 = vpop.f32.mrf.mxu3  ;;  %v7052_v53 = vpop.f32.mrf.mxu2 }
 0x3b3   : > { %3515 = vmatmul.f32.gmra.mxu3 %v4549_v61  ;;  %v7958_v61 = vld [vmem:[#allocation36_spill] sm:$0xff] }
 0x3b7   : > { %v7020_v6 = vpop.f32.mrf.mxu1 }
 0x3b9   : > { %3405 = vmatmul.f32.gmra.mxu2 %v6498_v33  ;;  %v4552_v33 = vld [vmem:[#allocation3 + $0xd7] sm:$0xff] }
 0x3ba   : > { %3693 = vmatmul.f32.gmra.mxu1 %v2587_v14  ;;  %3628 = vmatmul.f32.gmra.mxu0 %v6844_v26  ;;  %v2570_v2 = vmul.f32 %v4552_v33, %v7819_v8  ;;  %v4553_v8 = vld [vmem:[#allocation3 + $0xdf] sm:$0xff]  ;;  %v7067_v42 = vpop.f32.mrf.mxu2  ;;  %v7959_v14 = vld [vmem:[#allocation7_spill] sm:$0xff] }
 0x3bb   : > { %3518 = vmatmul.f32.gmra.mxu3 %v2568_v34  ;;  %v4557_v34 = vld [vmem:[#allocation3 + $0xff] sm:$0xff] }
 0x3bf   : > { %v7027_v0 = vpop.f32.mrf.mxu1 }
 0x3c1   : > { %3408 = vmatmul.f32.gmra.mxu2 %v2535_v37 }
 0x3c2   : > { %3696 = vmatmul.f32.gmra.mxu1 %v6850_v18  ;;  %3631 = vmatmul.f32.gmra.mxu0 %v6862_v63  ;;  %v7952_v18 = vld [vmem:[#allocation53_spill] sm:$0xff]  ;;  %v7082_v56 = vpop.f32.mrf.mxu2 }
 0x3c3   : > { %3521 = vmatmul.f32.gmra.mxu3 %v4551_v7  ;;  %v2537_v63 = vmul.f32 %v7952_v18, %v6551_v62  ;;  %v4554_v62 = vld [vmem:[#allocation3 + $0xe7] sm:$0xff] }
 0x3c7   : > { %v7033_v44 = vpop.f32.mrf.mxu1 }
 0x3c9   : > { %3411 = vmatmul.f32.gmra.mxu2 %v6540_v50  ;;  %v7050_v50 = vpop.f32.mrf.mxu0 }
 0x3ca   : > { %3699 = vmatmul.f32.gmra.mxu1 %v2589_v60  ;;  %3634 = vmatmul.f32.gmra.mxu0 %v6875_v41  ;;  %v7056_v41 = vpop.f32.mrf.mxu3  ;;  %v7096_v37 = vpop.f32.mrf.mxu2  ;;  %v7961_v60 = vld [vmem:[#allocation35_spill] sm:$0xff] }
 0x3cb   : > { %3524 = vmatmul.f32.gmra.mxu3 %v2570_v2  ;;  %v2595_v33 = vmul.f32 %v6951_v49, %v7961_v60  ;;  %v7962_v2 = vld [vmem:[#allocation57_spill] sm:$0xff] }
 0x3cf   : > { %v7044_v26 = vpop.f32.mrf.mxu1 }
 0x3d1   : > { %3414 = vmatmul.f32.gmra.mxu2 %v2537_v63  ;;  %v7963_v63 = vld [vmem:[#allocation13_spill] sm:$0xff] }
 0x3d2   : > { %3702 = vmatmul.f32.gmra.mxu1 %v6881_v35  ;;  %3637 = vmatmul.f32.gmra.mxu0 %v6893_v24  ;;  %v2572_v35 = vmul.f32 %v4554_v62, %v7953_v1  ;;  %v7063_v24 = vpop.f32.mrf.mxu0  ;;  %v7071_v13 = vpop.f32.mrf.mxu3 }
 0x3d3   : > { %3527 = vmatmul.f32.gmra.mxu3 %v4553_v8  ;;  %v7964_v8 = vld [vmem:[#allocation50_spill] sm:$0xff]  ;;  %v7110_v62 = vpop.f32.mrf.mxu2 }
 0x3d7   : > { %v7054_v55 = vpop.f32.mrf.mxu1 }
 0x3d9   : > { %3417 = vmatmul.f32.gmra.mxu2 %v7954_v25  ;;  %v7966_v25 = vld [vmem:[#allocation32_spill] sm:$0xff] }
 0x3da   : > { %3705 = vmatmul.f32.gmra.mxu1 %v2591_v47  ;;  %3640 = vmatmul.f32.gmra.mxu0 %v6906_v3  ;;  %v2593_v3 = vmul.f32 %v6920_v29, %v7930_v20  ;;  %v7079_v28 = vpop.f32.mrf.mxu0  ;;  %v2541_v20 = vmul.f32 %v7960_v59, %v7959_v14  ;;  %v7965_v47 = vld [vmem:[#allocation71_spill] sm:$0xff]  ;;  %v2543_v49 = vmul.f32 %v7967_v57, %v7966_v25 }
 0x3db   : > { %3530 = vmatmul.f32.gmra.mxu3 %v2572_v35 }
 0x3df   : > { %v7065_v12 = vpop.f32.mrf.mxu1 }
 0x3e1   : > { %3420 = vmatmul.f32.gmra.mxu2 %v2539_v9  ;;  %v7968_v9 = vld [vmem:[#allocation27_spill] sm:$0xff] }
 0x3e2   : > { %3708 = vmatmul.f32.gmra.mxu1 %v6912_v22  ;;  %3643 = vmatmul.f32.gmra.mxu0 %v6924_v4  ;;  %v7086_v22 = vpop.f32.mrf.mxu3  ;;  %v7093_v29 = vpop.f32.mrf.mxu0 }
 0x3e3   : > { %3533 = vmatmul.f32.gmra.mxu3 %v4555_v58 }
 0x3e7   : > { %v7075_v54 = vpop.f32.mrf.mxu1 }
 0x3e9   : > { %3423 = vmatmul.f32.gmra.mxu2 %v7958_v61  ;;  %v7127_v61 = vpop.f32.mrf.mxu2 }
 0x3ea   : > { %3711 = vmatmul.f32.gmra.mxu1 %v2593_v3  ;;  %3646 = vmatmul.f32.gmra.mxu0 %v6937_v15  ;;  %v7098_v15 = vpop.f32.mrf.mxu3 }
 0x3eb   : > { %3536 = vmatmul.f32.gmra.mxu3 %v2574_v27  ;;  %v2597_v27 = vmul.f32 %v6982_v10, %v7970_v45  ;;  %v7973_v10 = vld [vmem:[#allocation19_spill] sm:$0xff] }
 0x3ef   : > { %v7088_v4 = vpop.f32.mrf.mxu1 }
 0x3f1   : > { %3426 = vmatmul.f32.gmra.mxu2 %v2541_v20  ;;  %v7131_v20 = vld [vmem:[#allocation3 + $0x109] sm:$0xff] }
 0x3f2   : > { %3714 = vmatmul.f32.gmra.mxu1 %v6943_v46  ;;  %3649 = vmatmul.f32.gmra.mxu0 %v6955_v5  ;;  %v2576_v46 = vmul.f32 %v7963_v63, %v7962_v2  ;;  %v7108_v5 = vpop.f32.mrf.mxu0  ;;  %v7114_v35 = vpop.f32.mrf.mxu3  ;;  %v2547_v63 = vld [vmem:[#allocation3 + $0x11f] sm:$0xff] }
 0x3f3   : > { %3539 = vmatmul.f32.gmra.mxu3 %v4557_v34 }
 0x3f7   : > { %v7100_v7 = vpop.f32.mrf.mxu1 }
 0x3f9   : > { %3429 = vmatmul.f32.gmra.mxu2 %v7964_v8 }
 0x3fa   : > { %3717 = vmatmul.f32.gmra.mxu1 %v2595_v33  ;;  %3652 = vmatmul.f32.gmra.mxu0 %v7965_v47  ;;  %v7121_v58 = vpop.f32.mrf.mxu0  ;;  %v7129_v14 = vpop.f32.mrf.mxu3 }
 0x3fb   : > { %3542 = vmatmul.f32.gmra.mxu3 %v2576_v46  ;;  %v4558_v46 = vld [vmem:[#allocation3 + $0x99] sm:$0xff]  ;;  %v7144_v47 = vpop.f32.mrf.mxu2 }
 0x3ff   : > { %v7112_v1 = vpop.f32.mrf.mxu1 }
 0x401   : > { %3432 = vmatmul.f32.gmra.mxu2 %v2543_v49  ;;  %v4559_v49 = vld [vmem:[#allocation3] sm:$0xff] }
 0x402   : > { %3720 = vmatmul.f32.gmra.mxu1 %v6973_v21  ;;  %3655 = vmatmul.f32.gmra.mxu0 %v6980_v16  ;;  %v7971_v21 = vld [vmem:[#allocation14_spill] sm:$0xff]  ;;  %v7136_v16 = vld [vmem:[#allocation3 + $0x111] sm:$0xff]  ;;  %v7140_v33 = vpop.f32.mrf.mxu0  ;;  %v7148_v45 = vpop.f32.mrf.mxu3 }
 0x403   : > { %3545 = vmatmul.f32.gmra.mxu3 %v7968_v9  ;;  %v2578_v34 = vmul.f32 %v7971_v21, %v2546_v23  ;;  %v2545_v2 = vmul.f32 %v7973_v10, %v7136_v16  ;;  %v7974_v9 = vld [vmem:[#allocation41_spill] sm:$0xff] }
 0x407   : > { %v7123_v3 = vpop.f32.mrf.mxu1 }
 0x408   : > { %7969 = vst [vmem:[#allocation53_spill] sm:$0xff] %v7123_v3 }
 0x409   : > { %3435 = vmatmul.f32.gmra.mxu2 %v7131_v20 }
 0x40a   : > { %3723 = vmatmul.f32.gmra.mxu1 %v2597_v27  ;;  %3658 = vmatmul.f32.gmra.mxu0 %v6993_v32  ;;  %v7975_v32 = vld [vmem:[#allocation42_spill] sm:$0xff] }
 0x40b   : > { %3548 = vmatmul.f32.gmra.mxu3 %v2578_v34  ;;  %v3234_v23 = vadd.f32 %v7975_v32, %v7974_v9  ;;  %v4560_v34 = vld [vmem:[#allocation3 + $0xa1] sm:$0xff] }
 0x40c   : > { %v2599_v17 = vmul.f32 %v4560_v34, %v7949_v52  ;;  %v7979_v52 = vld [vmem:[#allocation47_spill] sm:$0xff]  ;;  %v7178_v34 = vpop.f32.mrf.mxu3 }
 0x40d   : > { %v3347_v27 = vadd.f32 %v7040_v19, %v3234_v23 }
 0x40f   : > { %v7138_v60 = vpop.f32.mrf.mxu1 }
 0x410   : > { %7972 = vst [vmem:[#allocation11_spill] sm:$0xff] %v7138_v60  ;;  %v7155_v60 = vpop.f32.mrf.mxu0 }
 0x411   : > { %3438 = vmatmul.f32.gmra.mxu2 %v2545_v2  ;;  %v7977_v2 = vld [vmem:[#allocation10_spill] sm:$0xff] }
 0x412   : > { %3726 = vmatmul.f32.gmra.mxu1 %v4558_v46  ;;  %3661 = vmatmul.f32.gmra.mxu0 %v4559_v49  ;;  %v3460_v46 = vadd.f32 %v7042_v31, %v3347_v27  ;;  %v3237_v3 = vadd.f32 %v7978_v11, %v7977_v2  ;;  %v4562_v27 = vld [vmem:[#allocation3 + $0xb1] sm:$0xff] }
 0x413   : > { %3551 = vmatmul.f32.gmra.mxu3 %v2547_v63  ;;  %v7982_v2 = vld [vmem:[#allocation55_spill] sm:$0xff] }
 0x414   : > { %v3573_v9 = vadd.f32 %v7050_v50, %v3460_v46  ;;  %v3350_v63 = vadd.f32 %v7052_v53, %v3237_v3  ;;  %v7981_v46 = vld [vmem:[#allocation61_spill] sm:$0xff] }
 0x416   : > { %v3463_v23 = vadd.f32 %v7056_v41, %v3350_v63  ;;  %v2601_v41 = vmul.f32 %v4562_v27, %v7866_v43 }
 0x417   : > { %v7151_v21 = vpop.f32.mrf.mxu1 }
 0x418   : > { %7976 = vst [vmem:[#allocation26_spill] sm:$0xff] %v7151_v21  ;;  %v4561_v21 = vld [vmem:[#allocation3 + $0xa9] sm:$0xff]  ;;  %v3576_v11 = vadd.f32 %v7063_v24, %v3463_v23  ;;  %v7184_v63 = vpop.f32.mrf.mxu0 }
 0x41a   : > { %3729 = vmatmul.f32.gmra.mxu1 %v2599_v17  ;;  %3664 = vmatmul.f32.gmra.mxu0 %v4559_v49  ;;  %v7980_v17 = vld [vmem:[#allocation8_spill] sm:$0xff]  ;;  %v7168_v49 = vpop.f32.mrf.mxu2 }
 0x41b   : > { %v3240_v31 = vadd.f32 %v7980_v17, %v7979_v52  ;;  %v4563_v52 = vld [vmem:[#allocation3 + $0xb9] sm:$0xff]  ;;  %v7983_v17 = vld [vmem:[#allocation51_spill] sm:$0xff] }
 0x41d   : > { %v3353_v50 = vadd.f32 %v7067_v42, %v3240_v31  ;;  %v7984_v31 = vld [vmem:[#allocation16_spill] sm:$0xff] }
 0x41f   : > { %v3685_v32 = vpop.f32.mrf.mxu1 }
 0x420   : > { %v7161_v19 = vadd.f32 %v3685_v32, %v3573_v9  ;;  %v3243_v9 = vadd.f32 %v7982_v2, %v7981_v46  ;;  %v7199_v27 = vpop.f32.mrf.mxu0 }
 0x422   : > { %3732 = vmatmul.f32.gmra.mxu1 %v4561_v21  ;;  %3877 = vrot.lane.b32.xlu2 %v7161_v19, %s4617_s10  ;;  %v3466_v21 = vadd.f32 %v7071_v13, %v3353_v50  ;;  %v3356_v42 = vadd.f32 %v7082_v56, %v3243_v9  ;;  %v7186_v32 = vpop.f32.mrf.mxu2  ;;  %v7985_v9 = vld [vmem:[#allocation62_spill] sm:$0xff] }
 0x424   : > { %v3579_v24 = vadd.f32 %v7079_v28, %v3466_v21  ;;  %v3469_v13 = vadd.f32 %v7086_v22, %v3356_v42  ;;  %v7195_v28 = vpop.f32.mrf.mxu3  ;;  %v4564_v22 = vld [vmem:[#allocation3 + $0xc1] sm:$0xff] }
 0x425   : > { %v2603_v21 = vmul.f32 %v4564_v22, %v7869_v30 }
 0x426   : > { %v3582_v56 = vadd.f32 %v7093_v29, %v3469_v13  ;;  %v7986_v29 = vld [vmem:[#allocation17_spill] sm:$0xff] }
 0x427   : > { %v3688_v53 = vpop.f32.mrf.mxu1 }
 0x428   : > { %v7172_v3 = vadd.f32 %v3688_v53, %v3576_v11  ;;  %v3246_v11 = vadd.f32 %v7984_v31, %v7983_v17  ;;  %v7218_v17 = vpop.f32.mrf.mxu0 }
 0x42a   : > { %3735 = vmatmul.f32.gmra.mxu1 %v2601_v41  ;;  %3879 = vrot.lane.b32.xlu0 %v7172_v3, %s4617_s10  ;;  %v3359_v50 = vadd.f32 %v7096_v37, %v3246_v11  ;;  %v7204_v46 = vpop.f32.mrf.mxu2  ;;  %v7987_v11 = vld [vmem:[#allocation23_spill] sm:$0xff] }
 0x42c   : > { %v3472_v2 = vadd.f32 %v7098_v15, %v3359_v50  ;;  %v4565_v15 = vld [vmem:[#allocation3 + $0xc9] sm:$0xff] }
 0x42e   : > { %v3585_v37 = vadd.f32 %v7108_v5, %v3472_v2  ;;  %v7988_v5 = vld [vmem:[#allocation18_spill] sm:$0xff] }
 0x42f   : > { %v3691_v43 = vpop.f32.mrf.mxu1 }
 0x430   : > { %v7188_v23 = vadd.f32 %v3691_v43, %v3579_v24  ;;  %v3249_v24 = vadd.f32 %v7986_v29, %v7985_v9  ;;  %v7213_v43 = vpop.f32.mrf.mxu3  ;;  %v7989_v29 = vld [vmem:[#allocation29_spill] sm:$0xff] }
 0x432   : > { %3738 = vmatmul.f32.gmra.mxu1 %v4563_v52  ;;  %3881 = vrot.lane.b32.xlu1 %v7188_v23, %s4617_s10  ;;  %v3362_v42 = vadd.f32 %v7110_v62, %v3249_v24  ;;  %v7222_v31 = vpop.f32.mrf.mxu2  ;;  %v7990_v24 = vld [vmem:[#allocation28_spill] sm:$0xff] }
 0x434   : > { %v3475_v30 = vadd.f32 %v7114_v35, %v3362_v42  ;;  %v4566_v35 = vld [vmem:[#allocation3 + $0xd1] sm:$0xff]  ;;  %v3605_v42 = vpop.f32.mrf.mxu0 }
 0x436   : > { %v3588_v62 = vadd.f32 %v7121_v58, %v3475_v30 }
 0x437   : > { %v3694_v53 = vpop.f32.mrf.mxu1 }
 0x438   : > { %v7201_v41 = vadd.f32 %v3694_v53, %v3582_v56  ;;  %v3252_v56 = vadd.f32 %v7988_v5, %v7987_v11  ;;  %v3492_v2 = vpop.f32.mrf.mxu3  ;;  %v4567_v11 = vld [vmem:[#allocation3 + $0xd9] sm:$0xff] }
 0x439   : > { %v7991_v5 = vld [vmem:[#allocation24_spill] sm:$0xff] }
 0x43a   : > { %3741 = vmatmul.f32.gmra.mxu1 %v2603_v21  ;;  %3883 = vrot.lane.b32.xlu2 %v7201_v41, %s4617_s10  ;;  %v3365_v50 = vadd.f32 %v7127_v61, %v3252_v56  ;;  %v2605_v21 = vmul.f32 %v4566_v35, %v7872_v36  ;;  %v3382_v58 = vpop.f32.mrf.mxu2  ;;  %v7992_v56 = vld [vmem:[#allocation63_spill] sm:$0xff] }
 0x43c   : > { %v3478_v9 = vadd.f32 %v7129_v14, %v3365_v50 }
 0x43e   : > { %v3591_v61 = vadd.f32 %v7140_v33, %v3478_v9  ;;  %v4568_v9 = vld [vmem:[#allocation3 + $0xe1] sm:$0xff] }
 0x43f   : > { %v3697_v13 = vpop.f32.mrf.mxu1 }
 0x440   : > { %v7215_v52 = vadd.f32 %v3697_v13, %v3585_v37  ;;  %v3255_v37 = vadd.f32 %v7990_v24, %v7989_v29  ;;  %v3495_v14 = vpop.f32.mrf.mxu3  ;;  %v7993_v24 = vld [vmem:[#allocation43_spill] sm:$0xff] }
 0x442   : > { %3744 = vmatmul.f32.gmra.mxu1 %v4565_v15  ;;  %3885 = vrot.lane.b32.xlu0 %v7215_v52, %s4617_s10  ;;  %v3368_v13 = vadd.f32 %v7144_v47, %v3255_v37  ;;  %v3385_v47 = vpop.f32.mrf.mxu2  ;;  %v7994_v37 = vld [vmem:[#allocation64_spill] sm:$0xff] }
 0x444   : > { %v3481_v36 = vadd.f32 %v7148_v45, %v3368_v13  ;;  %v2607_v45 = vmul.f32 %v4568_v9, %v7952_v18 }
 0x446   : > { %v3594_v50 = vadd.f32 %v7155_v60, %v3481_v36 }
 0x447   : > { %v3700_v53 = vpop.f32.mrf.mxu1 }
 0x448   : > { %v7228_v22 = vadd.f32 %v3700_v53, %v3588_v62  ;;  %v3258_v62 = vadd.f32 %v7992_v56, %v7991_v5  ;;  %v3608_v53 = vpop.f32.mrf.mxu0  ;;  %v3498_v60 = vpop.f32.mrf.mxu3  ;;  %v7995_v56 = vld [vmem:[#allocation45_spill] sm:$0xff] }
 0x44a   : > { %3747 = vmatmul.f32.gmra.mxu1 %v2605_v21  ;;  %3887 = vrot.lane.b32.xlu1 %v7228_v22, %s4617_s10  ;;  %v3371_v33 = vadd.f32 %v7168_v49, %v3258_v62  ;;  %v3388_v5 = vpop.f32.mrf.mxu2  ;;  %v7996_v62 = vld [vmem:[#allocation65_spill] sm:$0xff] }
 0x44c   : > { %v3484_v29 = vadd.f32 %v7178_v34, %v3371_v33  ;;  %v4569_v34 = vld [vmem:[#allocation3 + $0xe9] sm:$0xff] }
 0x44e   : > { %v3597_v49 = vadd.f32 %v7184_v63, %v3484_v29 }
 0x44f   : > { %v3703_v30 = vpop.f32.mrf.mxu1 }
 0x450   : > { %v7238_v15 = vadd.f32 %v3703_v30, %v3591_v61  ;;  %v3261_v61 = vadd.f32 %v7994_v37, %v7993_v24  ;;  %v3611_v36 = vpop.f32.mrf.mxu0 }
 0x452   : > { %3750 = vmatmul.f32.gmra.mxu1 %v4567_v11  ;;  %3889 = vrot.lane.b32.xlu2 %v7238_v15, %s4617_s10  ;;  %v3374_v13 = vadd.f32 %v7186_v32, %v3261_v61  ;;  %v3501_v32 = vpop.f32.mrf.mxu3  ;;  %v3391_v37 = vpop.f32.mrf.mxu2  ;;  %v7997_v61 = vld [vmem:[#allocation44_spill] sm:$0xff] }
 0x454   : > { %v3487_v18 = vadd.f32 %v7195_v28, %v3374_v13 }
 0x456   : > { %v3600_v33 = vadd.f32 %v7199_v27, %v3487_v18  ;;  %v7998_v27 = vld [vmem:[#allocation67_spill] sm:$0xff] }
 0x457   : > { %v3706_v35 = vpop.f32.mrf.mxu1 }
 0x458   : > { %v7247_v21 = vadd.f32 %v3706_v35, %v3594_v50  ;;  %v3264_v50 = vadd.f32 %v7996_v62, %v7995_v56  ;;  %v3614_v24 = vpop.f32.mrf.mxu0  ;;  %v8000_v56 = vld [vmem:[#allocation68_spill] sm:$0xff] }
 0x45a   : > { %3753 = vmatmul.f32.gmra.mxu1 %v2607_v45  ;;  %3891 = vrot.lane.b32.xlu0 %v7247_v21, %s4617_s10  ;;  %v3377_v63 = vadd.f32 %v7204_v46, %v3264_v50  ;;  %v4570_v45 = vld [vmem:[#allocation3 + $0xf1] sm:$0xff] }
 0x45b   : > { %v2609_v29 = vmul.f32 %v4570_v45, %v7956_v39  ;;  %v3504_v39 = vpop.f32.mrf.mxu3 }
 0x45c   : > { %v3490_v28 = vadd.f32 %v7213_v43, %v3377_v63  ;;  %v7999_v43 = vld [vmem:[#allocation40_spill] sm:$0xff] }
 0x45d   : > { %v3270_v62 = vadd.f32 %v8000_v56, %v7999_v43  ;;  %v8004_v43 = vld [vmem:[#allocation72_spill] sm:$0xff] }
 0x45e   : > { %v3603_v46 = vadd.f32 %v7218_v17, %v3490_v28 }
 0x45f   : > { %v3709_v30 = vpop.f32.mrf.mxu1 }
 0x460   : > { %v7257_v11 = vadd.f32 %v3709_v30, %v3597_v49  ;;  %v3267_v49 = vadd.f32 %v7998_v27, %v7997_v61  ;;  %v3617_v50 = vpop.f32.mrf.mxu0  ;;  %v8001_v61 = vld [vmem:[#allocation30_spill] sm:$0xff] }
 0x461   : > { %v8002_v27 = vld [vmem:[#allocation70_spill] sm:$0xff] }
 0x462   : > { %3756 = vmatmul.f32.gmra.mxu1 %v4569_v34  ;;  %3893 = vrot.lane.b32.xlu1 %v7257_v11, %s4617_s10  ;;  %v3380_v13 = vadd.f32 %v7222_v31, %v3267_v49  ;;  %v3383_v31 = vadd.f32 %v3382_v58, %v3270_v62  ;;  %v3273_v49 = vadd.f32 %v8002_v27, %v8001_v61  ;;  %v2582_v27 = vld [vmem:[#allocation3 + $0x119] sm:$0xff] }
 0x464   : > { %v3493_v34 = vadd.f32 %v3492_v2, %v3380_v13  ;;  %v3496_v45 = vadd.f32 %v3495_v14, %v3383_v31  ;;  %v3386_v58 = vadd.f32 %v3385_v47, %v3273_v49 }
 0x466   : > { %v3606_v17 = vadd.f32 %v3605_v42, %v3493_v34  ;;  %v8003_v34 = vld [vmem:[#allocation38_spill] sm:$0xff] }
 0x467   : > { %v3712_v35 = vpop.f32.mrf.mxu1  ;;  %v3276_v56 = vadd.f32 %v8004_v43, %v8003_v34 }
 0x468   : > { %v7266_v9 = vadd.f32 %v3712_v35, %v3600_v33  ;;  %v3394_v33 = vpop.f32.mrf.mxu2  ;;  %v3781_v35 = vld [vmem:[%s7287_s15] sm:$0xff]  ;;  %v3620_v14 = vpop.f32.mrf.mxu0 }
 0x469   : > { %v3813_v28 = vmul.f32 %v3781_v35, %v7161_v19  ;;  %v3499_v19 = vadd.f32 %v3498_v60, %v3386_v58 }
 0x46a   : > { %3759 = vmatmul.f32.gmra.mxu1 %v2609_v29  ;;  %3895 = vrot.lane.b32.xlu2 %v7266_v9, %s4617_s10  ;;  %v3507_v29 = vpop.f32.mrf.mxu3 }
 0x46f   : > { %v3715_v30 = vpop.f32.mrf.mxu1 }
 0x470   : > { %v7276_v18 = vadd.f32 %v3715_v30, %v3603_v46  ;;  %v3397_v46 = vpop.f32.mrf.mxu2  ;;  %v3623_v31 = vpop.f32.mrf.mxu0 }
 0x472   : > { %3762 = vmatmul.f32.gmra.mxu1 %v7964_v8  ;;  %3897 = vrot.lane.b32.xlu0 %v7276_v18, %s4617_s10  ;;  %v2611_v8 = vmul.f32 %v7960_v59, %v7966_v25  ;;  %v3609_v25 = vadd.f32 %v3608_v53, %v3496_v45  ;;  %v3510_v62 = vpop.f32.mrf.mxu3  ;;  %v3389_v53 = vadd.f32 %v3388_v5, %v3276_v56  ;;  %v3782_v56 = vld [vmem:[%s7287_s15 + $0x8] sm:$0xff] }
 0x474   : > { %v3502_v35 = vadd.f32 %v3501_v32, %v3389_v53 }
 0x477   : > { %v3718_v2 = vpop.f32.mrf.mxu1 }
 0x478   : > { %v7289_v63 = vadd.f32 %v3718_v2, %v3606_v17  ;;  %v3612_v17 = vadd.f32 %v3611_v36, %v3499_v19  ;;  %v3400_v60 = vpop.f32.mrf.mxu2 }
 0x47a   : > { %3765 = vmatmul.f32.gmra.mxu1 %v2611_v8  ;;  %3899 = vrot.lane.b32.xlu1 %v7289_v63, %s4617_s10  ;;  %v2613_v8 = vmul.f32 %v7967_v57, %v7136_v16  ;;  %v3513_v5 = vpop.f32.mrf.mxu3  ;;  %v3626_v57 = vpop.f32.mrf.mxu0 }
 0x47c   : > { %v3878_v42 = vpop.permute.xlu2 %3877 }
 0x47d   : > { %v3973_v59 = vadd.f32 %v3878_v42, %v3813_v28  ;;  %v3615_v28 = vadd.f32 %v3614_v24, %v3502_v35  ;;  %v3784_v42 = vld [vmem:[%s7287_s15 + $0x18] sm:$0xff] }
 0x47e   : > { %v3816_v32 = vmul.f32 %v3784_v42, %v7201_v41  ;;  %v8006_v24 = vld [vmem:[#allocation46_spill] sm:$0xff] }
 0x47f   : > { %4005 = vst.msk [vmem:[%s7303_s18] sm:$0xff] %vm546_vm0, %v3973_v59  ;;  %v3721_v13 = vpop.f32.mrf.mxu1 }
 0x480   : > { %v7307_v30 = vadd.f32 %v3721_v13, %v3609_v25  ;;  %v3403_v16 = vpop.f32.mrf.mxu2 }
 0x482   : > { %3768 = vmatmul.f32.gmra.mxu1 %v7131_v20  ;;  %3901 = vrot.lane.b32.xlu2 %v7307_v30, %s4617_s10  ;;  %v8005_v20 = vld [vmem:[#allocation33_spill] sm:$0xff] }
 0x483   : > { %v3279_v45 = vadd.f32 %v6991_v40, %v8005_v20  ;;  %v2583_v40 = vld [vmem:[#allocation3 + $0x121] sm:$0xff] }
 0x484   : > { %v2615_v34 = vmul.f32 %v7973_v10, %v2583_v40  ;;  %v3629_v10 = vpop.f32.mrf.mxu0 }
 0x485   : > { %v3392_v36 = vadd.f32 %v3391_v37, %v3279_v45  ;;  %v3282_v37 = vadd.f32 %v7001_v51, %v8006_v24  ;;  %v3814_v51 = vmul.f32 %v3782_v56, %v7172_v3 }
 0x487   : > { %v3724_v47 = vpop.f32.mrf.mxu1  ;;  %v3505_v59 = vadd.f32 %v3504_v39, %v3392_v36  ;;  %v3395_v19 = vadd.f32 %v3394_v33, %v3282_v37  ;;  %v3787_v37 = vld [vmem:[%s7287_s15 + $0x30] sm:$0xff] }
 0x488   : > { %v7314_v2 = vadd.f32 %v3724_v47, %v3612_v17  ;;  %v3516_v17 = vpop.f32.mrf.mxu3  ;;  %v3406_v47 = vpop.f32.mrf.mxu2 }
 0x489   : > { %v3618_v13 = vadd.f32 %v3617_v50, %v3505_v59  ;;  %v3508_v41 = vadd.f32 %v3507_v29, %v3395_v19  ;;  %v8007_v50 = vld [vmem:[#allocation37_spill] sm:$0xff] }
 0x48a   : > { %3771 = vmatmul.f32.gmra.mxu1 %v2613_v8  ;;  %3903 = vrot.lane.b32.xlu0 %v7314_v2, %s4617_s10  ;;  %v3285_v33 = vadd.f32 %v7007_v48, %v8007_v50 }
 0x48b   : > { %v3621_v35 = vadd.f32 %v3620_v14, %v3508_v41  ;;  %v3785_v41 = vld [vmem:[%s7287_s15 + $0x20] sm:$0xff] }
 0x48c   : > { %v3398_v20 = vadd.f32 %v3397_v46, %v3285_v33 }
 0x48e   : > { %v3511_v36 = vadd.f32 %v3510_v62, %v3398_v20 }
 0x48f   : > { %v3727_v61 = vpop.f32.mrf.mxu1 }
 0x490   : > { %v7322_v49 = vadd.f32 %v3727_v61, %v3615_v28  ;;  %v3783_v28 = vld [vmem:[%s7287_s15 + $0x10] sm:$0xff]  ;;  %v3519_v3 = vpop.f32.mrf.mxu3  ;;  %v3624_v42 = vadd.f32 %v3623_v31, %v3511_v36  ;;  %v3409_v40 = vpop.f32.mrf.mxu2 }
 0x491   : > { %v3815_v48 = vmul.f32 %v3783_v28, %v7188_v23  ;;  %v8008_v61 = vld [vmem:[#allocation9_spill] sm:$0xff]  ;;  %v8009_v23 = vld [vmem:[#allocation15_spill] sm:$0xff] }
 0x492   : > { %3774 = vmatmul.f32.gmra.mxu1 %v2582_v27  ;;  %3905 = vrot.lane.b32.xlu1 %v7322_v49, %s4617_s10  ;;  %v3288_v27 = vadd.f32 %v7014_v38, %v8008_v61  ;;  %v3819_v38 = vmul.f32 %v3787_v37, %v7238_v15  ;;  %v3291_v31 = vadd.f32 %v7020_v6, %v8009_v23  ;;  %v8010_v15 = vld [vmem:[#allocation20_spill] sm:$0xff] }
 0x493   : > { %v3817_v6 = vmul.f32 %v3785_v41, %v7215_v52 }
 0x494   : > { %v3884_v25 = vpop.permute.xlu2 %3883  ;;  %v3401_v59 = vadd.f32 %v3400_v60, %v3288_v27 }
 0x495   : > { %v3976_v58 = vadd.f32 %v3884_v25, %v3816_v32  ;;  %v3632_v32 = vpop.f32.mrf.mxu0 }
 0x496   : > { %v3514_v25 = vadd.f32 %v3513_v5, %v3401_v59 }
 0x497   : > { %4008 = vst.msk [vmem:[%s7303_s18 + $0x18] sm:$0xff] %vm546_vm0, %v3976_v58  ;;  %v3730_v39 = vpop.f32.mrf.mxu1 }
 0x498   : > { %v7333_v43 = vadd.f32 %v3730_v39, %v3618_v13  ;;  %v3522_v58 = vpop.f32.mrf.mxu3  ;;  %v3627_v19 = vadd.f32 %v3626_v57, %v3514_v25  ;;  %v3294_v57 = vadd.f32 %v7027_v0, %v8010_v15 }
 0x49a   : > { %3777 = vmatmul.f32.gmra.mxu1 %v2615_v34  ;;  %3907 = vrot.lane.b32.xlu2 %v7333_v43, %s4617_s10  ;;  %v3404_v34 = vadd.f32 %v3403_v16, %v3291_v31 }
 0x49c   : > { %v3880_v53 = vpop.permute.xlu0 %3879  ;;  %v3517_v50 = vadd.f32 %v3516_v17, %v3404_v34  ;;  %v3786_v17 = vld [vmem:[%s7287_s15 + $0x28] sm:$0xff]  ;;  %v8013_v34 = vld [vmem:[#allocation34_spill] sm:$0xff] }
 0x49d   : > { %v3974_v8 = vadd.f32 %v3880_v53, %v3814_v51  ;;  %v3635_v56 = vpop.f32.mrf.mxu0  ;;  %v3412_v51 = vpop.f32.mrf.mxu2  ;;  %v3818_v0 = vmul.f32 %v3786_v17, %v7228_v22 }
 0x49e   : > { %v3630_v53 = vadd.f32 %v3629_v10, %v3517_v50 }
 0x49f   : > { %4006 = vst.msk [vmem:[%s7303_s18 + $0x8] sm:$0xff] %vm546_vm0, %v3974_v8  ;;  %v3733_v45 = vpop.f32.mrf.mxu1  ;;  %v3407_v8 = vadd.f32 %v3406_v47, %v3294_v57 }
 0x4a0   : > { %v7343_v29 = vadd.f32 %v3733_v45, %v3621_v35  ;;  %v3525_v35 = vpop.f32.mrf.mxu3 }
 0x4a1   : > { %v3520_v28 = vadd.f32 %v3519_v3, %v3407_v8  ;;  %v3790_v3 = vld [vmem:[%s7287_s15 + $0x48] sm:$0xff] }
 0x4a2   : > { %3909 = vrot.lane.b32.xlu0 %v7343_v29, %s4617_s10  ;;  %v3822_v22 = vmul.f32 %v3790_v3, %v7266_v9 }
 0x4a3   : > { %v3633_v27 = vadd.f32 %v3632_v32, %v3520_v28 }
 0x4a4   : > { %v3882_v14 = vpop.permute.xlu1 %3881 }
 0x4a5   : > { %v3975_v46 = vadd.f32 %v3882_v14, %v3815_v48  ;;  %v3638_v36 = vpop.f32.mrf.mxu0  ;;  %v3415_v52 = vpop.f32.mrf.mxu2  ;;  %v8011_v48 = vld [vmem:[#allocation21_spill] sm:$0xff] }
 0x4a6   : > { %v3297_v10 = vadd.f32 %v7033_v44, %v8011_v48  ;;  %v8012_v44 = vld [vmem:[#allocation22_spill] sm:$0xff] }
 0x4a7   : > { %4007 = vst.msk [vmem:[%s7303_s18 + $0x10] sm:$0xff] %vm546_vm0, %v3975_v46  ;;  %v3736_v24 = vpop.f32.mrf.mxu1  ;;  %v3300_v37 = vadd.f32 %v7044_v26, %v8012_v44 }
 0x4a8   : > { %v7353_v62 = vadd.f32 %v3736_v24, %v3624_v42  ;;  %v3410_v14 = vadd.f32 %v3409_v40, %v3297_v10  ;;  %v3528_v59 = vpop.f32.mrf.mxu3  ;;  %v3793_v10 = vld [vmem:[%s7287_s15 + $0x60] sm:$0xff] }
 0x4a9   : > { %v3413_v31 = vadd.f32 %v3412_v51, %v3300_v37  ;;  %v3791_v37 = vld [vmem:[%s7287_s15 + $0x50] sm:$0xff] }
 0x4aa   : > { %3911 = vrot.lane.b32.xlu1 %v7353_v62, %s4617_s10  ;;  %v3523_v24 = vadd.f32 %v3522_v58, %v3410_v14  ;;  %v3788_v58 = vld [vmem:[%s7287_s15 + $0x38] sm:$0xff] }
 0x4ab   : > { %v3820_v26 = vmul.f32 %v3788_v58, %v7247_v21  ;;  %v8014_v21 = vld [vmem:[#allocation25_spill] sm:$0xff] }
 0x4ac   : > { %v3890_v60 = vpop.permute.xlu2 %3889  ;;  %v3636_v23 = vadd.f32 %v3635_v56, %v3523_v24  ;;  %v3306_v8 = vadd.f32 %v7065_v12, %v8014_v21  ;;  %v3825_v12 = vmul.f32 %v3793_v10, %v7307_v30 }
 0x4ad   : > { %v3979_v13 = vadd.f32 %v3890_v60, %v3819_v38  ;;  %v3641_v32 = vpop.f32.mrf.mxu0  ;;  %v3418_v25 = vpop.f32.mrf.mxu2 }
 0x4af   : > { %4011 = vst.msk [vmem:[%s7303_s18 + $0x30] sm:$0xff] %vm546_vm0, %v3979_v13  ;;  %v3739_v39 = vpop.f32.mrf.mxu1 }
 0x4b0   : > { %v7363_v5 = vadd.f32 %v3739_v39, %v3627_v19  ;;  %v3526_v19 = vadd.f32 %v3525_v35, %v3413_v31  ;;  %v3531_v9 = vpop.f32.mrf.mxu3  ;;  %v3303_v39 = vadd.f32 %v7054_v55, %v8013_v34 }
 0x4b2   : > { %3913 = vrot.lane.b32.xlu2 %v7363_v5, %s4617_s10  ;;  %v3639_v51 = vadd.f32 %v3638_v36, %v3526_v19  ;;  %v3416_v50 = vadd.f32 %v3415_v52, %v3303_v39  ;;  %v3419_v36 = vadd.f32 %v3418_v25, %v3306_v8  ;;  %v8016_v25 = vld [vmem:[#allocation66_spill] sm:$0xff]  ;;  %v8018_v8 = vld [vmem:[#allocation69_spill] sm:$0xff] }
 0x4b4   : > { %v3886_v16 = vpop.permute.xlu0 %3885 }
 0x4b5   : > { %v3977_v33 = vadd.f32 %v3886_v16, %v3817_v6  ;;  %v3644_v6 = vpop.f32.mrf.mxu0  ;;  %v3421_v15 = vpop.f32.mrf.mxu2 }
 0x4b7   : > { %4009 = vst.msk [vmem:[%s7303_s18 + $0x20] sm:$0xff] %vm546_vm0, %v3977_v33  ;;  %v3742_v20 = vpop.f32.mrf.mxu1  ;;  %v3789_v33 = vld [vmem:[%s7287_s15 + $0x40] sm:$0xff] }
 0x4b8   : > { %v7373_v45 = vadd.f32 %v3742_v20, %v3630_v53  ;;  %v3529_v53 = vadd.f32 %v3528_v59, %v3416_v50  ;;  %v3821_v55 = vmul.f32 %v3789_v33, %v7257_v11  ;;  %v3534_v20 = vpop.f32.mrf.mxu3  ;;  %v8015_v11 = vld [vmem:[#allocation31_spill] sm:$0xff] }
 0x4ba   : > { %3915 = vrot.lane.b32.xlu0 %v7373_v45, %s4617_s10  ;;  %v3642_v28 = vadd.f32 %v3641_v32, %v3529_v53 }
 0x4bc   : > { %v3888_v47 = vpop.permute.xlu1 %3887 }
 0x4bd   : > { %v3978_v61 = vadd.f32 %v3888_v47, %v3818_v0  ;;  %v3647_v0 = vpop.f32.mrf.mxu0  ;;  %v3424_v47 = vpop.f32.mrf.mxu2 }
 0x4bf   : > { %4010 = vst.msk [vmem:[%s7303_s18 + $0x28] sm:$0xff] %vm546_vm0, %v3978_v61  ;;  %v3745_v46 = vpop.f32.mrf.mxu1  ;;  %v3532_v61 = vadd.f32 %v3531_v9, %v3419_v36 }
 0x4c0   : > { %v7383_v42 = vadd.f32 %v3745_v46, %v3633_v27  ;;  %v3309_v27 = vadd.f32 %v7075_v54, %v8015_v11  ;;  %v3537_v24 = vpop.f32.mrf.mxu3  ;;  %v3823_v54 = vmul.f32 %v3791_v37, %v7276_v18  ;;  %v8020_v11 = vld [vmem:[#allocation53_spill] sm:$0xff] }
 0x4c1   : > { %v3645_v3 = vadd.f32 %v3644_v6, %v3532_v61  ;;  %v3794_v61 = vld [vmem:[%s7287_s15 + $0x68] sm:$0xff] }
 0x4c2   : > { %3917 = vrot.lane.b32.xlu1 %v7383_v42, %s4617_s10  ;;  %v3422_v59 = vadd.f32 %v3421_v15, %v3309_v27 }
 0x4c4   : > { %v3896_v40 = vpop.permute.xlu2 %3895  ;;  %v3535_v32 = vadd.f32 %v3534_v20, %v3422_v59 }
 0x4c5   : > { %v3982_v38 = vadd.f32 %v3896_v40, %v3822_v22  ;;  %v3650_v40 = vpop.f32.mrf.mxu0  ;;  %v3427_v30 = vpop.f32.mrf.mxu2 }
 0x4c7   : > { %4014 = vst.msk [vmem:[%s7303_s18 + $0x48] sm:$0xff] %vm546_vm0, %v3982_v38  ;;  %v3748_v60 = vpop.f32.mrf.mxu1  ;;  %v3312_v38 = vadd.f32 %v7088_v4, %v8016_v25  ;;  %v8017_v4 = vld [vmem:[#allocation39_spill] sm:$0xff]  ;;  %v8021_v25 = vld [vmem:[#allocation60_spill] sm:$0xff] }
 0x4c8   : > { %v7393_v13 = vadd.f32 %v3748_v60, %v3636_v23  ;;  %v3648_v60 = vadd.f32 %v3647_v0, %v3535_v32  ;;  %v3540_v34 = vpop.f32.mrf.mxu3  ;;  %v3795_v32 = vld [vmem:[%s7287_s15 + $0x70] sm:$0xff] }
 0x4c9   : > { %v3425_v58 = vadd.f32 %v3424_v47, %v3312_v38  ;;  %v8022_v38 = vld [vmem:[#allocation11_spill] sm:$0xff] }
 0x4ca   : > { %3919 = vrot.lane.b32.xlu2 %v7393_v13, %s4617_s10 }
 0x4cb   : > { %v3538_v39 = vadd.f32 %v3537_v24, %v3425_v58 }
 0x4cc   : > { %v3892_v56 = vpop.permute.xlu0 %3891 }
 0x4cd   : > { %v3980_v41 = vadd.f32 %v3892_v56, %v3820_v26  ;;  %v3792_v26 = vld [vmem:[%s7287_s15 + $0x58] sm:$0xff]  ;;  %v3315_v56 = vadd.f32 %v7100_v7, %v8017_v4  ;;  %v3430_v50 = vpop.f32.mrf.mxu2  ;;  %v3651_v15 = vadd.f32 %v3650_v40, %v3538_v39 }
 0x4ce   : > { %v3824_v18 = vmul.f32 %v3792_v26, %v7289_v63 }
 0x4cf   : > { %4012 = vst.msk [vmem:[%s7303_s18 + $0x38] sm:$0xff] %vm546_vm0, %v3980_v41  ;;  %v3751_v57 = vpop.f32.mrf.mxu1  ;;  %v3653_v41 = vpop.f32.mrf.mxu0 }
 0x4d0   : > { %v7403_v16 = vadd.f32 %v3751_v57, %v3639_v51  ;;  %v3428_v57 = vadd.f32 %v3427_v30, %v3315_v56  ;;  %v3543_v63 = vpop.f32.mrf.mxu3 }
 0x4d2   : > { %3921 = vrot.lane.b32.xlu0 %v7403_v16, %s4617_s10  ;;  %v3541_v21 = vadd.f32 %v3540_v34, %v3428_v57 }
 0x4d4   : > { %v3894_v35 = vpop.permute.xlu1 %3893 }
 0x4d5   : > { %v3981_v17 = vadd.f32 %v3894_v35, %v3821_v55  ;;  %v3796_v55 = vld [vmem:[%s7287_s15 + $0x78] sm:$0xff]  ;;  %v3318_v35 = vadd.f32 %v7112_v1, %v8018_v8  ;;  %v3433_v0 = vpop.f32.mrf.mxu2  ;;  %v3826_v1 = vmul.f32 %v3794_v61, %v7314_v2  ;;  %v3827_v2 = vmul.f32 %v3795_v32, %v7322_v49  ;;  %v3797_v8 = vld [vmem:[%s7287_s15 + $0x80] sm:$0xff] }
 0x4d6   : > { %v3828_v7 = vmul.f32 %v3796_v55, %v7333_v43  ;;  %v8019_v43 = vld [vmem:[#allocation54_spill] sm:$0xff]  ;;  %v3805_v32 = vld [vmem:[%s7287_s15 + $0xc0] sm:$0xff] }
 0x4d7   : > { %4013 = vst.msk [vmem:[%s7303_s18 + $0x40] sm:$0xff] %vm546_vm0, %v3981_v17  ;;  %v3754_v52 = vpop.f32.mrf.mxu1  ;;  %v3431_v36 = vadd.f32 %v3430_v50, %v3318_v35  ;;  %v3321_v27 = vadd.f32 %v8020_v11, %v8019_v43  ;;  %v8024_v50 = vld [vmem:[#allocation26_spill] sm:$0xff] }
 0x4d8   : > { %v7413_v48 = vadd.f32 %v3754_v52, %v3642_v28  ;;  %v3654_v28 = vadd.f32 %v3653_v41, %v3541_v21  ;;  %v3656_v52 = vpop.f32.mrf.mxu0 }
 0x4d9   : > { %v3434_v24 = vadd.f32 %v3433_v0, %v3321_v27 }
 0x4da   : > { %3923 = vrot.lane.b32.xlu1 %v7413_v48, %s4617_s10 }
 0x4dc   : > { %v3902_v14 = vpop.permute.xlu2 %3901 }
 0x4dd   : > { %v3985_v46 = vadd.f32 %v3902_v14, %v3825_v12  ;;  %v3544_v12 = vadd.f32 %v3543_v63, %v3431_v36  ;;  %v3436_v30 = vpop.f32.mrf.mxu2 }
 0x4df   : > { %4017 = vst.msk [vmem:[%s7303_s18 + $0x60] sm:$0xff] %vm546_vm0, %v3985_v46  ;;  %v3757_v22 = vpop.f32.mrf.mxu1  ;;  %v3546_v46 = vpop.f32.mrf.mxu3  ;;  %v3657_v59 = vadd.f32 %v3656_v52, %v3544_v12 }
 0x4e0   : > { %v7423_v44 = vadd.f32 %v3757_v22, %v3645_v3  ;;  %v3659_v40 = vpop.f32.mrf.mxu0 }
 0x4e2   : > { %3925 = vrot.lane.b32.xlu2 %v7423_v44, %s4617_s10 }
 0x4e4   : > { %v3898_v23 = vpop.permute.xlu0 %3897 }
 0x4e5   : > { %v3983_v31 = vadd.f32 %v3898_v23, %v3823_v54  ;;  %v3547_v54 = vadd.f32 %v3546_v46, %v3434_v24  ;;  %v3324_v23 = vadd.f32 %v8022_v38, %v8021_v25  ;;  %v3439_v49 = vpop.f32.mrf.mxu2  ;;  %v3804_v38 = vld [vmem:[%s7287_s15 + $0xb8] sm:$0xff] }
 0x4e7   : > { %4015 = vst.msk [vmem:[%s7303_s18 + $0x50] sm:$0xff] %vm546_vm0, %v3983_v31  ;;  %v3760_v19 = vpop.f32.mrf.mxu1  ;;  %v3660_v58 = vadd.f32 %v3659_v40, %v3547_v54  ;;  %v3549_v26 = vpop.f32.mrf.mxu3  ;;  %v3837_v40 = vmul.f32 %v3805_v32, %v7423_v44  ;;  %v3803_v54 = vld [vmem:[%s7287_s15 + $0xb0] sm:$0xff] }
 0x4e8   : > { %v7433_v9 = vadd.f32 %v3760_v19, %v3648_v60  ;;  %v3437_v19 = vadd.f32 %v3436_v30, %v3324_v23  ;;  %v3662_v4 = vpop.f32.mrf.mxu0  ;;  %v3836_v23 = vmul.f32 %v3804_v38, %v7413_v48 }
 0x4ea   : > { %3927 = vrot.lane.b32.xlu0 %v7433_v9, %s4617_s10  ;;  %v3550_v56 = vadd.f32 %v3549_v26, %v3437_v19  ;;  %v3806_v26 = vld [vmem:[%s7287_s15 + $0xc8] sm:$0xff] }
 0x4ec   : > { %v3900_v51 = vpop.permute.xlu1 %3899 }
 0x4ed   : > { %v3984_v6 = vadd.f32 %v3900_v51, %v3824_v18  ;;  %v3799_v18 = vld [vmem:[%s7287_s15 + $0x90] sm:$0xff] }
 0x4ee   : > { %v3831_v41 = vmul.f32 %v3799_v18, %v7363_v5  ;;  %v8023_v51 = vld [vmem:[#allocation73_spill] sm:$0xff] }
 0x4ef   : > { %4016 = vst.msk [vmem:[%s7303_s18 + $0x58] sm:$0xff] %vm546_vm0, %v3984_v6  ;;  %v3763_v33 = vpop.f32.mrf.mxu1  ;;  %v3327_v6 = vadd.f32 %v8024_v50, %v8023_v51  ;;  %v3552_v21 = vpop.f32.mrf.mxu3 }
 0x4f0   : > { %v7443_v53 = vadd.f32 %v3763_v33, %v3651_v15  ;;  %v3663_v33 = vadd.f32 %v3662_v4, %v3550_v56  ;;  %v3665_v5 = vpop.f32.mrf.mxu0  ;;  %v3807_v4 = vld [vmem:[%s7287_s15 + $0xd0] sm:$0xff] }
 0x4f1   : > { %v3440_v55 = vadd.f32 %v3439_v49, %v3327_v6  ;;  %v3809_v6 = vld [vmem:[%s7287_s15 + $0xe0] sm:$0xff] }
 0x4f2   : > { %3929 = vrot.lane.b32.xlu1 %v7443_v53, %s4617_s10  ;;  %v3839_v56 = vmul.f32 %v3807_v4, %v7443_v53  ;;  %v3810_v53 = vld [vmem:[%s7287_s15 + $0xe8] sm:$0xff] }
 0x4f3   : > { %v3553_v35 = vadd.f32 %v3552_v21, %v3440_v55 }
 0x4f4   : > { %v3908_v20 = vpop.permute.xlu2 %3907 }
 0x4f5   : > { %v3988_v17 = vadd.f32 %v3908_v20, %v3828_v7  ;;  %v3829_v20 = vmul.f32 %v3797_v8, %v7343_v29  ;;  %v3666_v36 = vadd.f32 %v3665_v5, %v3553_v35 }
 0x4f7   : > { %4020 = vst.msk [vmem:[%s7303_s18 + $0x78] sm:$0xff] %vm546_vm0, %v3988_v17  ;;  %v3766_v10 = vpop.f32.mrf.mxu1 }
 0x4f8   : > { %v7453_v47 = vadd.f32 %v3766_v10, %v3654_v28  ;;  %v3798_v10 = vld [vmem:[%s7287_s15 + $0x88] sm:$0xff] }
 0x4f9   : > { %v3830_v61 = vmul.f32 %v3798_v10, %v7353_v62 }
 0x4fa   : > { %3931 = vrot.lane.b32.xlu2 %v7453_v47, %s4617_s10 }
 0x4fc   : > { %v3904_v14 = vpop.permute.xlu0 %3903 }
 0x4fd   : > { %v3986_v3 = vadd.f32 %v3904_v14, %v3826_v1  ;;  %v3802_v1 = vld [vmem:[%s7287_s15 + $0xa8] sm:$0xff]  ;;  %v3800_v14 = vld [vmem:[%s7287_s15 + $0x98] sm:$0xff] }
 0x4fe   : > { %v3834_v43 = vmul.f32 %v3802_v1, %v7393_v13  ;;  %v3832_v46 = vmul.f32 %v3800_v14, %v7373_v45 }
 0x4ff   : > { %4018 = vst.msk [vmem:[%s7303_s18 + $0x68] sm:$0xff] %vm546_vm0, %v3986_v3  ;;  %v3769_v22 = vpop.f32.mrf.mxu1 }
 0x500   : > { %v7463_v37 = vadd.f32 %v3769_v22, %v3657_v59  ;;  %v3801_v59 = vld [vmem:[%s7287_s15 + $0xa0] sm:$0xff] }
 0x501   : > { %v3833_v24 = vmul.f32 %v3801_v59, %v7383_v42 }
 0x502   : > { %3933 = vrot.lane.b32.xlu0 %v7463_v37, %s4617_s10 }
 0x504   : > { %v3906_v31 = vpop.permute.xlu1 %3905 }
 0x505   : > { %v3987_v60 = vadd.f32 %v3906_v31, %v3827_v2  ;;  %v3835_v2 = vmul.f32 %v3803_v54, %v7403_v16 }
 0x507   : > { %4019 = vst.msk [vmem:[%s7303_s18 + $0x70] sm:$0xff] %vm546_vm0, %v3987_v60  ;;  %v3772_v34 = vpop.f32.mrf.mxu1  ;;  %v3808_v60 = vld [vmem:[%s7287_s15 + $0xd8] sm:$0xff] }
 0x508   : > { %v7473_v39 = vadd.f32 %v3772_v34, %v3660_v58  ;;  %v3840_v58 = vmul.f32 %v3808_v60, %v7453_v47  ;;  %v3838_v34 = vmul.f32 %v3806_v26, %v7433_v9 }
 0x50a   : > { %3935 = vrot.lane.b32.xlu1 %v7473_v39, %s4617_s10  ;;  %v3842_v55 = vmul.f32 %v3810_v53, %v7473_v39 }
 0x50c   : > { %v3914_v15 = vpop.permute.xlu2 %3913 }
 0x50d   : > { %v3991_v57 = vadd.f32 %v3914_v15, %v3831_v41  ;;  %v3811_v41 = vld [vmem:[%s7287_s15 + $0xf0] sm:$0xff]  ;;  %v3841_v15 = vmul.f32 %v3809_v6, %v7463_v37 }
 0x50f   : > { %4023 = vst.msk [vmem:[%s7303_s18 + $0x90] sm:$0xff] %vm546_vm0, %v3991_v57  ;;  %v3775_v63 = vpop.f32.mrf.mxu1 }
 0x510   : > { %v7483_v7 = vadd.f32 %v3775_v63, %v3663_v33 }
 0x512   : > { %3937 = vrot.lane.b32.xlu2 %v7483_v7, %s4617_s10  ;;  %v3843_v51 = vmul.f32 %v3811_v41, %v7483_v7  ;;  %v3812_v7 = vld [vmem:[%s7287_s15 + $0xf8] sm:$0xff] }
 0x514   : > { %v3910_v17 = vpop.permute.xlu0 %3909 }
 0x515   : > { %v3989_v28 = vadd.f32 %v3910_v17, %v3829_v20 }
 0x517   : > { %4021 = vst.msk [vmem:[%s7303_s18 + $0x80] sm:$0xff] %vm546_vm0, %v3989_v28  ;;  %v3778_v52 = vpop.f32.mrf.mxu1 }
 0x518   : > { %v7491_v0 = vadd.f32 %v3778_v52, %v3666_v36 }
 0x51a   : > { %3939 = vrot.lane.b32.xlu0 %v7491_v0, %s4617_s10  ;;  %v3844_v8 = vmul.f32 %v3812_v7, %v7491_v0 }
 0x51c   : > { %v3912_v12 = vpop.permute.xlu1 %3911 }
 0x51d   : > { %v3990_v29 = vadd.f32 %v3912_v12, %v3830_v61 }
 0x51f   : > { %4022 = vst.msk [vmem:[%s7303_s18 + $0x88] sm:$0xff] %vm546_vm0, %v3990_v29 }
 0x524   : > { %v3920_v11 = vpop.permute.xlu2 %3919 }
 0x525   : > { %v3994_v27 = vadd.f32 %v3920_v11, %v3834_v43 }
 0x527   : > { %4026 = vst.msk [vmem:[%s7303_s18 + $0xa8] sm:$0xff] %vm546_vm0, %v3994_v27 }
 0x52c   : > { %v3916_v3 = vpop.permute.xlu0 %3915 }
 0x52d   : > { %v3992_v62 = vadd.f32 %v3916_v3, %v3832_v46 }
 0x52f   : > { %4024 = vst.msk [vmem:[%s7303_s18 + $0x98] sm:$0xff] %vm546_vm0, %v3992_v62 }
 0x534   : > { %v3918_v22 = vpop.permute.xlu1 %3917 }
 0x535   : > { %v3993_v13 = vadd.f32 %v3918_v22, %v3833_v24 }
 0x537   : > { %4025 = vst.msk [vmem:[%s7303_s18 + $0xa0] sm:$0xff] %vm546_vm0, %v3993_v13 }
 0x53c   : > { %v3926_v30 = vpop.permute.xlu2 %3925 }
 0x53d   : > { %v3997_v45 = vadd.f32 %v3926_v30, %v3837_v40 }
 0x53f   : > { %4029 = vst.msk [vmem:[%s7303_s18 + $0xc0] sm:$0xff] %vm546_vm0, %v3997_v45 }
 0x544   : > { %v3922_v25 = vpop.permute.xlu0 %3921 }
 0x545   : > { %v3995_v42 = vadd.f32 %v3922_v25, %v3835_v2 }
 0x547   : > { %4027 = vst.msk [vmem:[%s7303_s18 + $0xb0] sm:$0xff] %vm546_vm0, %v3995_v42 }
 0x54c   : > { %v3924_v31 = vpop.permute.xlu1 %3923 }
 0x54d   : > { %v3996_v44 = vadd.f32 %v3924_v31, %v3836_v23 }
 0x54f   : > { %4028 = vst.msk [vmem:[%s7303_s18 + $0xb8] sm:$0xff] %vm546_vm0, %v3996_v44 }
 0x554   : > { %v3932_v19 = vpop.permute.xlu2 %3931 }
 0x555   : > { %v4000_v16 = vadd.f32 %v3932_v19, %v3840_v58 }
 0x557   : > { %4032 = vst.msk [vmem:[%s7303_s18 + $0xd8] sm:$0xff] %vm546_vm0, %v4000_v16 }
 0x55c   : > { %v3928_v18 = vpop.permute.xlu0 %3927 }
 0x55d   : > { %v3998_v48 = vadd.f32 %v3928_v18, %v3838_v34 }
 0x55f   : > { %4030 = vst.msk [vmem:[%s7303_s18 + $0xc8] sm:$0xff] %vm546_vm0, %v3998_v48 }
 0x564   : > { %v3930_v49 = vpop.permute.xlu1 %3929 }
 0x565   : > { %v3999_v47 = vadd.f32 %v3930_v49, %v3839_v56 }
 0x567   : > { %4031 = vst.msk [vmem:[%s7303_s18 + $0xd0] sm:$0xff] %vm546_vm0, %v3999_v47 }
 0x56c   : > { %v3938_v50 = vpop.permute.xlu2 %3937 }
 0x56d   : > { %v4003_v9 = vadd.f32 %v3938_v50, %v3843_v51 }
 0x56f   : > { %4035 = vst.msk [vmem:[%s7303_s18 + $0xf0] sm:$0xff] %vm546_vm0, %v4003_v9 }
 0x574   : > { %v3934_v57 = vpop.permute.xlu0 %3933 }
 0x575   : > { %v4001_v33 = vadd.f32 %v3934_v57, %v3841_v15 }
 0x577   : > { %4033 = vst.msk [vmem:[%s7303_s18 + $0xe0] sm:$0xff] %vm546_vm0, %v4001_v33 }
 0x57c   : > { %v3936_v21 = vpop.permute.xlu1 %3935 }
 0x57d   : > { %v4002_v63 = vadd.f32 %v3936_v21, %v3842_v55 }
 0x57f   : > { %4034 = vst.msk [vmem:[%s7303_s18 + $0xe8] sm:$0xff] %vm546_vm0, %v4002_v63 }
 0x58c   : > { %v3940_v35 = vpop.permute.xlu0 %3939 }
 0x58d   : > { %v4004_v5 = vadd.f32 %v3940_v35, %v3844_v8 }
 0x58f   : > { %4036 = vst.msk [vmem:[%s7303_s18 + $0xf8] sm:$0xff] %vm546_vm0, %v4004_v5 }
 0x590 PF: > { %s17_s21 = sadd.s32 1, %s4611_s21  }
 0x591   : > { %p14_p7 = scmp.ge.s32.totalorder %s17_s21, 4  }
 0x593   :  { %16 = sbr.rel (!%p14_p7) target bundleno = 1 (0x1), region = 82 }
 0x598   :  { %4058 = vsyncpa [#allocation5], 1 }
 0x599   :  { %4060 = vsyncpa [#allocation5 + $0x1], 1 }

</bundles_post_ra>
